<compile_context>
chip_gen: v5e
topology: v5e:2x2
jax: 0.10.0
libtpu: 0.0.40
codegen_flags: <defaults>
</compile_context>

<pallas_src>
import numpy as np
import jax
import jax.numpy as jnp
from jax import lax
from jax.experimental import pallas as pl
from jax.experimental.pallas import tpu as pltpu

ACT_DTYPE = jnp.bfloat16     # activations / weights at kernel boundaries
LN_EPS = 1e-5
NEG_FILL = -1e9              # masked_fill value (finite, matches full-score form)


def _layernorm(z, g, b):
    mean = jnp.mean(z, axis=-1, keepdims=True)
    var = jnp.mean((z - mean) ** 2, axis=-1, keepdims=True)
    return (z - mean) * lax.rsqrt(var + LN_EPS) * g + b


def _pick_tile(length, pref):
    """Largest multiple-of-8 divisor of `length` that is <= pref, else full length."""
    if length <= pref:
        return length
    for t in range(pref, 7, -8):
        if length % t == 0:
            return t
    return length


# ----------------------------------------------------------------------------
# Fused attention-block kernel (flash / online softmax), optionally + FFN:
#   init (kv==0):    q = (xq@Wq + bq) * scale            -> VMEM scratch
#   update (per kv): [k|v] = xkv_tile @ Wkv + bkv ; per-head online softmax
#   finalize (last): out = sum_h (acc_h / l_h) @ Wo_h ; residual + LN
#                    [+ fused FFN: LN(x + relu(x@W1+b1)@W2+b2)]
# Grid: (B, n_q_tiles, n_kv_tiles); kv axis is the reduction ("arbitrary", last).
# ----------------------------------------------------------------------------
def _make_mha_kernel(*, num_heads, dh, scale, causal, tq, tk, fuse_ffn):
    def kernel(lens_ref, xq_ref, xkv_ref,
               wq_ref, bq_ref, wkv_ref, bkv_ref, wo_ref, bo_ref,
               g1_ref, bln1_ref, *rest):
        if fuse_ffn:
            (w1_ref, bf1_ref, w2_ref, bf2_ref, g2_ref, bln2_ref,
             out_ref, q_sc, m_sc, l_sc, acc_sc) = rest
        else:
            (out_ref, q_sc, m_sc, l_sc, acc_sc) = rest

        b = pl.program_id(0)
        qi = pl.program_id(1)
        kvi = pl.program_id(2)
        n_kv = pl.num_programs(2)
        cdt = xq_ref.dtype
        D = wq_ref.shape[0]

        # ---- init: project Q once per (b, qi) tile; reset online-softmax state
        @pl.when(kvi == 0)
        def _init():
            q = jnp.dot(xq_ref[0], wq_ref[...],
                        preferred_element_type=jnp.float32) + bq_ref[...]
            q_sc[...] = (q * scale).astype(cdt)          # fold 1/sqrt(dh) into q
            m_sc[...] = jnp.full_like(m_sc, -jnp.inf)
            l_sc[...] = jnp.zeros_like(l_sc)
            acc_sc[...] = jnp.zeros_like(acc_sc)

        kv_len = lens_ref[b]                             # SMEM scalar (prefetched)
        kv_start = kvi * tk
        live = kv_start < kv_len                         # skip fully padded tiles
        if causal:
            live = jnp.logical_and(live, kv_start <= qi * tq + (tq - 1))

        # ---- online-softmax update over this KV tile
        @pl.when(live)
        def _update():
            kv = jnp.dot(xkv_ref[0], wkv_ref[...],
                         preferred_element_type=jnp.float32) + bkv_ref[...]
            k = kv[:, :D].astype(cdt)
            v = kv[:, D:].astype(cdt)
            # mask built in-kernel: key padding (+ causal) — no HBM mask stream
            col = kv_start + lax.broadcasted_iota(jnp.int32, (tq, tk), 1)
            masked = col >= kv_len
            if causal:
                row = qi * tq + lax.broadcasted_iota(jnp.int32, (tq, tk), 0)
                masked = jnp.logical_or(masked, col > row)
            for h in range(num_heads):
                sl = slice(h * dh, (h + 1) * dh)
                s = lax.dot_general(q_sc[:, sl], k[:, sl],
                                    (((1,), (1,)), ((), ())),     # K^T on the MXU
                                    preferred_element_type=jnp.float32)
                s = jnp.where(masked, NEG_FILL, s)
                m_old = m_sc[h]
                m_new = jnp.maximum(m_old, jnp.max(s, axis=-1, keepdims=True))
                alpha = jnp.exp(m_old - m_new)
                p = jnp.exp(s - m_new)
                l_sc[h] = alpha * l_sc[h] + jnp.sum(p, axis=-1, keepdims=True)
                acc_sc[h] = alpha * acc_sc[h] + jnp.dot(
                    p.astype(cdt), v[:, sl], preferred_element_type=jnp.float32)
                m_sc[h] = m_new

        # ---- finalize: per-head accumulate into Wo (no concat), residual + LN,
        #      and (for the cross-attention call) the fused position-wise FFN.
        @pl.when(kvi == n_kv - 1)
        def _finalize():
            o = jnp.zeros((tq, D), jnp.float32)
            for h in range(num_heads):
                inv_l = pl.reciprocal(l_sc[h], approx=True)        # EUP
                ctx = (acc_sc[h] * inv_l).astype(cdt)              # [tq, dh]
                o = o + jnp.dot(ctx, wo_ref[h * dh:(h + 1) * dh, :],
                                preferred_element_type=jnp.float32)
            o = o + bo_ref[...]
            z = _layernorm(xq_ref[0].astype(jnp.float32) + o,
                           g1_ref[...], bln1_ref[...])
            if fuse_ffn:
                x = z.astype(cdt)
                h1 = jnp.dot(x, w1_ref[...],
                             preferred_element_type=jnp.float32) + bf1_ref[...]
                h1 = jnp.maximum(h1, 0.0).astype(cdt)              # bf16 immediately
                y = jnp.dot(h1, w2_ref[...],
                            preferred_element_type=jnp.float32) + bf2_ref[...]
                z = _layernorm(z + y, g2_ref[...], bln2_ref[...])
            out_ref[0] = z.astype(out_ref.dtype)

    return kernel


def mha_block(x_q, x_kv, kv_lens, attn_p, num_heads, *, causal, ffn_p=None):
    """One fused pallas_call: QKV proj + flash attention + Wo + residual + LN
    (+ fused FFN + residual + LN when ffn_p is given)."""
    B, Lq, D = x_q.shape
    Lk = x_kv.shape[1]
    assert D % num_heads == 0
    dh = D // num_heads
    tq = _pick_tile(Lq, 256)       # Lq-parallel axis (megacore) + bounded VMEM
    tk = _pick_tile(Lk, 512)       # KV reduction tile
    n_q, n_kv = Lq // tq, Lk // tk
    fuse_ffn = ffn_p is not None

    kernel = _make_mha_kernel(num_heads=num_heads, dh=dh, scale=float(dh) ** -0.5,
                              causal=causal, tq=tq, tk=tk, fuse_ffn=fuse_ffn)

    weights = [attn_p["wq"], attn_p["bq"], attn_p["wkv"], attn_p["bkv"],
               attn_p["wo"], attn_p["bo"], attn_p["ln_g"], attn_p["ln_b"]]
    if fuse_ffn:
        weights += [ffn_p["w1"], ffn_p["b1"], ffn_p["w2"], ffn_p["b2"],
                    ffn_p["ln_g"], ffn_p["ln_b"]]
    wspec = lambda b, qi, kvi, lens: (0, 0)     # weights pinned (resident in VMEM)

    grid_spec = pltpu.PrefetchScalarGridSpec(
        num_scalar_prefetch=1,                  # kv_lens -> SMEM
        grid=(B, n_q, n_kv),
        in_specs=[pl.BlockSpec((1, tq, D), lambda b, qi, kvi, lens: (b, qi, 0)),
                  pl.BlockSpec((1, tk, D), lambda b, qi, kvi, lens: (b, kvi, 0))]
                 + [pl.BlockSpec(w.shape, wspec) for w in weights],
        out_specs=pl.BlockSpec((1, tq, D), lambda b, qi, kvi, lens: (b, qi, 0)),
        scratch_shapes=[
            pltpu.VMEM((tq, D), ACT_DTYPE),                  # scaled Q
            pltpu.VMEM((num_heads, tq, 1), jnp.float32),     # running max  m
            pltpu.VMEM((num_heads, tq, 1), jnp.float32),     # running sum  l
            pltpu.VMEM((num_heads, tq, dh), jnp.float32),    # context acc
        ],
    )
    out = pl.pallas_call(
        kernel,
        out_shape=jax.ShapeDtypeStruct((B, Lq, D), ACT_DTYPE),
        grid_spec=grid_spec,
        compiler_params=pltpu.CompilerParams(
            dimension_semantics=("parallel", "parallel", "arbitrary"),
            vmem_limit_bytes=48 * 1024 * 1024),
    )(jnp.maximum(kv_lens.astype(jnp.int32), 1), x_q, x_kv, *weights)
    return out


# ----------------------------------------------------------------------------
# Model glue (plain JAX: embedding/positional gathers, layer loop) — jittable.
# ----------------------------------------------------------------------------
def build_pos_encoding_table(max_seq_len, d_model):
    pos = np.arange(max_seq_len)[:, None].astype(np.float64)
    j = np.arange(d_model)[None, :]
    angle = pos / np.power(10000.0, 2.0 * (j // 2) / d_model)
    pe = np.zeros((max_seq_len, d_model))
    pe[:, 0::2] = np.sin(angle[:, 0::2])
    pe[:, 1::2] = np.cos(angle[:, 1::2])
    pe = np.concatenate([np.zeros((1, d_model)), pe], axis=0)   # row 0 = padding pos
    return jnp.asarray(pe, jnp.float32)


def positional_encoding(input_lens, pos_table, max_len):
    ar = jnp.arange(1, max_len + 1)[None, :]
    pos = jnp.where(ar <= input_lens[:, None], ar, 0)           # 0 -> zero row
    return pos_table[pos]


def decoder_forward(inputs, input_lens, enc_output, params, num_heads,
                    context_attn_mask=None):
    # inputs: [B, L] int token ids (0 = padding)
    B, L = inputs.shape
    output = params["seq_emb"][inputs]
    output = output + positional_encoding(input_lens, params["pos_table"], L)
    output = output.astype(ACT_DTYPE)
    enc_output = enc_output.astype(ACT_DTYPE)

    # Self-attn mask = causal + key padding, built *inside* the kernel from these
    # per-batch key lengths (matches padding_mask(seq_k==0) for suffix padding).
    dec_key_lens = jnp.maximum(jnp.sum(inputs != 0, axis=1).astype(jnp.int32), 1)
    # Reference call path passes context_attn_mask=None -> no encoder-key masking.
    enc_key_lens = jnp.full((B,), enc_output.shape[1], jnp.int32)
    # TODO(synk): arbitrary dense context_attn_mask / interior-zero padding would
    # require streaming a mask; only key-length masks are supported (per perf review).

    self_attentions, context_attentions = [], []
    for lp in params["layers"]:
        # self-attention (same shared attention weights as cross-attention)
        output = mha_block(output, output, dec_key_lens, lp["attn"], num_heads,
                           causal=True)
        # cross-attention + position-wise FFN fused into one kernel
        output = mha_block(output, enc_output, enc_key_lens, lp["attn"], num_heads,
                           causal=False, ffn_p=lp["ffn"])
        # Attention-probability maps are not materialized (perf review item #1);
        # the reference's returned lists are degenerate (appends the list itself).
        self_attentions.append(None)
        context_attentions.append(None)
    return output.astype(jnp.float32), self_attentions, context_attentions


# ----------------------------------------------------------------------------
# Deterministic parameter init (weights bf16, biases / LN params f32)
# ----------------------------------------------------------------------------
def init_params(key, vocab_size, max_sep_len, num_layers, model_dim, ffn_dim):
    keys = jax.random.split(key, 1 + num_layers)
    emb = 0.02 * jax.random.normal(keys[0], (vocab_size + 1, model_dim), jnp.float32)
    emb = emb.at[0].set(0.0)                                    # padding_idx=0
    pos_table = build_pos_encoding_table(max_sep_len, model_dim)

    def lin(k, din, dout):
        return (0.05 * jax.random.normal(k, (din, dout), jnp.float32)).astype(ACT_DTYPE)

    layers = []
    for li in range(num_layers):
        ks = jax.random.split(keys[1 + li], 5)
        attn = dict(
            wq=lin(ks[0], model_dim, model_dim),
            bq=jnp.zeros((1, model_dim), jnp.float32),
            wkv=lin(ks[1], model_dim, 2 * model_dim),           # [Wk | Wv] fused
            bkv=jnp.zeros((1, 2 * model_dim), jnp.float32),
            wo=lin(ks[2], model_dim, model_dim),
            bo=jnp.zeros((1, model_dim), jnp.float32),
            ln_g=jnp.ones((1, model_dim), jnp.float32),
            ln_b=jnp.zeros((1, model_dim), jnp.float32),
        )
        ffn = dict(
            w1=lin(ks[3], model_dim, ffn_dim),
            b1=jnp.zeros((1, ffn_dim), jnp.float32),
            w2=lin(ks[4], ffn_dim, model_dim),
            b2=jnp.zeros((1, model_dim), jnp.float32),
            ln_g=jnp.ones((1, model_dim), jnp.float32),
            ln_b=jnp.zeros((1, model_dim), jnp.float32),
        )
        layers.append(dict(attn=attn, ffn=ffn))
    return dict(seq_emb=emb, pos_table=pos_table, layers=layers)


# ----------------------------------------------------------------------------
if __name__ == "__main__":
    key = jax.random.PRNGKey(0)
    vocab_size, max_sep_len = 11, 16
    # lane-dense model_dim (stored last dims are full 128-lane tiles); dh = 64
    num_layers, model_dim, num_heads, ffn_dim = 2, 128, 2, 256
    B, L = 2, 8

    params = init_params(key, vocab_size, max_sep_len, num_layers, model_dim, ffn_dim)

    inputs = jnp.array([[3, 5, 2, 7, 1, 4, 9, 6],
                        [2, 8, 4, 1, 6, 3, 0, 0]], jnp.int32)   # 0 = padding
    input_lens = jnp.array([8, 6], jnp.int32)
    enc_output = jax.random.normal(jax.random.fold_in(key, 1), (B, L, model_dim),
                                   jnp.float32)

    fwd = jax.jit(decoder_forward, static_argnums=(4,))
    out, self_attns, ctx_attns = fwd(inputs, input_lens, enc_output, params, num_heads)
    out = jax.block_until_ready(out)

    assert out.shape == (B, L, model_dim)
    assert len(self_attns) == num_layers and len(ctx_attns) == num_layers
    assert bool(jnp.all(jnp.isfinite(out)))
    print("KERNEL_OK")
</pallas_src>

<mosaic_0001>
module attributes {stable_mosaic.version = 11 : i64} {
  func.func @kernel(%arg0: i32, %arg1: i32, %arg2: i32, %arg3: memref<2xi32, #tpu.memory_space<smem>>, %arg4: memref<1x8x128xbf16, #tpu.memory_space<vmem>>, %arg5: memref<1x8x128xbf16, #tpu.memory_space<vmem>>, %arg6: memref<128x128xbf16, #tpu.memory_space<vmem>>, %arg7: memref<1x128xf32, #tpu.memory_space<vmem>>, %arg8: memref<128x256xbf16, #tpu.memory_space<vmem>>, %arg9: memref<1x256xf32, #tpu.memory_space<vmem>>, %arg10: memref<128x128xbf16, #tpu.memory_space<vmem>>, %arg11: memref<1x128xf32, #tpu.memory_space<vmem>>, %arg12: memref<1x128xf32, #tpu.memory_space<vmem>>, %arg13: memref<1x128xf32, #tpu.memory_space<vmem>>, %arg14: memref<128x256xbf16, #tpu.memory_space<vmem>>, %arg15: memref<1x256xf32, #tpu.memory_space<vmem>>, %arg16: memref<256x128xbf16, #tpu.memory_space<vmem>>, %arg17: memref<1x128xf32, #tpu.memory_space<vmem>>, %arg18: memref<1x128xf32, #tpu.memory_space<vmem>>, %arg19: memref<1x128xf32, #tpu.memory_space<vmem>>, %arg20: memref<1x8x128xbf16, #tpu.memory_space<vmem>>, %arg21: memref<8x128xbf16, #tpu.memory_space<vmem>>, %arg22: memref<2x8x1xf32, #tpu.memory_space<vmem>>, %arg23: memref<2x8x1xf32, #tpu.memory_space<vmem>>, %arg24: memref<2x8x64xf32, #tpu.memory_space<vmem>>) attributes {dimension_semantics = [#tpu.dimension_semantics<parallel>, #tpu.dimension_semantics<parallel>, #tpu.dimension_semantics<arbitrary>], iteration_bounds = array<i64: 2, 1, 1>, scalar_prefetch = 1 : i64, scratch_operands = 4 : i64, tpu.core_type = #tpu.core_type<tc>, window_params = [{transform_indices = @transform_0, window_bounds = array<i64: 1, 8, 128>}, {transform_indices = @transform_1, window_bounds = array<i64: 1, 8, 128>}, {pipeline_mode = #tpu.pipeline_mode<synchronous>, transform_indices = @transform_2, window_bounds = array<i64: 128, 128>}, {pipeline_mode = #tpu.pipeline_mode<synchronous>, transform_indices = @transform_3, window_bounds = array<i64: 1, 128>}, {pipeline_mode = #tpu.pipeline_mode<synchronous>, transform_indices = @transform_4, window_bounds = array<i64: 128, 256>}, {pipeline_mode = #tpu.pipeline_mode<synchronous>, transform_indices = @transform_5, window_bounds = array<i64: 1, 256>}, {pipeline_mode = #tpu.pipeline_mode<synchronous>, transform_indices = @transform_6, window_bounds = array<i64: 128, 128>}, {pipeline_mode = #tpu.pipeline_mode<synchronous>, transform_indices = @transform_7, window_bounds = array<i64: 1, 128>}, {pipeline_mode = #tpu.pipeline_mode<synchronous>, transform_indices = @transform_8, window_bounds = array<i64: 1, 128>}, {pipeline_mode = #tpu.pipeline_mode<synchronous>, transform_indices = @transform_9, window_bounds = array<i64: 1, 128>}, {pipeline_mode = #tpu.pipeline_mode<synchronous>, transform_indices = @transform_10, window_bounds = array<i64: 128, 256>}, {pipeline_mode = #tpu.pipeline_mode<synchronous>, transform_indices = @transform_11, window_bounds = array<i64: 1, 256>}, {pipeline_mode = #tpu.pipeline_mode<synchronous>, transform_indices = @transform_12, window_bounds = array<i64: 256, 128>}, {pipeline_mode = #tpu.pipeline_mode<synchronous>, transform_indices = @transform_13, window_bounds = array<i64: 1, 128>}, {pipeline_mode = #tpu.pipeline_mode<synchronous>, transform_indices = @transform_14, window_bounds = array<i64: 1, 128>}, {pipeline_mode = #tpu.pipeline_mode<synchronous>, transform_indices = @transform_15, window_bounds = array<i64: 1, 128>}, {transform_indices = @transform_16, window_bounds = array<i64: 1, 8, 128>}]} {
    %c0_i32 = arith.constant 0 : i32
    %0 = arith.cmpi eq, %arg2, %c0_i32 : i32
    %1 = arith.extui %0 : i1 to i32
    %c0_i32_0 = arith.constant 0 : i32
    %2 = arith.cmpi ne, %1, %c0_i32_0 : i32
    scf.if %2 {
      %c0 = arith.constant 0 : index
      %c0_4 = arith.constant 0 : index
      %c0_5 = arith.constant 0 : index
      %12 = vector.load %arg4[%c0, %c0_4, %c0_5] : memref<1x8x128xbf16, #tpu.memory_space<vmem>>, vector<1x8x128xbf16>
      %13 = vector.shape_cast %12 : vector<1x8x128xbf16> to vector<8x128xbf16>
      %c0_6 = arith.constant 0 : index
      %c0_7 = arith.constant 0 : index
      %14 = vector.load %arg6[%c0_6, %c0_7] : memref<128x128xbf16, #tpu.memory_space<vmem>>, vector<128x128xbf16>
      %cst = arith.constant dense<0.000000e+00> : vector<8x128xf32>
      %15 = tpu.matmul %13, %14, %cst {dimension_numbers = #tpu.dot_dimension_numbers<[1], [0], [0], [1], [0, 0, 1, 1], [], []>} : vector<8x128xbf16>, vector<128x128xbf16>, vector<8x128xf32> -> vector<8x128xf32>
      %c0_8 = arith.constant 0 : index
      %c0_9 = arith.constant 0 : index
      %16 = vector.load %arg7[%c0_8, %c0_9] : memref<1x128xf32, #tpu.memory_space<vmem>>, vector<1x128xf32>
      %17 = vector.broadcast %16 : vector<1x128xf32> to vector<8x128xf32>
      %18 = arith.addf %15, %17 : vector<8x128xf32>
      %cst_10 = arith.constant 1.250000e-01 : f32
      %19 = vector.broadcast %cst_10 : f32 to vector<8x128xf32>
      %20 = arith.mulf %18, %19 : vector<8x128xf32>
      %21 = arith.truncf %20 : vector<8x128xf32> to vector<8x128xbf16>
      %c0_11 = arith.constant 0 : index
      %c0_12 = arith.constant 0 : index
      %22 = vector.load %arg21[%c0_11, %c0_12] : memref<8x128xbf16, #tpu.memory_space<vmem>>, vector<8x128xbf16>
      tpu.vector_store %arg21[%c0_11, %c0_12], %21 {strides = array<i32>} : memref<8x128xbf16, #tpu.memory_space<vmem>>, vector<8x128xbf16>,
      %cst_13 = arith.constant 0xFF800000 : f32
      %23 = vector.broadcast %cst_13 : f32 to vector<2x8x1xf32>
      %c0_14 = arith.constant 0 : index
      %c0_15 = arith.constant 0 : index
      %c0_16 = arith.constant 0 : index
      %24 = vector.load %arg22[%c0_14, %c0_15, %c0_16] : memref<2x8x1xf32, #tpu.memory_space<vmem>>, vector<2x8x1xf32>
      tpu.vector_store %arg22[%c0_14, %c0_15, %c0_16], %23 {strides = array<i32>} : memref<2x8x1xf32, #tpu.memory_space<vmem>>, vector<2x8x1xf32>,
      %cst_17 = arith.constant 0.000000e+00 : f32
      %25 = vector.broadcast %cst_17 : f32 to vector<2x8x1xf32>
      %c0_18 = arith.constant 0 : index
      %c0_19 = arith.constant 0 : index
      %c0_20 = arith.constant 0 : index
      %26 = vector.load %arg23[%c0_18, %c0_19, %c0_20] : memref<2x8x1xf32, #tpu.memory_space<vmem>>, vector<2x8x1xf32>
      tpu.vector_store %arg23[%c0_18, %c0_19, %c0_20], %25 {strides = array<i32>} : memref<2x8x1xf32, #tpu.memory_space<vmem>>, vector<2x8x1xf32>,
      %cst_21 = arith.constant 0.000000e+00 : f32
      %27 = vector.broadcast %cst_21 : f32 to vector<2x8x64xf32>
      %c0_22 = arith.constant 0 : index
      %c0_23 = arith.constant 0 : index
      %c0_24 = arith.constant 0 : index
      %28 = vector.load %arg24[%c0_22, %c0_23, %c0_24] : memref<2x8x64xf32, #tpu.memory_space<vmem>>, vector<2x8x64xf32>
      tpu.vector_store %arg24[%c0_22, %c0_23, %c0_24], %27 {strides = array<i32>} : memref<2x8x64xf32, #tpu.memory_space<vmem>>, vector<2x8x64xf32>,
    } else {
    }
    %3 = arith.index_cast %arg0 : i32 to index
    %4 = memref.load %arg3[%3] : memref<2xi32, #tpu.memory_space<smem>>
    %c8_i32 = arith.constant 8 : i32
    %5 = arith.muli %arg2, %c8_i32 : i32
    %6 = arith.cmpi slt, %5, %4 : i32
    %7 = arith.extui %6 : i1 to i32
    %c0_i32_1 = arith.constant 0 : i32
    %8 = arith.cmpi ne, %7, %c0_i32_1 : i32
    scf.if %8 {
      %c0 = arith.constant 0 : index
      %c0_4 = arith.constant 0 : index
      %c0_5 = arith.constant 0 : index
      %12 = vector.load %arg5[%c0, %c0_4, %c0_5] : memref<1x8x128xbf16, #tpu.memory_space<vmem>>, vector<1x8x128xbf16>
      %13 = vector.shape_cast %12 : vector<1x8x128xbf16> to vector<8x128xbf16>
      %c0_6 = arith.constant 0 : index
      %c0_7 = arith.constant 0 : index
      %14 = vector.load %arg8[%c0_6, %c0_7] : memref<128x256xbf16, #tpu.memory_space<vmem>>, vector<128x256xbf16>
      %cst = arith.constant dense<0.000000e+00> : vector<8x256xf32>
      %15 = tpu.matmul %13, %14, %cst {dimension_numbers = #tpu.dot_dimension_numbers<[1], [0], [0], [1], [0, 0, 1, 1], [], []>} : vector<8x128xbf16>, vector<128x256xbf16>, vector<8x256xf32> -> vector<8x256xf32>
      %c0_8 = arith.constant 0 : index
      %c0_9 = arith.constant 0 : index
      %16 = vector.load %arg9[%c0_8, %c0_9] : memref<1x256xf32, #tpu.memory_space<vmem>>, vector<1x256xf32>
      %17 = vector.broadcast %16 : vector<1x256xf32> to vector<8x256xf32>
      %18 = arith.addf %15, %17 : vector<8x256xf32>
      %19 = vector.extract_strided_slice %18 {offsets = [0, 0], sizes = [8, 128], strides = [1, 1]} : vector<8x256xf32> to vector<8x128xf32>
      %20 = arith.truncf %19 : vector<8x128xf32> to vector<8x128xbf16>
      %21 = vector.extract_strided_slice %18 {offsets = [0, 128], sizes = [8, 128], strides = [1, 1]} : vector<8x256xf32> to vector<8x128xf32>
      %22 = arith.truncf %21 : vector<8x128xf32> to vector<8x128xbf16>
      %23 = tpu.iota {dimensions = array<i32: 1>} : vector<8x8xi32>
      %24 = vector.broadcast %5 : i32 to vector<8x8xi32>
      %25 = arith.addi %24, %23 : vector<8x8xi32>
      %26 = vector.broadcast %4 : i32 to vector<8x8xi32>
      %27 = arith.cmpi sge, %25, %26 : vector<8x8xi32>
      %c0_10 = arith.constant 0 : index
      %c0_11 = arith.constant 0 : index
      %28 = vector.load %arg21[%c0_10, %c0_11] : memref<8x128xbf16, #tpu.memory_space<vmem>>, vector<8x64xbf16>
      %29 = vector.extract_strided_slice %20 {offsets = [0, 0], sizes = [8, 64], strides = [1, 1]} : vector<8x128xbf16> to vector<8x64xbf16>
      %cst_12 = arith.constant dense<0.000000e+00> : vector<8x8xf32>
      %30 = tpu.matmul %28, %29, %cst_12 {dimension_numbers = #tpu.dot_dimension_numbers<[1], [1], [0], [0], [0, 0, 1, 0], [], []>} : vector<8x64xbf16>, vector<8x64xbf16>, vector<8x8xf32> -> vector<8x8xf32>
      %cst_13 = arith.constant -1.000000e+09 : f32
      %31 = vector.broadcast %cst_13 : f32 to vector<8x8xf32>
      %32 = arith.select %27, %31, %30 : vector<8x8xi1>, vector<8x8xf32>
      %c0_14 = arith.constant 0 : index
      %c0_15 = arith.constant 0 : index
      %c0_16 = arith.constant 0 : index
      %33 = vector.load %arg22[%c0_14, %c0_15, %c0_16] : memref<2x8x1xf32, #tpu.memory_space<vmem>>, vector<1x8x1xf32>
      %34 = vector.shape_cast %33 : vector<1x8x1xf32> to vector<8x1xf32>
      %cst_17 = arith.constant dense<0xFF800000> : vector<8xf32>
      %35 = vector.multi_reduction <maximumf>, %32, %cst_17 [1] : vector<8x8xf32> to vector<8xf32>
      %36 = vector.shape_cast %35 : vector<8xf32> to vector<8x1xf32>
      %37 = arith.maximumf %34, %36 : vector<8x1xf32>
      %38 = arith.subf %34, %37 : vector<8x1xf32>
      %39 = math.exp %38 : vector<8x1xf32>
      %40 = vector.broadcast %37 : vector<8x1xf32> to vector<8x8xf32>
      %41 = arith.subf %32, %40 : vector<8x8xf32>
      %42 = math.exp %41 : vector<8x8xf32>
      %c0_18 = arith.constant 0 : index
      %c0_19 = arith.constant 0 : index
      %c0_20 = arith.constant 0 : index
      %43 = vector.load %arg23[%c0_18, %c0_19, %c0_20] : memref<2x8x1xf32, #tpu.memory_space<vmem>>, vector<1x8x1xf32>
      %44 = vector.shape_cast %43 : vector<1x8x1xf32> to vector<8x1xf32>
      %45 = arith.mulf %39, %44 : vector<8x1xf32>
      %cst_21 = arith.constant dense<0.000000e+00> : vector<8xf32>
      %46 = vector.multi_reduction <add>, %42, %cst_21 [1] : vector<8x8xf32> to vector<8xf32>
      %47 = vector.shape_cast %46 : vector<8xf32> to vector<8x1xf32>
      %48 = arith.addf %45, %47 : vector<8x1xf32>
      %c0_22 = arith.constant 0 : index
      %c0_23 = arith.constant 0 : index
      %c0_24 = arith.constant 0 : index
      %49 = vector.load %arg23[%c0_22, %c0_23, %c0_24] : memref<2x8x1xf32, #tpu.memory_space<vmem>>, vector<1x8x1xf32>
      %50 = vector.shape_cast %49 : vector<1x8x1xf32> to vector<8x1xf32>
      %51 = vector.shape_cast %48 : vector<8x1xf32> to vector<1x8x1xf32>
      tpu.vector_store %arg23[%c0_22, %c0_23, %c0_24], %51 {strides = array<i32>} : memref<2x8x1xf32, #tpu.memory_space<vmem>>, vector<1x8x1xf32>,
      %c0_25 = arith.constant 0 : index
      %c0_26 = arith.constant 0 : index
      %c0_27 = arith.constant 0 : index
      %52 = vector.load %arg24[%c0_25, %c0_26, %c0_27] : memref<2x8x64xf32, #tpu.memory_space<vmem>>, vector<1x8x64xf32>
      %53 = vector.shape_cast %52 : vector<1x8x64xf32> to vector<8x64xf32>
      %54 = vector.broadcast %39 : vector<8x1xf32> to vector<8x64xf32>
      %55 = arith.mulf %54, %53 : vector<8x64xf32>
      %56 = arith.truncf %42 : vector<8x8xf32> to vector<8x8xbf16>
      %57 = vector.extract_strided_slice %22 {offsets = [0, 0], sizes = [8, 64], strides = [1, 1]} : vector<8x128xbf16> to vector<8x64xbf16>
      %cst_28 = arith.constant dense<0.000000e+00> : vector<8x64xf32>
      %58 = tpu.matmul %56, %57, %cst_28 {dimension_numbers = #tpu.dot_dimension_numbers<[1], [0], [0], [1], [0, 0, 1, 1], [], []>} : vector<8x8xbf16>, vector<8x64xbf16>, vector<8x64xf32> -> vector<8x64xf32>
      %59 = arith.addf %55, %58 : vector<8x64xf32>
      %c0_29 = arith.constant 0 : index
      %c0_30 = arith.constant 0 : index
      %c0_31 = arith.constant 0 : index
      %60 = vector.load %arg24[%c0_29, %c0_30, %c0_31] : memref<2x8x64xf32, #tpu.memory_space<vmem>>, vector<1x8x64xf32>
      %61 = vector.shape_cast %60 : vector<1x8x64xf32> to vector<8x64xf32>
      %62 = vector.shape_cast %59 : vector<8x64xf32> to vector<1x8x64xf32>
      tpu.vector_store %arg24[%c0_29, %c0_30, %c0_31], %62 {strides = array<i32>} : memref<2x8x64xf32, #tpu.memory_space<vmem>>, vector<1x8x64xf32>,
      %c0_32 = arith.constant 0 : index
      %c0_33 = arith.constant 0 : index
      %c0_34 = arith.constant 0 : index
      %63 = vector.load %arg22[%c0_32, %c0_33, %c0_34] : memref<2x8x1xf32, #tpu.memory_space<vmem>>, vector<1x8x1xf32>
      %64 = vector.shape_cast %63 : vector<1x8x1xf32> to vector<8x1xf32>
      %65 = vector.shape_cast %37 : vector<8x1xf32> to vector<1x8x1xf32>
      tpu.vector_store %arg22[%c0_32, %c0_33, %c0_34], %65 {strides = array<i32>} : memref<2x8x1xf32, #tpu.memory_space<vmem>>, vector<1x8x1xf32>,
      %c0_35 = arith.constant 0 : index
      %c64 = arith.constant 64 : index
      %66 = vector.load %arg21[%c0_35, %c64] : memref<8x128xbf16, #tpu.memory_space<vmem>>, vector<8x64xbf16>
      %67 = vector.extract_strided_slice %20 {offsets = [0, 64], sizes = [8, 64], strides = [1, 1]} : vector<8x128xbf16> to vector<8x64xbf16>
      %cst_36 = arith.constant dense<0.000000e+00> : vector<8x8xf32>
      %68 = tpu.matmul %66, %67, %cst_36 {dimension_numbers = #tpu.dot_dimension_numbers<[1], [1], [0], [0], [0, 0, 1, 0], [], []>} : vector<8x64xbf16>, vector<8x64xbf16>, vector<8x8xf32> -> vector<8x8xf32>
      %cst_37 = arith.constant -1.000000e+09 : f32
      %69 = vector.broadcast %cst_37 : f32 to vector<8x8xf32>
      %70 = arith.select %27, %69, %68 : vector<8x8xi1>, vector<8x8xf32>
      %c1 = arith.constant 1 : index
      %c0_38 = arith.constant 0 : index
      %c0_39 = arith.constant 0 : index
      %71 = vector.load %arg22[%c1, %c0_38, %c0_39] : memref<2x8x1xf32, #tpu.memory_space<vmem>>, vector<1x8x1xf32>
      %72 = vector.shape_cast %71 : vector<1x8x1xf32> to vector<8x1xf32>
      %cst_40 = arith.constant dense<0xFF800000> : vector<8xf32>
      %73 = vector.multi_reduction <maximumf>, %70, %cst_40 [1] : vector<8x8xf32> to vector<8xf32>
      %74 = vector.shape_cast %73 : vector<8xf32> to vector<8x1xf32>
      %75 = arith.maximumf %72, %74 : vector<8x1xf32>
      %76 = arith.subf %72, %75 : vector<8x1xf32>
      %77 = math.exp %76 : vector<8x1xf32>
      %78 = vector.broadcast %75 : vector<8x1xf32> to vector<8x8xf32>
      %79 = arith.subf %70, %78 : vector<8x8xf32>
      %80 = math.exp %79 : vector<8x8xf32>
      %c1_41 = arith.constant 1 : index
      %c0_42 = arith.constant 0 : index
      %c0_43 = arith.constant 0 : index
      %81 = vector.load %arg23[%c1_41, %c0_42, %c0_43] : memref<2x8x1xf32, #tpu.memory_space<vmem>>, vector<1x8x1xf32>
      %82 = vector.shape_cast %81 : vector<1x8x1xf32> to vector<8x1xf32>
      %83 = arith.mulf %77, %82 : vector<8x1xf32>
      %cst_44 = arith.constant dense<0.000000e+00> : vector<8xf32>
      %84 = vector.multi_reduction <add>, %80, %cst_44 [1] : vector<8x8xf32> to vector<8xf32>
      %85 = vector.shape_cast %84 : vector<8xf32> to vector<8x1xf32>
      %86 = arith.addf %83, %85 : vector<8x1xf32>
      %c1_45 = arith.constant 1 : index
      %c0_46 = arith.constant 0 : index
      %c0_47 = arith.constant 0 : index
      %87 = vector.load %arg23[%c1_45, %c0_46, %c0_47] : memref<2x8x1xf32, #tpu.memory_space<vmem>>, vector<1x8x1xf32>
      %88 = vector.shape_cast %87 : vector<1x8x1xf32> to vector<8x1xf32>
      %89 = vector.shape_cast %86 : vector<8x1xf32> to vector<1x8x1xf32>
      tpu.vector_store %arg23[%c1_45, %c0_46, %c0_47], %89 {strides = array<i32>} : memref<2x8x1xf32, #tpu.memory_space<vmem>>, vector<1x8x1xf32>,
      %c1_48 = arith.constant 1 : index
      %c0_49 = arith.constant 0 : index
      %c0_50 = arith.constant 0 : index
      %90 = vector.load %arg24[%c1_48, %c0_49, %c0_50] : memref<2x8x64xf32, #tpu.memory_space<vmem>>, vector<1x8x64xf32>
      %91 = vector.shape_cast %90 : vector<1x8x64xf32> to vector<8x64xf32>
      %92 = vector.broadcast %77 : vector<8x1xf32> to vector<8x64xf32>
      %93 = arith.mulf %92, %91 : vector<8x64xf32>
      %94 = arith.truncf %80 : vector<8x8xf32> to vector<8x8xbf16>
      %95 = vector.extract_strided_slice %22 {offsets = [0, 64], sizes = [8, 64], strides = [1, 1]} : vector<8x128xbf16> to vector<8x64xbf16>
      %cst_51 = arith.constant dense<0.000000e+00> : vector<8x64xf32>
      %96 = tpu.matmul %94, %95, %cst_51 {dimension_numbers = #tpu.dot_dimension_numbers<[1], [0], [0], [1], [0, 0, 1, 1], [], []>} : vector<8x8xbf16>, vector<8x64xbf16>, vector<8x64xf32> -> vector<8x64xf32>
      %97 = arith.addf %93, %96 : vector<8x64xf32>
      %c1_52 = arith.constant 1 : index
      %c0_53 = arith.constant 0 : index
      %c0_54 = arith.constant 0 : index
      %98 = vector.load %arg24[%c1_52, %c0_53, %c0_54] : memref<2x8x64xf32, #tpu.memory_space<vmem>>, vector<1x8x64xf32>
      %99 = vector.shape_cast %98 : vector<1x8x64xf32> to vector<8x64xf32>
      %100 = vector.shape_cast %97 : vector<8x64xf32> to vector<1x8x64xf32>
      tpu.vector_store %arg24[%c1_52, %c0_53, %c0_54], %100 {strides = array<i32>} : memref<2x8x64xf32, #tpu.memory_space<vmem>>, vector<1x8x64xf32>,
      %c1_55 = arith.constant 1 : index
      %c0_56 = arith.constant 0 : index
      %c0_57 = arith.constant 0 : index
      %101 = vector.load %arg22[%c1_55, %c0_56, %c0_57] : memref<2x8x1xf32, #tpu.memory_space<vmem>>, vector<1x8x1xf32>
      %102 = vector.shape_cast %101 : vector<1x8x1xf32> to vector<8x1xf32>
      %103 = vector.shape_cast %75 : vector<8x1xf32> to vector<1x8x1xf32>
      tpu.vector_store %arg22[%c1_55, %c0_56, %c0_57], %103 {strides = array<i32>} : memref<2x8x1xf32, #tpu.memory_space<vmem>>, vector<1x8x1xf32>,
    } else {
    }
    %c0_i32_2 = arith.constant 0 : i32
    %9 = arith.cmpi eq, %arg2, %c0_i32_2 : i32
    %10 = arith.extui %9 : i1 to i32
    %c0_i32_3 = arith.constant 0 : i32
    %11 = arith.cmpi ne, %10, %c0_i32_3 : i32
    scf.if %11 {
      %cst = arith.constant 0.000000e+00 : f32
      %12 = vector.broadcast %cst : f32 to vector<8x128xf32>
      %c0 = arith.constant 0 : index
      %c0_4 = arith.constant 0 : index
      %c0_5 = arith.constant 0 : index
      %13 = vector.load %arg23[%c0, %c0_4, %c0_5] : memref<2x8x1xf32, #tpu.memory_space<vmem>>, vector<1x8x1xf32>
      %14 = vector.shape_cast %13 : vector<1x8x1xf32> to vector<8x1xf32>
      %15 = tpu.reciprocal %14 {approx = true} : vector<8x1xf32> -> vector<8x1xf32>
      %c0_6 = arith.constant 0 : index
      %c0_7 = arith.constant 0 : index
      %c0_8 = arith.constant 0 : index
      %16 = vector.load %arg24[%c0_6, %c0_7, %c0_8] : memref<2x8x64xf32, #tpu.memory_space<vmem>>, vector<1x8x64xf32>
      %17 = vector.shape_cast %16 : vector<1x8x64xf32> to vector<8x64xf32>
      %18 = vector.broadcast %15 : vector<8x1xf32> to vector<8x64xf32>
      %19 = arith.mulf %17, %18 : vector<8x64xf32>
      %20 = arith.truncf %19 : vector<8x64xf32> to vector<8x64xbf16>
      %c0_9 = arith.constant 0 : index
      %c0_10 = arith.constant 0 : index
      %21 = vector.load %arg10[%c0_9, %c0_10] : memref<128x128xbf16, #tpu.memory_space<vmem>>, vector<64x128xbf16>
      %cst_11 = arith.constant dense<0.000000e+00> : vector<8x128xf32>
      %22 = tpu.matmul %20, %21, %cst_11 {dimension_numbers = #tpu.dot_dimension_numbers<[1], [0], [0], [1], [0, 0, 1, 1], [], []>} : vector<8x64xbf16>, vector<64x128xbf16>, vector<8x128xf32> -> vector<8x128xf32>
      %23 = arith.addf %12, %22 : vector<8x128xf32>
      %c1 = arith.constant 1 : index
      %c0_12 = arith.constant 0 : index
      %c0_13 = arith.constant 0 : index
      %24 = vector.load %arg23[%c1, %c0_12, %c0_13] : memref<2x8x1xf32, #tpu.memory_space<vmem>>, vector<1x8x1xf32>
      %25 = vector.shape_cast %24 : vector<1x8x1xf32> to vector<8x1xf32>
      %26 = tpu.reciprocal %25 {approx = true} : vector<8x1xf32> -> vector<8x1xf32>
      %c1_14 = arith.constant 1 : index
      %c0_15 = arith.constant 0 : index
      %c0_16 = arith.constant 0 : index
      %27 = vector.load %arg24[%c1_14, %c0_15, %c0_16] : memref<2x8x64xf32, #tpu.memory_space<vmem>>, vector<1x8x64xf32>
      %28 = vector.shape_cast %27 : vector<1x8x64xf32> to vector<8x64xf32>
      %29 = vector.broadcast %26 : vector<8x1xf32> to vector<8x64xf32>
      %30 = arith.mulf %28, %29 : vector<8x64xf32>
      %31 = arith.truncf %30 : vector<8x64xf32> to vector<8x64xbf16>
      %c64 = arith.constant 64 : index
      %c0_17 = arith.constant 0 : index
      %32 = vector.load %arg10[%c64, %c0_17] : memref<128x128xbf16, #tpu.memory_space<vmem>>, vector<64x128xbf16>
      %cst_18 = arith.constant dense<0.000000e+00> : vector<8x128xf32>
      %33 = tpu.matmul %31, %32, %cst_18 {dimension_numbers = #tpu.dot_dimension_numbers<[1], [0], [0], [1], [0, 0, 1, 1], [], []>} : vector<8x64xbf16>, vector<64x128xbf16>, vector<8x128xf32> -> vector<8x128xf32>
      %34 = arith.addf %23, %33 : vector<8x128xf32>
      %c0_19 = arith.constant 0 : index
      %c0_20 = arith.constant 0 : index
      %35 = vector.load %arg11[%c0_19, %c0_20] : memref<1x128xf32, #tpu.memory_space<vmem>>, vector<1x128xf32>
      %36 = vector.broadcast %35 : vector<1x128xf32> to vector<8x128xf32>
      %37 = arith.addf %34, %36 : vector<8x128xf32>
      %c0_21 = arith.constant 0 : index
      %c0_22 = arith.constant 0 : index
      %c0_23 = arith.constant 0 : index
      %38 = vector.load %arg4[%c0_21, %c0_22, %c0_23] : memref<1x8x128xbf16, #tpu.memory_space<vmem>>, vector<1x8x128xbf16>
      %39 = vector.shape_cast %38 : vector<1x8x128xbf16> to vector<8x128xbf16>
      %40 = arith.extf %39 : vector<8x128xbf16> to vector<8x128xf32>
      %41 = arith.addf %40, %37 : vector<8x128xf32>
      %c0_24 = arith.constant 0 : index
      %c0_25 = arith.constant 0 : index
      %42 = vector.load %arg12[%c0_24, %c0_25] : memref<1x128xf32, #tpu.memory_space<vmem>>, vector<1x128xf32>
      %c0_26 = arith.constant 0 : index
      %c0_27 = arith.constant 0 : index
      %43 = vector.load %arg13[%c0_26, %c0_27] : memref<1x128xf32, #tpu.memory_space<vmem>>, vector<1x128xf32>
      %cst_28 = arith.constant dense<0.000000e+00> : vector<8xf32>
      %44 = vector.multi_reduction <add>, %41, %cst_28 [1] : vector<8x128xf32> to vector<8xf32>
      %45 = vector.shape_cast %44 : vector<8xf32> to vector<8x1xf32>
      %cst_29 = arith.constant 1.280000e+02 : f32
      %46 = vector.broadcast %cst_29 : f32 to vector<8x1xf32>
      %47 = arith.divf %45, %46 : vector<8x1xf32>
      %48 = vector.broadcast %47 : vector<8x1xf32> to vector<8x128xf32>
      %49 = arith.subf %41, %48 : vector<8x128xf32>
      %50 = arith.mulf %49, %49 : vector<8x128xf32>
      %cst_30 = arith.constant dense<0.000000e+00> : vector<8xf32>
      %51 = vector.multi_reduction <add>, %50, %cst_30 [1] : vector<8x128xf32> to vector<8xf32>
      %52 = vector.shape_cast %51 : vector<8xf32> to vector<8x1xf32>
      %cst_31 = arith.constant 1.280000e+02 : f32
      %53 = vector.broadcast %cst_31 : f32 to vector<8x1xf32>
      %54 = arith.divf %52, %53 : vector<8x1xf32>
      %55 = vector.broadcast %47 : vector<8x1xf32> to vector<8x128xf32>
      %56 = arith.subf %41, %55 : vector<8x128xf32>
      %cst_32 = arith.constant 9.99999974E-6 : f32
      %57 = vector.broadcast %cst_32 : f32 to vector<8x1xf32>
      %58 = arith.addf %54, %57 : vector<8x1xf32>
      %59 = math.rsqrt %58 : vector<8x1xf32>
      %60 = vector.broadcast %59 : vector<8x1xf32> to vector<8x128xf32>
      %61 = arith.mulf %56, %60 : vector<8x128xf32>
      %62 = vector.broadcast %42 : vector<1x128xf32> to vector<8x128xf32>
      %63 = arith.mulf %61, %62 : vector<8x128xf32>
      %64 = vector.broadcast %43 : vector<1x128xf32> to vector<8x128xf32>
      %65 = arith.addf %63, %64 : vector<8x128xf32>
      %66 = arith.truncf %65 : vector<8x128xf32> to vector<8x128xbf16>
      %c0_33 = arith.constant 0 : index
      %c0_34 = arith.constant 0 : index
      %67 = vector.load %arg14[%c0_33, %c0_34] : memref<128x256xbf16, #tpu.memory_space<vmem>>, vector<128x256xbf16>
      %cst_35 = arith.constant dense<0.000000e+00> : vector<8x256xf32>
      %68 = tpu.matmul %66, %67, %cst_35 {dimension_numbers = #tpu.dot_dimension_numbers<[1], [0], [0], [1], [0, 0, 1, 1], [], []>} : vector<8x128xbf16>, vector<128x256xbf16>, vector<8x256xf32> -> vector<8x256xf32>
      %c0_36 = arith.constant 0 : index
      %c0_37 = arith.constant 0 : index
      %69 = vector.load %arg15[%c0_36, %c0_37] : memref<1x256xf32, #tpu.memory_space<vmem>>, vector<1x256xf32>
      %70 = vector.broadcast %69 : vector<1x256xf32> to vector<8x256xf32>
      %71 = arith.addf %68, %70 : vector<8x256xf32>
      %cst_38 = arith.constant 0.000000e+00 : f32
      %72 = vector.broadcast %cst_38 : f32 to vector<8x256xf32>
      %73 = arith.maximumf %71, %72 : vector<8x256xf32>
      %74 = arith.truncf %73 : vector<8x256xf32> to vector<8x256xbf16>
      %c0_39 = arith.constant 0 : index
      %c0_40 = arith.constant 0 : index
      %75 = vector.load %arg16[%c0_39, %c0_40] : memref<256x128xbf16, #tpu.memory_space<vmem>>, vector<256x128xbf16>
      %cst_41 = arith.constant dense<0.000000e+00> : vector<8x128xf32>
      %76 = tpu.matmul %74, %75, %cst_41 {dimension_numbers = #tpu.dot_dimension_numbers<[1], [0], [0], [1], [0, 0, 1, 1], [], []>} : vector<8x256xbf16>, vector<256x128xbf16>, vector<8x128xf32> -> vector<8x128xf32>
      %c0_42 = arith.constant 0 : index
      %c0_43 = arith.constant 0 : index
      %77 = vector.load %arg17[%c0_42, %c0_43] : memref<1x128xf32, #tpu.memory_space<vmem>>, vector<1x128xf32>
      %78 = vector.broadcast %77 : vector<1x128xf32> to vector<8x128xf32>
      %79 = arith.addf %76, %78 : vector<8x128xf32>
      %80 = arith.addf %65, %79 : vector<8x128xf32>
      %c0_44 = arith.constant 0 : index
      %c0_45 = arith.constant 0 : index
      %81 = vector.load %arg18[%c0_44, %c0_45] : memref<1x128xf32, #tpu.memory_space<vmem>>, vector<1x128xf32>
      %c0_46 = arith.constant 0 : index
      %c0_47 = arith.constant 0 : index
      %82 = vector.load %arg19[%c0_46, %c0_47] : memref<1x128xf32, #tpu.memory_space<vmem>>, vector<1x128xf32>
      %cst_48 = arith.constant dense<0.000000e+00> : vector<8xf32>
      %83 = vector.multi_reduction <add>, %80, %cst_48 [1] : vector<8x128xf32> to vector<8xf32>
      %84 = vector.shape_cast %83 : vector<8xf32> to vector<8x1xf32>
      %cst_49 = arith.constant 1.280000e+02 : f32
      %85 = vector.broadcast %cst_49 : f32 to vector<8x1xf32>
      %86 = arith.divf %84, %85 : vector<8x1xf32>
      %87 = vector.broadcast %86 : vector<8x1xf32> to vector<8x128xf32>
      %88 = arith.subf %80, %87 : vector<8x128xf32>
      %89 = arith.mulf %88, %88 : vector<8x128xf32>
      %cst_50 = arith.constant dense<0.000000e+00> : vector<8xf32>
      %90 = vector.multi_reduction <add>, %89, %cst_50 [1] : vector<8x128xf32> to vector<8xf32>
      %91 = vector.shape_cast %90 : vector<8xf32> to vector<8x1xf32>
      %cst_51 = arith.constant 1.280000e+02 : f32
      %92 = vector.broadcast %cst_51 : f32 to vector<8x1xf32>
      %93 = arith.divf %91, %92 : vector<8x1xf32>
      %94 = vector.broadcast %86 : vector<8x1xf32> to vector<8x128xf32>
      %95 = arith.subf %80, %94 : vector<8x128xf32>
      %cst_52 = arith.constant 9.99999974E-6 : f32
      %96 = vector.broadcast %cst_52 : f32 to vector<8x1xf32>
      %97 = arith.addf %93, %96 : vector<8x1xf32>
      %98 = math.rsqrt %97 : vector<8x1xf32>
      %99 = vector.broadcast %98 : vector<8x1xf32> to vector<8x128xf32>
      %100 = arith.mulf %95, %99 : vector<8x128xf32>
      %101 = vector.broadcast %81 : vector<1x128xf32> to vector<8x128xf32>
      %102 = arith.mulf %100, %101 : vector<8x128xf32>
      %103 = vector.broadcast %82 : vector<1x128xf32> to vector<8x128xf32>
      %104 = arith.addf %102, %103 : vector<8x128xf32>
      %105 = arith.truncf %104 : vector<8x128xf32> to vector<8x128xbf16>
      %c0_53 = arith.constant 0 : index
      %c0_54 = arith.constant 0 : index
      %c0_55 = arith.constant 0 : index
      %106 = vector.load %arg20[%c0_53, %c0_54, %c0_55] : memref<1x8x128xbf16, #tpu.memory_space<vmem>>, vector<1x8x128xbf16>
      %107 = vector.shape_cast %106 : vector<1x8x128xbf16> to vector<8x128xbf16>
      %108 = vector.shape_cast %105 : vector<8x128xbf16> to vector<1x8x128xbf16>
      tpu.vector_store %arg20[%c0_53, %c0_54, %c0_55], %108 {strides = array<i32>} : memref<1x8x128xbf16, #tpu.memory_space<vmem>>, vector<1x8x128xbf16>,
    } else {
    }
    return
  }
  func.func @transform_0(%arg0: i32, %arg1: i32, %arg2: i32, %arg3: memref<2xi32, #tpu.memory_space<smem>>) -> (i32, i32, i32) {
    %c0_i32 = arith.constant 0 : i32
    %c0_i32_0 = arith.constant 0 : i32
    return %arg0, %arg1, %c0_i32 : i32, i32, i32
  }
  func.func @transform_1(%arg0: i32, %arg1: i32, %arg2: i32, %arg3: memref<2xi32, #tpu.memory_space<smem>>) -> (i32, i32, i32) {
    %c0_i32 = arith.constant 0 : i32
    %c0_i32_0 = arith.constant 0 : i32
    return %arg0, %arg2, %c0_i32 : i32, i32, i32
  }
  func.func @transform_2(%arg0: i32, %arg1: i32, %arg2: i32, %arg3: memref<2xi32, #tpu.memory_space<smem>>) -> (i32, i32) {
    %c0_i32 = arith.constant 0 : i32
    %c0_i32_0 = arith.constant 0 : i32
    %c0_i32_1 = arith.constant 0 : i32
    return %c0_i32, %c0_i32_0 : i32, i32
  }
  func.func @transform_3(%arg0: i32, %arg1: i32, %arg2: i32, %arg3: memref<2xi32, #tpu.memory_space<smem>>) -> (i32, i32) {
    %c0_i32 = arith.constant 0 : i32
    %c0_i32_0 = arith.constant 0 : i32
    %c0_i32_1 = arith.constant 0 : i32
    return %c0_i32, %c0_i32_0 : i32, i32
  }
  func.func @transform_4(%arg0: i32, %arg1: i32, %arg2: i32, %arg3: memref<2xi32, #tpu.memory_space<smem>>) -> (i32, i32) {
    %c0_i32 = arith.constant 0 : i32
    %c0_i32_0 = arith.constant 0 : i32
    %c0_i32_1 = arith.constant 0 : i32
    return %c0_i32, %c0_i32_0 : i32, i32
  }
  func.func @transform_5(%arg0: i32, %arg1: i32, %arg2: i32, %arg3: memref<2xi32, #tpu.memory_space<smem>>) -> (i32, i32) {
    %c0_i32 = arith.constant 0 : i32
    %c0_i32_0 = arith.constant 0 : i32
    %c0_i32_1 = arith.constant 0 : i32
    return %c0_i32, %c0_i32_0 : i32, i32
  }
  func.func @transform_6(%arg0: i32, %arg1: i32, %arg2: i32, %arg3: memref<2xi32, #tpu.memory_space<smem>>) -> (i32, i32) {
    %c0_i32 = arith.constant 0 : i32
    %c0_i32_0 = arith.constant 0 : i32
    %c0_i32_1 = arith.constant 0 : i32
    return %c0_i32, %c0_i32_0 : i32, i32
  }
  func.func @transform_7(%arg0: i32, %arg1: i32, %arg2: i32, %arg3: memref<2xi32, #tpu.memory_space<smem>>) -> (i32, i32) {
    %c0_i32 = arith.constant 0 : i32
    %c0_i32_0 = arith.constant 0 : i32
    %c0_i32_1 = arith.constant 0 : i32
    return %c0_i32, %c0_i32_0 : i32, i32
  }
  func.func @transform_8(%arg0: i32, %arg1: i32, %arg2: i32, %arg3: memref<2xi32, #tpu.memory_space<smem>>) -> (i32, i32) {
    %c0_i32 = arith.constant 0 : i32
    %c0_i32_0 = arith.constant 0 : i32
    %c0_i32_1 = arith.constant 0 : i32
    return %c0_i32, %c0_i32_0 : i32, i32
  }
  func.func @transform_9(%arg0: i32, %arg1: i32, %arg2: i32, %arg3: memref<2xi32, #tpu.memory_space<smem>>) -> (i32, i32) {
    %c0_i32 = arith.constant 0 : i32
    %c0_i32_0 = arith.constant 0 : i32
    %c0_i32_1 = arith.constant 0 : i32
    return %c0_i32, %c0_i32_0 : i32, i32
  }
  func.func @transform_10(%arg0: i32, %arg1: i32, %arg2: i32, %arg3: memref<2xi32, #tpu.memory_space<smem>>) -> (i32, i32) {
    %c0_i32 = arith.constant 0 : i32
    %c0_i32_0 = arith.constant 0 : i32
    %c0_i32_1 = arith.constant 0 : i32
    return %c0_i32, %c0_i32_0 : i32, i32
  }
  func.func @transform_11(%arg0: i32, %arg1: i32, %arg2: i32, %arg3: memref<2xi32, #tpu.memory_space<smem>>) -> (i32, i32) {
    %c0_i32 = arith.constant 0 : i32
    %c0_i32_0 = arith.constant 0 : i32
    %c0_i32_1 = arith.constant 0 : i32
    return %c0_i32, %c0_i32_0 : i32, i32
  }
  func.func @transform_12(%arg0: i32, %arg1: i32, %arg2: i32, %arg3: memref<2xi32, #tpu.memory_space<smem>>) -> (i32, i32) {
    %c0_i32 = arith.constant 0 : i32
    %c0_i32_0 = arith.constant 0 : i32
    %c0_i32_1 = arith.constant 0 : i32
    return %c0_i32, %c0_i32_0 : i32, i32
  }
  func.func @transform_13(%arg0: i32, %arg1: i32, %arg2: i32, %arg3: memref<2xi32, #tpu.memory_space<smem>>) -> (i32, i32) {
    %c0_i32 = arith.constant 0 : i32
    %c0_i32_0 = arith.constant 0 : i32
    %c0_i32_1 = arith.constant 0 : i32
    return %c0_i32, %c0_i32_0 : i32, i32
  }
  func.func @transform_14(%arg0: i32, %arg1: i32, %arg2: i32, %arg3: memref<2xi32, #tpu.memory_space<smem>>) -> (i32, i32) {
    %c0_i32 = arith.constant 0 : i32
    %c0_i32_0 = arith.constant 0 : i32
    %c0_i32_1 = arith.constant 0 : i32
    return %c0_i32, %c0_i32_0 : i32, i32
  }
  func.func @transform_15(%arg0: i32, %arg1: i32, %arg2: i32, %arg3: memref<2xi32, #tpu.memory_space<smem>>) -> (i32, i32) {
    %c0_i32 = arith.constant 0 : i32
    %c0_i32_0 = arith.constant 0 : i32
    %c0_i32_1 = arith.constant 0 : i32
    return %c0_i32, %c0_i32_0 : i32, i32
  }
  func.func @transform_16(%arg0: i32, %arg1: i32, %arg2: i32, %arg3: memref<2xi32, #tpu.memory_space<smem>>) -> (i32, i32, i32) {
    %c0_i32 = arith.constant 0 : i32
    %c0_i32_0 = arith.constant 0 : i32
    return %arg0, %arg1, %c0_i32 : i32, i32, i32
  }
}

module attributes {stable_mosaic.version = 11 : i64} {
  func.func @kernel(%arg0: i32, %arg1: i32, %arg2: i32, %arg3: memref<2xi32, #tpu.memory_space<smem>>, %arg4: memref<1x8x128xbf16, #tpu.memory_space<vmem>>, %arg5: memref<1x8x128xbf16, #tpu.memory_space<vmem>>, %arg6: memref<128x128xbf16, #tpu.memory_space<vmem>>, %arg7: memref<1x128xf32, #tpu.memory_space<vmem>>, %arg8: memref<128x256xbf16, #tpu.memory_space<vmem>>, %arg9: memref<1x256xf32, #tpu.memory_space<vmem>>, %arg10: memref<128x128xbf16, #tpu.memory_space<vmem>>, %arg11: memref<1x128xf32, #tpu.memory_space<vmem>>, %arg12: memref<1x128xf32, #tpu.memory_space<vmem>>, %arg13: memref<1x128xf32, #tpu.memory_space<vmem>>, %arg14: memref<1x8x128xbf16, #tpu.memory_space<vmem>>, %arg15: memref<8x128xbf16, #tpu.memory_space<vmem>>, %arg16: memref<2x8x1xf32, #tpu.memory_space<vmem>>, %arg17: memref<2x8x1xf32, #tpu.memory_space<vmem>>, %arg18: memref<2x8x64xf32, #tpu.memory_space<vmem>>) attributes {dimension_semantics = [#tpu.dimension_semantics<parallel>, #tpu.dimension_semantics<parallel>, #tpu.dimension_semantics<arbitrary>], iteration_bounds = array<i64: 2, 1, 1>, scalar_prefetch = 1 : i64, scratch_operands = 4 : i64, tpu.core_type = #tpu.core_type<tc>, window_params = [{transform_indices = @transform_0, window_bounds = array<i64: 1, 8, 128>}, {transform_indices = @transform_1, window_bounds = array<i64: 1, 8, 128>}, {pipeline_mode = #tpu.pipeline_mode<synchronous>, transform_indices = @transform_2, window_bounds = array<i64: 128, 128>}, {pipeline_mode = #tpu.pipeline_mode<synchronous>, transform_indices = @transform_3, window_bounds = array<i64: 1, 128>}, {pipeline_mode = #tpu.pipeline_mode<synchronous>, transform_indices = @transform_4, window_bounds = array<i64: 128, 256>}, {pipeline_mode = #tpu.pipeline_mode<synchronous>, transform_indices = @transform_5, window_bounds = array<i64: 1, 256>}, {pipeline_mode = #tpu.pipeline_mode<synchronous>, transform_indices = @transform_6, window_bounds = array<i64: 128, 128>}, {pipeline_mode = #tpu.pipeline_mode<synchronous>, transform_indices = @transform_7, window_bounds = array<i64: 1, 128>}, {pipeline_mode = #tpu.pipeline_mode<synchronous>, transform_indices = @transform_8, window_bounds = array<i64: 1, 128>}, {pipeline_mode = #tpu.pipeline_mode<synchronous>, transform_indices = @transform_9, window_bounds = array<i64: 1, 128>}, {transform_indices = @transform_10, window_bounds = array<i64: 1, 8, 128>}]} {
    %c0_i32 = arith.constant 0 : i32
    %0 = arith.cmpi eq, %arg2, %c0_i32 : i32
    %1 = arith.extui %0 : i1 to i32
    %c0_i32_0 = arith.constant 0 : i32
    %2 = arith.cmpi ne, %1, %c0_i32_0 : i32
    scf.if %2 {
      %c0 = arith.constant 0 : index
      %c0_5 = arith.constant 0 : index
      %c0_6 = arith.constant 0 : index
      %16 = vector.load %arg4[%c0, %c0_5, %c0_6] : memref<1x8x128xbf16, #tpu.memory_space<vmem>>, vector<1x8x128xbf16>
      %17 = vector.shape_cast %16 : vector<1x8x128xbf16> to vector<8x128xbf16>
      %c0_7 = arith.constant 0 : index
      %c0_8 = arith.constant 0 : index
      %18 = vector.load %arg6[%c0_7, %c0_8] : memref<128x128xbf16, #tpu.memory_space<vmem>>, vector<128x128xbf16>
      %cst = arith.constant dense<0.000000e+00> : vector<8x128xf32>
      %19 = tpu.matmul %17, %18, %cst {dimension_numbers = #tpu.dot_dimension_numbers<[1], [0], [0], [1], [0, 0, 1, 1], [], []>} : vector<8x128xbf16>, vector<128x128xbf16>, vector<8x128xf32> -> vector<8x128xf32>
      %c0_9 = arith.constant 0 : index
      %c0_10 = arith.constant 0 : index
      %20 = vector.load %arg7[%c0_9, %c0_10] : memref<1x128xf32, #tpu.memory_space<vmem>>, vector<1x128xf32>
      %21 = vector.broadcast %20 : vector<1x128xf32> to vector<8x128xf32>
      %22 = arith.addf %19, %21 : vector<8x128xf32>
      %cst_11 = arith.constant 1.250000e-01 : f32
      %23 = vector.broadcast %cst_11 : f32 to vector<8x128xf32>
      %24 = arith.mulf %22, %23 : vector<8x128xf32>
      %25 = arith.truncf %24 : vector<8x128xf32> to vector<8x128xbf16>
      %c0_12 = arith.constant 0 : index
      %c0_13 = arith.constant 0 : index
      %26 = vector.load %arg15[%c0_12, %c0_13] : memref<8x128xbf16, #tpu.memory_space<vmem>>, vector<8x128xbf16>
      tpu.vector_store %arg15[%c0_12, %c0_13], %25 {strides = array<i32>} : memref<8x128xbf16, #tpu.memory_space<vmem>>, vector<8x128xbf16>,
      %cst_14 = arith.constant 0xFF800000 : f32
      %27 = vector.broadcast %cst_14 : f32 to vector<2x8x1xf32>
      %c0_15 = arith.constant 0 : index
      %c0_16 = arith.constant 0 : index
      %c0_17 = arith.constant 0 : index
      %28 = vector.load %arg16[%c0_15, %c0_16, %c0_17] : memref<2x8x1xf32, #tpu.memory_space<vmem>>, vector<2x8x1xf32>
      tpu.vector_store %arg16[%c0_15, %c0_16, %c0_17], %27 {strides = array<i32>} : memref<2x8x1xf32, #tpu.memory_space<vmem>>, vector<2x8x1xf32>,
      %cst_18 = arith.constant 0.000000e+00 : f32
      %29 = vector.broadcast %cst_18 : f32 to vector<2x8x1xf32>
      %c0_19 = arith.constant 0 : index
      %c0_20 = arith.constant 0 : index
      %c0_21 = arith.constant 0 : index
      %30 = vector.load %arg17[%c0_19, %c0_20, %c0_21] : memref<2x8x1xf32, #tpu.memory_space<vmem>>, vector<2x8x1xf32>
      tpu.vector_store %arg17[%c0_19, %c0_20, %c0_21], %29 {strides = array<i32>} : memref<2x8x1xf32, #tpu.memory_space<vmem>>, vector<2x8x1xf32>,
      %cst_22 = arith.constant 0.000000e+00 : f32
      %31 = vector.broadcast %cst_22 : f32 to vector<2x8x64xf32>
      %c0_23 = arith.constant 0 : index
      %c0_24 = arith.constant 0 : index
      %c0_25 = arith.constant 0 : index
      %32 = vector.load %arg18[%c0_23, %c0_24, %c0_25] : memref<2x8x64xf32, #tpu.memory_space<vmem>>, vector<2x8x64xf32>
      tpu.vector_store %arg18[%c0_23, %c0_24, %c0_25], %31 {strides = array<i32>} : memref<2x8x64xf32, #tpu.memory_space<vmem>>, vector<2x8x64xf32>,
    } else {
    }
    %3 = arith.index_cast %arg0 : i32 to index
    %4 = memref.load %arg3[%3] : memref<2xi32, #tpu.memory_space<smem>>
    %c8_i32 = arith.constant 8 : i32
    %5 = arith.muli %arg2, %c8_i32 : i32
    %6 = arith.cmpi slt, %5, %4 : i32
    %c8_i32_1 = arith.constant 8 : i32
    %7 = arith.muli %arg1, %c8_i32_1 : i32
    %c7_i32 = arith.constant 7 : i32
    %8 = arith.addi %7, %c7_i32 : i32
    %9 = arith.cmpi sle, %5, %8 : i32
    %10 = arith.andi %6, %9 : i1
    %11 = arith.extui %10 : i1 to i32
    %c0_i32_2 = arith.constant 0 : i32
    %12 = arith.cmpi ne, %11, %c0_i32_2 : i32
    scf.if %12 {
      %c0 = arith.constant 0 : index
      %c0_5 = arith.constant 0 : index
      %c0_6 = arith.constant 0 : index
      %16 = vector.load %arg5[%c0, %c0_5, %c0_6] : memref<1x8x128xbf16, #tpu.memory_space<vmem>>, vector<1x8x128xbf16>
      %17 = vector.shape_cast %16 : vector<1x8x128xbf16> to vector<8x128xbf16>
      %c0_7 = arith.constant 0 : index
      %c0_8 = arith.constant 0 : index
      %18 = vector.load %arg8[%c0_7, %c0_8] : memref<128x256xbf16, #tpu.memory_space<vmem>>, vector<128x256xbf16>
      %cst = arith.constant dense<0.000000e+00> : vector<8x256xf32>
      %19 = tpu.matmul %17, %18, %cst {dimension_numbers = #tpu.dot_dimension_numbers<[1], [0], [0], [1], [0, 0, 1, 1], [], []>} : vector<8x128xbf16>, vector<128x256xbf16>, vector<8x256xf32> -> vector<8x256xf32>
      %c0_9 = arith.constant 0 : index
      %c0_10 = arith.constant 0 : index
      %20 = vector.load %arg9[%c0_9, %c0_10] : memref<1x256xf32, #tpu.memory_space<vmem>>, vector<1x256xf32>
      %21 = vector.broadcast %20 : vector<1x256xf32> to vector<8x256xf32>
      %22 = arith.addf %19, %21 : vector<8x256xf32>
      %23 = vector.extract_strided_slice %22 {offsets = [0, 0], sizes = [8, 128], strides = [1, 1]} : vector<8x256xf32> to vector<8x128xf32>
      %24 = arith.truncf %23 : vector<8x128xf32> to vector<8x128xbf16>
      %25 = vector.extract_strided_slice %22 {offsets = [0, 128], sizes = [8, 128], strides = [1, 1]} : vector<8x256xf32> to vector<8x128xf32>
      %26 = arith.truncf %25 : vector<8x128xf32> to vector<8x128xbf16>
      %27 = tpu.iota {dimensions = array<i32: 1>} : vector<8x8xi32>
      %28 = vector.broadcast %5 : i32 to vector<8x8xi32>
      %29 = arith.addi %28, %27 : vector<8x8xi32>
      %30 = vector.broadcast %4 : i32 to vector<8x8xi32>
      %31 = arith.cmpi sge, %29, %30 : vector<8x8xi32>
      %c8_i32_11 = arith.constant 8 : i32
      %32 = arith.muli %arg1, %c8_i32_11 : i32
      %33 = tpu.iota {dimensions = array<i32: 0>} : vector<8x8xi32>
      %34 = vector.broadcast %32 : i32 to vector<8x8xi32>
      %35 = arith.addi %34, %33 : vector<8x8xi32>
      %36 = arith.cmpi sgt, %29, %35 : vector<8x8xi32>
      %37 = arith.ori %31, %36 : vector<8x8xi1>
      %c0_12 = arith.constant 0 : index
      %c0_13 = arith.constant 0 : index
      %38 = vector.load %arg15[%c0_12, %c0_13] : memref<8x128xbf16, #tpu.memory_space<vmem>>, vector<8x64xbf16>
      %39 = vector.extract_strided_slice %24 {offsets = [0, 0], sizes = [8, 64], strides = [1, 1]} : vector<8x128xbf16> to vector<8x64xbf16>
      %cst_14 = arith.constant dense<0.000000e+00> : vector<8x8xf32>
      %40 = tpu.matmul %38, %39, %cst_14 {dimension_numbers = #tpu.dot_dimension_numbers<[1], [1], [0], [0], [0, 0, 1, 0], [], []>} : vector<8x64xbf16>, vector<8x64xbf16>, vector<8x8xf32> -> vector<8x8xf32>
      %cst_15 = arith.constant -1.000000e+09 : f32
      %41 = vector.broadcast %cst_15 : f32 to vector<8x8xf32>
      %42 = arith.select %37, %41, %40 : vector<8x8xi1>, vector<8x8xf32>
      %c0_16 = arith.constant 0 : index
      %c0_17 = arith.constant 0 : index
      %c0_18 = arith.constant 0 : index
      %43 = vector.load %arg16[%c0_16, %c0_17, %c0_18] : memref<2x8x1xf32, #tpu.memory_space<vmem>>, vector<1x8x1xf32>
      %44 = vector.shape_cast %43 : vector<1x8x1xf32> to vector<8x1xf32>
      %cst_19 = arith.constant dense<0xFF800000> : vector<8xf32>
      %45 = vector.multi_reduction <maximumf>, %42, %cst_19 [1] : vector<8x8xf32> to vector<8xf32>
      %46 = vector.shape_cast %45 : vector<8xf32> to vector<8x1xf32>
      %47 = arith.maximumf %44, %46 : vector<8x1xf32>
      %48 = arith.subf %44, %47 : vector<8x1xf32>
      %49 = math.exp %48 : vector<8x1xf32>
      %50 = vector.broadcast %47 : vector<8x1xf32> to vector<8x8xf32>
      %51 = arith.subf %42, %50 : vector<8x8xf32>
      %52 = math.exp %51 : vector<8x8xf32>
      %c0_20 = arith.constant 0 : index
      %c0_21 = arith.constant 0 : index
      %c0_22 = arith.constant 0 : index
      %53 = vector.load %arg17[%c0_20, %c0_21, %c0_22] : memref<2x8x1xf32, #tpu.memory_space<vmem>>, vector<1x8x1xf32>
      %54 = vector.shape_cast %53 : vector<1x8x1xf32> to vector<8x1xf32>
      %55 = arith.mulf %49, %54 : vector<8x1xf32>
      %cst_23 = arith.constant dense<0.000000e+00> : vector<8xf32>
      %56 = vector.multi_reduction <add>, %52, %cst_23 [1] : vector<8x8xf32> to vector<8xf32>
      %57 = vector.shape_cast %56 : vector<8xf32> to vector<8x1xf32>
      %58 = arith.addf %55, %57 : vector<8x1xf32>
      %c0_24 = arith.constant 0 : index
      %c0_25 = arith.constant 0 : index
      %c0_26 = arith.constant 0 : index
      %59 = vector.load %arg17[%c0_24, %c0_25, %c0_26] : memref<2x8x1xf32, #tpu.memory_space<vmem>>, vector<1x8x1xf32>
      %60 = vector.shape_cast %59 : vector<1x8x1xf32> to vector<8x1xf32>
      %61 = vector.shape_cast %58 : vector<8x1xf32> to vector<1x8x1xf32>
      tpu.vector_store %arg17[%c0_24, %c0_25, %c0_26], %61 {strides = array<i32>} : memref<2x8x1xf32, #tpu.memory_space<vmem>>, vector<1x8x1xf32>,
      %c0_27 = arith.constant 0 : index
      %c0_28 = arith.constant 0 : index
      %c0_29 = arith.constant 0 : index
      %62 = vector.load %arg18[%c0_27, %c0_28, %c0_29] : memref<2x8x64xf32, #tpu.memory_space<vmem>>, vector<1x8x64xf32>
      %63 = vector.shape_cast %62 : vector<1x8x64xf32> to vector<8x64xf32>
      %64 = vector.broadcast %49 : vector<8x1xf32> to vector<8x64xf32>
      %65 = arith.mulf %64, %63 : vector<8x64xf32>
      %66 = arith.truncf %52 : vector<8x8xf32> to vector<8x8xbf16>
      %67 = vector.extract_strided_slice %26 {offsets = [0, 0], sizes = [8, 64], strides = [1, 1]} : vector<8x128xbf16> to vector<8x64xbf16>
      %cst_30 = arith.constant dense<0.000000e+00> : vector<8x64xf32>
      %68 = tpu.matmul %66, %67, %cst_30 {dimension_numbers = #tpu.dot_dimension_numbers<[1], [0], [0], [1], [0, 0, 1, 1], [], []>} : vector<8x8xbf16>, vector<8x64xbf16>, vector<8x64xf32> -> vector<8x64xf32>
      %69 = arith.addf %65, %68 : vector<8x64xf32>
      %c0_31 = arith.constant 0 : index
      %c0_32 = arith.constant 0 : index
      %c0_33 = arith.constant 0 : index
      %70 = vector.load %arg18[%c0_31, %c0_32, %c0_33] : memref<2x8x64xf32, #tpu.memory_space<vmem>>, vector<1x8x64xf32>
      %71 = vector.shape_cast %70 : vector<1x8x64xf32> to vector<8x64xf32>
      %72 = vector.shape_cast %69 : vector<8x64xf32> to vector<1x8x64xf32>
      tpu.vector_store %arg18[%c0_31, %c0_32, %c0_33], %72 {strides = array<i32>} : memref<2x8x64xf32, #tpu.memory_space<vmem>>, vector<1x8x64xf32>,
      %c0_34 = arith.constant 0 : index
      %c0_35 = arith.constant 0 : index
      %c0_36 = arith.constant 0 : index
      %73 = vector.load %arg16[%c0_34, %c0_35, %c0_36] : memref<2x8x1xf32, #tpu.memory_space<vmem>>, vector<1x8x1xf32>
      %74 = vector.shape_cast %73 : vector<1x8x1xf32> to vector<8x1xf32>
      %75 = vector.shape_cast %47 : vector<8x1xf32> to vector<1x8x1xf32>
      tpu.vector_store %arg16[%c0_34, %c0_35, %c0_36], %75 {strides = array<i32>} : memref<2x8x1xf32, #tpu.memory_space<vmem>>, vector<1x8x1xf32>,
      %c0_37 = arith.constant 0 : index
      %c64 = arith.constant 64 : index
      %76 = vector.load %arg15[%c0_37, %c64] : memref<8x128xbf16, #tpu.memory_space<vmem>>, vector<8x64xbf16>
      %77 = vector.extract_strided_slice %24 {offsets = [0, 64], sizes = [8, 64], strides = [1, 1]} : vector<8x128xbf16> to vector<8x64xbf16>
      %cst_38 = arith.constant dense<0.000000e+00> : vector<8x8xf32>
      %78 = tpu.matmul %76, %77, %cst_38 {dimension_numbers = #tpu.dot_dimension_numbers<[1], [1], [0], [0], [0, 0, 1, 0], [], []>} : vector<8x64xbf16>, vector<8x64xbf16>, vector<8x8xf32> -> vector<8x8xf32>
      %cst_39 = arith.constant -1.000000e+09 : f32
      %79 = vector.broadcast %cst_39 : f32 to vector<8x8xf32>
      %80 = arith.select %37, %79, %78 : vector<8x8xi1>, vector<8x8xf32>
      %c1 = arith.constant 1 : index
      %c0_40 = arith.constant 0 : index
      %c0_41 = arith.constant 0 : index
      %81 = vector.load %arg16[%c1, %c0_40, %c0_41] : memref<2x8x1xf32, #tpu.memory_space<vmem>>, vector<1x8x1xf32>
      %82 = vector.shape_cast %81 : vector<1x8x1xf32> to vector<8x1xf32>
      %cst_42 = arith.constant dense<0xFF800000> : vector<8xf32>
      %83 = vector.multi_reduction <maximumf>, %80, %cst_42 [1] : vector<8x8xf32> to vector<8xf32>
      %84 = vector.shape_cast %83 : vector<8xf32> to vector<8x1xf32>
      %85 = arith.maximumf %82, %84 : vector<8x1xf32>
      %86 = arith.subf %82, %85 : vector<8x1xf32>
      %87 = math.exp %86 : vector<8x1xf32>
      %88 = vector.broadcast %85 : vector<8x1xf32> to vector<8x8xf32>
      %89 = arith.subf %80, %88 : vector<8x8xf32>
      %90 = math.exp %89 : vector<8x8xf32>
      %c1_43 = arith.constant 1 : index
      %c0_44 = arith.constant 0 : index
      %c0_45 = arith.constant 0 : index
      %91 = vector.load %arg17[%c1_43, %c0_44, %c0_45] : memref<2x8x1xf32, #tpu.memory_space<vmem>>, vector<1x8x1xf32>
      %92 = vector.shape_cast %91 : vector<1x8x1xf32> to vector<8x1xf32>
      %93 = arith.mulf %87, %92 : vector<8x1xf32>
      %cst_46 = arith.constant dense<0.000000e+00> : vector<8xf32>
      %94 = vector.multi_reduction <add>, %90, %cst_46 [1] : vector<8x8xf32> to vector<8xf32>
      %95 = vector.shape_cast %94 : vector<8xf32> to vector<8x1xf32>
      %96 = arith.addf %93, %95 : vector<8x1xf32>
      %c1_47 = arith.constant 1 : index
      %c0_48 = arith.constant 0 : index
      %c0_49 = arith.constant 0 : index
      %97 = vector.load %arg17[%c1_47, %c0_48, %c0_49] : memref<2x8x1xf32, #tpu.memory_space<vmem>>, vector<1x8x1xf32>
      %98 = vector.shape_cast %97 : vector<1x8x1xf32> to vector<8x1xf32>
      %99 = vector.shape_cast %96 : vector<8x1xf32> to vector<1x8x1xf32>
      tpu.vector_store %arg17[%c1_47, %c0_48, %c0_49], %99 {strides = array<i32>} : memref<2x8x1xf32, #tpu.memory_space<vmem>>, vector<1x8x1xf32>,
      %c1_50 = arith.constant 1 : index
      %c0_51 = arith.constant 0 : index
      %c0_52 = arith.constant 0 : index
      %100 = vector.load %arg18[%c1_50, %c0_51, %c0_52] : memref<2x8x64xf32, #tpu.memory_space<vmem>>, vector<1x8x64xf32>
      %101 = vector.shape_cast %100 : vector<1x8x64xf32> to vector<8x64xf32>
      %102 = vector.broadcast %87 : vector<8x1xf32> to vector<8x64xf32>
      %103 = arith.mulf %102, %101 : vector<8x64xf32>
      %104 = arith.truncf %90 : vector<8x8xf32> to vector<8x8xbf16>
      %105 = vector.extract_strided_slice %26 {offsets = [0, 64], sizes = [8, 64], strides = [1, 1]} : vector<8x128xbf16> to vector<8x64xbf16>
      %cst_53 = arith.constant dense<0.000000e+00> : vector<8x64xf32>
      %106 = tpu.matmul %104, %105, %cst_53 {dimension_numbers = #tpu.dot_dimension_numbers<[1], [0], [0], [1], [0, 0, 1, 1], [], []>} : vector<8x8xbf16>, vector<8x64xbf16>, vector<8x64xf32> -> vector<8x64xf32>
      %107 = arith.addf %103, %106 : vector<8x64xf32>
      %c1_54 = arith.constant 1 : index
      %c0_55 = arith.constant 0 : index
      %c0_56 = arith.constant 0 : index
      %108 = vector.load %arg18[%c1_54, %c0_55, %c0_56] : memref<2x8x64xf32, #tpu.memory_space<vmem>>, vector<1x8x64xf32>
      %109 = vector.shape_cast %108 : vector<1x8x64xf32> to vector<8x64xf32>
      %110 = vector.shape_cast %107 : vector<8x64xf32> to vector<1x8x64xf32>
      tpu.vector_store %arg18[%c1_54, %c0_55, %c0_56], %110 {strides = array<i32>} : memref<2x8x64xf32, #tpu.memory_space<vmem>>, vector<1x8x64xf32>,
      %c1_57 = arith.constant 1 : index
      %c0_58 = arith.constant 0 : index
      %c0_59 = arith.constant 0 : index
      %111 = vector.load %arg16[%c1_57, %c0_58, %c0_59] : memref<2x8x1xf32, #tpu.memory_space<vmem>>, vector<1x8x1xf32>
      %112 = vector.shape_cast %111 : vector<1x8x1xf32> to vector<8x1xf32>
      %113 = vector.shape_cast %85 : vector<8x1xf32> to vector<1x8x1xf32>
      tpu.vector_store %arg16[%c1_57, %c0_58, %c0_59], %113 {strides = array<i32>} : memref<2x8x1xf32, #tpu.memory_space<vmem>>, vector<1x8x1xf32>,
    } else {
    }
    %c0_i32_3 = arith.constant 0 : i32
    %13 = arith.cmpi eq, %arg2, %c0_i32_3 : i32
    %14 = arith.extui %13 : i1 to i32
    %c0_i32_4 = arith.constant 0 : i32
    %15 = arith.cmpi ne, %14, %c0_i32_4 : i32
    scf.if %15 {
      %cst = arith.constant 0.000000e+00 : f32
      %16 = vector.broadcast %cst : f32 to vector<8x128xf32>
      %c0 = arith.constant 0 : index
      %c0_5 = arith.constant 0 : index
      %c0_6 = arith.constant 0 : index
      %17 = vector.load %arg17[%c0, %c0_5, %c0_6] : memref<2x8x1xf32, #tpu.memory_space<vmem>>, vector<1x8x1xf32>
      %18 = vector.shape_cast %17 : vector<1x8x1xf32> to vector<8x1xf32>
      %19 = tpu.reciprocal %18 {approx = true} : vector<8x1xf32> -> vector<8x1xf32>
      %c0_7 = arith.constant 0 : index
      %c0_8 = arith.constant 0 : index
      %c0_9 = arith.constant 0 : index
      %20 = vector.load %arg18[%c0_7, %c0_8, %c0_9] : memref<2x8x64xf32, #tpu.memory_space<vmem>>, vector<1x8x64xf32>
      %21 = vector.shape_cast %20 : vector<1x8x64xf32> to vector<8x64xf32>
      %22 = vector.broadcast %19 : vector<8x1xf32> to vector<8x64xf32>
      %23 = arith.mulf %21, %22 : vector<8x64xf32>
      %24 = arith.truncf %23 : vector<8x64xf32> to vector<8x64xbf16>
      %c0_10 = arith.constant 0 : index
      %c0_11 = arith.constant 0 : index
      %25 = vector.load %arg10[%c0_10, %c0_11] : memref<128x128xbf16, #tpu.memory_space<vmem>>, vector<64x128xbf16>
      %cst_12 = arith.constant dense<0.000000e+00> : vector<8x128xf32>
      %26 = tpu.matmul %24, %25, %cst_12 {dimension_numbers = #tpu.dot_dimension_numbers<[1], [0], [0], [1], [0, 0, 1, 1], [], []>} : vector<8x64xbf16>, vector<64x128xbf16>, vector<8x128xf32> -> vector<8x128xf32>
      %27 = arith.addf %16, %26 : vector<8x128xf32>
      %c1 = arith.constant 1 : index
      %c0_13 = arith.constant 0 : index
      %c0_14 = arith.constant 0 : index
      %28 = vector.load %arg17[%c1, %c0_13, %c0_14] : memref<2x8x1xf32, #tpu.memory_space<vmem>>, vector<1x8x1xf32>
      %29 = vector.shape_cast %28 : vector<1x8x1xf32> to vector<8x1xf32>
      %30 = tpu.reciprocal %29 {approx = true} : vector<8x1xf32> -> vector<8x1xf32>
      %c1_15 = arith.constant 1 : index
      %c0_16 = arith.constant 0 : index
      %c0_17 = arith.constant 0 : index
      %31 = vector.load %arg18[%c1_15, %c0_16, %c0_17] : memref<2x8x64xf32, #tpu.memory_space<vmem>>, vector<1x8x64xf32>
      %32 = vector.shape_cast %31 : vector<1x8x64xf32> to vector<8x64xf32>
      %33 = vector.broadcast %30 : vector<8x1xf32> to vector<8x64xf32>
      %34 = arith.mulf %32, %33 : vector<8x64xf32>
      %35 = arith.truncf %34 : vector<8x64xf32> to vector<8x64xbf16>
      %c64 = arith.constant 64 : index
      %c0_18 = arith.constant 0 : index
      %36 = vector.load %arg10[%c64, %c0_18] : memref<128x128xbf16, #tpu.memory_space<vmem>>, vector<64x128xbf16>
      %cst_19 = arith.constant dense<0.000000e+00> : vector<8x128xf32>
      %37 = tpu.matmul %35, %36, %cst_19 {dimension_numbers = #tpu.dot_dimension_numbers<[1], [0], [0], [1], [0, 0, 1, 1], [], []>} : vector<8x64xbf16>, vector<64x128xbf16>, vector<8x128xf32> -> vector<8x128xf32>
      %38 = arith.addf %27, %37 : vector<8x128xf32>
      %c0_20 = arith.constant 0 : index
      %c0_21 = arith.constant 0 : index
      %39 = vector.load %arg11[%c0_20, %c0_21] : memref<1x128xf32, #tpu.memory_space<vmem>>, vector<1x128xf32>
      %40 = vector.broadcast %39 : vector<1x128xf32> to vector<8x128xf32>
      %41 = arith.addf %38, %40 : vector<8x128xf32>
      %c0_22 = arith.constant 0 : index
      %c0_23 = arith.constant 0 : index
      %c0_24 = arith.constant 0 : index
      %42 = vector.load %arg4[%c0_22, %c0_23, %c0_24] : memref<1x8x128xbf16, #tpu.memory_space<vmem>>, vector<1x8x128xbf16>
      %43 = vector.shape_cast %42 : vector<1x8x128xbf16> to vector<8x128xbf16>
      %44 = arith.extf %43 : vector<8x128xbf16> to vector<8x128xf32>
      %45 = arith.addf %44, %41 : vector<8x128xf32>
      %c0_25 = arith.constant 0 : index
      %c0_26 = arith.constant 0 : index
      %46 = vector.load %arg12[%c0_25, %c0_26] : memref<1x128xf32, #tpu.memory_space<vmem>>, vector<1x128xf32>
      %c0_27 = arith.constant 0 : index
      %c0_28 = arith.constant 0 : index
      %47 = vector.load %arg13[%c0_27, %c0_28] : memref<1x128xf32, #tpu.memory_space<vmem>>, vector<1x128xf32>
      %cst_29 = arith.constant dense<0.000000e+00> : vector<8xf32>
      %48 = vector.multi_reduction <add>, %45, %cst_29 [1] : vector<8x128xf32> to vector<8xf32>
      %49 = vector.shape_cast %48 : vector<8xf32> to vector<8x1xf32>
      %cst_30 = arith.constant 1.280000e+02 : f32
      %50 = vector.broadcast %cst_30 : f32 to vector<8x1xf32>
      %51 = arith.divf %49, %50 : vector<8x1xf32>
      %52 = vector.broadcast %51 : vector<8x1xf32> to vector<8x128xf32>
      %53 = arith.subf %45, %52 : vector<8x128xf32>
      %54 = arith.mulf %53, %53 : vector<8x128xf32>
      %cst_31 = arith.constant dense<0.000000e+00> : vector<8xf32>
      %55 = vector.multi_reduction <add>, %54, %cst_31 [1] : vector<8x128xf32> to vector<8xf32>
      %56 = vector.shape_cast %55 : vector<8xf32> to vector<8x1xf32>
      %cst_32 = arith.constant 1.280000e+02 : f32
      %57 = vector.broadcast %cst_32 : f32 to vector<8x1xf32>
      %58 = arith.divf %56, %57 : vector<8x1xf32>
      %59 = vector.broadcast %51 : vector<8x1xf32> to vector<8x128xf32>
      %60 = arith.subf %45, %59 : vector<8x128xf32>
      %cst_33 = arith.constant 9.99999974E-6 : f32
      %61 = vector.broadcast %cst_33 : f32 to vector<8x1xf32>
      %62 = arith.addf %58, %61 : vector<8x1xf32>
      %63 = math.rsqrt %62 : vector<8x1xf32>
      %64 = vector.broadcast %63 : vector<8x1xf32> to vector<8x128xf32>
      %65 = arith.mulf %60, %64 : vector<8x128xf32>
      %66 = vector.broadcast %46 : vector<1x128xf32> to vector<8x128xf32>
      %67 = arith.mulf %65, %66 : vector<8x128xf32>
      %68 = vector.broadcast %47 : vector<1x128xf32> to vector<8x128xf32>
      %69 = arith.addf %67, %68 : vector<8x128xf32>
      %70 = arith.truncf %69 : vector<8x128xf32> to vector<8x128xbf16>
      %c0_34 = arith.constant 0 : index
      %c0_35 = arith.constant 0 : index
      %c0_36 = arith.constant 0 : index
      %71 = vector.load %arg14[%c0_34, %c0_35, %c0_36] : memref<1x8x128xbf16, #tpu.memory_space<vmem>>, vector<1x8x128xbf16>
      %72 = vector.shape_cast %71 : vector<1x8x128xbf16> to vector<8x128xbf16>
      %73 = vector.shape_cast %70 : vector<8x128xbf16> to vector<1x8x128xbf16>
      tpu.vector_store %arg14[%c0_34, %c0_35, %c0_36], %73 {strides = array<i32>} : memref<1x8x128xbf16, #tpu.memory_space<vmem>>, vector<1x8x128xbf16>,
    } else {
    }
    return
  }
  func.func @transform_0(%arg0: i32, %arg1: i32, %arg2: i32, %arg3: memref<2xi32, #tpu.memory_space<smem>>) -> (i32, i32, i32) {
    %c0_i32 = arith.constant 0 : i32
    %c0_i32_0 = arith.constant 0 : i32
    return %arg0, %arg1, %c0_i32 : i32, i32, i32
  }
  func.func @transform_1(%arg0: i32, %arg1: i32, %arg2: i32, %arg3: memref<2xi32, #tpu.memory_space<smem>>) -> (i32, i32, i32) {
    %c0_i32 = arith.constant 0 : i32
    %c0_i32_0 = arith.constant 0 : i32
    return %arg0, %arg2, %c0_i32 : i32, i32, i32
  }
  func.func @transform_2(%arg0: i32, %arg1: i32, %arg2: i32, %arg3: memref<2xi32, #tpu.memory_space<smem>>) -> (i32, i32) {
    %c0_i32 = arith.constant 0 : i32
    %c0_i32_0 = arith.constant 0 : i32
    %c0_i32_1 = arith.constant 0 : i32
    return %c0_i32, %c0_i32_0 : i32, i32
  }
  func.func @transform_3(%arg0: i32, %arg1: i32, %arg2: i32, %arg3: memref<2xi32, #tpu.memory_space<smem>>) -> (i32, i32) {
    %c0_i32 = arith.constant 0 : i32
    %c0_i32_0 = arith.constant 0 : i32
    %c0_i32_1 = arith.constant 0 : i32
    return %c0_i32, %c0_i32_0 : i32, i32
  }
  func.func @transform_4(%arg0: i32, %arg1: i32, %arg2: i32, %arg3: memref<2xi32, #tpu.memory_space<smem>>) -> (i32, i32) {
    %c0_i32 = arith.constant 0 : i32
    %c0_i32_0 = arith.constant 0 : i32
    %c0_i32_1 = arith.constant 0 : i32
    return %c0_i32, %c0_i32_0 : i32, i32
  }
  func.func @transform_5(%arg0: i32, %arg1: i32, %arg2: i32, %arg3: memref<2xi32, #tpu.memory_space<smem>>) -> (i32, i32) {
    %c0_i32 = arith.constant 0 : i32
    %c0_i32_0 = arith.constant 0 : i32
    %c0_i32_1 = arith.constant 0 : i32
    return %c0_i32, %c0_i32_0 : i32, i32
  }
  func.func @transform_6(%arg0: i32, %arg1: i32, %arg2: i32, %arg3: memref<2xi32, #tpu.memory_space<smem>>) -> (i32, i32) {
    %c0_i32 = arith.constant 0 : i32
    %c0_i32_0 = arith.constant 0 : i32
    %c0_i32_1 = arith.constant 0 : i32
    return %c0_i32, %c0_i32_0 : i32, i32
  }
  func.func @transform_7(%arg0: i32, %arg1: i32, %arg2: i32, %arg3: memref<2xi32, #tpu.memory_space<smem>>) -> (i32, i32) {
    %c0_i32 = arith.constant 0 : i32
    %c0_i32_0 = arith.constant 0 : i32
    %c0_i32_1 = arith.constant 0 : i32
    return %c0_i32, %c0_i32_0 : i32, i32
  }
  func.func @transform_8(%arg0: i32, %arg1: i32, %arg2: i32, %arg3: memref<2xi32, #tpu.memory_space<smem>>) -> (i32, i32) {
    %c0_i32 = arith.constant 0 : i32
    %c0_i32_0 = arith.constant 0 : i32
    %c0_i32_1 = arith.constant 0 : i32
    return %c0_i32, %c0_i32_0 : i32, i32
  }
  func.func @transform_9(%arg0: i32, %arg1: i32, %arg2: i32, %arg3: memref<2xi32, #tpu.memory_space<smem>>) -> (i32, i32) {
    %c0_i32 = arith.constant 0 : i32
    %c0_i32_0 = arith.constant 0 : i32
    %c0_i32_1 = arith.constant 0 : i32
    return %c0_i32, %c0_i32_0 : i32, i32
  }
  func.func @transform_10(%arg0: i32, %arg1: i32, %arg2: i32, %arg3: memref<2xi32, #tpu.memory_space<smem>>) -> (i32, i32, i32) {
    %c0_i32 = arith.constant 0 : i32
    %c0_i32_0 = arith.constant 0 : i32
    return %arg0, %arg1, %c0_i32 : i32, i32, i32
  }
}

module attributes {stable_mosaic.version = 11 : i64} {
  func.func @kernel(%arg0: i32, %arg1: i32, %arg2: i32, %arg3: memref<2xi32, #tpu.memory_space<smem>>, %arg4: memref<1x8x128xbf16, #tpu.memory_space<vmem>>, %arg5: memref<1x8x128xbf16, #tpu.memory_space<vmem>>, %arg6: memref<128x128xbf16, #tpu.memory_space<vmem>>, %arg7: memref<1x128xf32, #tpu.memory_space<vmem>>, %arg8: memref<128x256xbf16, #tpu.memory_space<vmem>>, %arg9: memref<1x256xf32, #tpu.memory_space<vmem>>, %arg10: memref<128x128xbf16, #tpu.memory_space<vmem>>, %arg11: memref<1x128xf32, #tpu.memory_space<vmem>>, %arg12: memref<1x128xf32, #tpu.memory_space<vmem>>, %arg13: memref<1x128xf32, #tpu.memory_space<vmem>>, %arg14: memref<1x8x128xbf16, #tpu.memory_space<vmem>>, %arg15: memref<8x128xbf16, #tpu.memory_space<vmem>>, %arg16: memref<2x8x1xf32, #tpu.memory_space<vmem>>, %arg17: memref<2x8x1xf32, #tpu.memory_space<vmem>>, %arg18: memref<2x8x64xf32, #tpu.memory_space<vmem>>) attributes {dimension_semantics = [#tpu.dimension_semantics<parallel>, #tpu.dimension_semantics<parallel>, #tpu.dimension_semantics<arbitrary>], iteration_bounds = array<i64: 2, 1, 1>, scalar_prefetch = 1 : i64, scratch_operands = 4 : i64, tpu.core_type = #tpu.core_type<tc>, window_params = [{transform_indices = @transform_0, window_bounds = array<i64: 1, 8, 128>}, {transform_indices = @transform_1, window_bounds = array<i64: 1, 8, 128>}, {pipeline_mode = #tpu.pipeline_mode<synchronous>, transform_indices = @transform_2, window_bounds = array<i64: 128, 128>}, {pipeline_mode = #tpu.pipeline_mode<synchronous>, transform_indices = @transform_3, window_bounds = array<i64: 1, 128>}, {pipeline_mode = #tpu.pipeline_mode<synchronous>, transform_indices = @transform_4, window_bounds = array<i64: 128, 256>}, {pipeline_mode = #tpu.pipeline_mode<synchronous>, transform_indices = @transform_5, window_bounds = array<i64: 1, 256>}, {pipeline_mode = #tpu.pipeline_mode<synchronous>, transform_indices = @transform_6, window_bounds = array<i64: 128, 128>}, {pipeline_mode = #tpu.pipeline_mode<synchronous>, transform_indices = @transform_7, window_bounds = array<i64: 1, 128>}, {pipeline_mode = #tpu.pipeline_mode<synchronous>, transform_indices = @transform_8, window_bounds = array<i64: 1, 128>}, {pipeline_mode = #tpu.pipeline_mode<synchronous>, transform_indices = @transform_9, window_bounds = array<i64: 1, 128>}, {transform_indices = @transform_10, window_bounds = array<i64: 1, 8, 128>}]} {
    %c0_i32 = arith.constant 0 : i32
    %0 = arith.cmpi eq, %arg2, %c0_i32 : i32
    %1 = arith.extui %0 : i1 to i32
    %c0_i32_0 = arith.constant 0 : i32
    %2 = arith.cmpi ne, %1, %c0_i32_0 : i32
    scf.if %2 {
      %c0 = arith.constant 0 : index
      %c0_5 = arith.constant 0 : index
      %c0_6 = arith.constant 0 : index
      %16 = vector.load %arg4[%c0, %c0_5, %c0_6] : memref<1x8x128xbf16, #tpu.memory_space<vmem>>, vector<1x8x128xbf16>
      %17 = vector.shape_cast %16 : vector<1x8x128xbf16> to vector<8x128xbf16>
      %c0_7 = arith.constant 0 : index
      %c0_8 = arith.constant 0 : index
      %18 = vector.load %arg6[%c0_7, %c0_8] : memref<128x128xbf16, #tpu.memory_space<vmem>>, vector<128x128xbf16>
      %cst = arith.constant dense<0.000000e+00> : vector<8x128xf32>
      %19 = tpu.matmul %17, %18, %cst {dimension_numbers = #tpu.dot_dimension_numbers<[1], [0], [0], [1], [0, 0, 1, 1], [], []>} : vector<8x128xbf16>, vector<128x128xbf16>, vector<8x128xf32> -> vector<8x128xf32>
      %c0_9 = arith.constant 0 : index
      %c0_10 = arith.constant 0 : index
      %20 = vector.load %arg7[%c0_9, %c0_10] : memref<1x128xf32, #tpu.memory_space<vmem>>, vector<1x128xf32>
      %21 = vector.broadcast %20 : vector<1x128xf32> to vector<8x128xf32>
      %22 = arith.addf %19, %21 : vector<8x128xf32>
      %cst_11 = arith.constant 1.250000e-01 : f32
      %23 = vector.broadcast %cst_11 : f32 to vector<8x128xf32>
      %24 = arith.mulf %22, %23 : vector<8x128xf32>
      %25 = arith.truncf %24 : vector<8x128xf32> to vector<8x128xbf16>
      %c0_12 = arith.constant 0 : index
      %c0_13 = arith.constant 0 : index
      %26 = vector.load %arg15[%c0_12, %c0_13] : memref<8x128xbf16, #tpu.memory_space<vmem>>, vector<8x128xbf16>
      tpu.vector_store %arg15[%c0_12, %c0_13], %25 {strides = array<i32>} : memref<8x128xbf16, #tpu.memory_space<vmem>>, vector<8x128xbf16>,
      %cst_14 = arith.constant 0xFF800000 : f32
      %27 = vector.broadcast %cst_14 : f32 to vector<2x8x1xf32>
      %c0_15 = arith.constant 0 : index
      %c0_16 = arith.constant 0 : index
      %c0_17 = arith.constant 0 : index
      %28 = vector.load %arg16[%c0_15, %c0_16, %c0_17] : memref<2x8x1xf32, #tpu.memory_space<vmem>>, vector<2x8x1xf32>
      tpu.vector_store %arg16[%c0_15, %c0_16, %c0_17], %27 {strides = array<i32>} : memref<2x8x1xf32, #tpu.memory_space<vmem>>, vector<2x8x1xf32>,
      %cst_18 = arith.constant 0.000000e+00 : f32
      %29 = vector.broadcast %cst_18 : f32 to vector<2x8x1xf32>
      %c0_19 = arith.constant 0 : index
      %c0_20 = arith.constant 0 : index
      %c0_21 = arith.constant 0 : index
      %30 = vector.load %arg17[%c0_19, %c0_20, %c0_21] : memref<2x8x1xf32, #tpu.memory_space<vmem>>, vector<2x8x1xf32>
      tpu.vector_store %arg17[%c0_19, %c0_20, %c0_21], %29 {strides = array<i32>} : memref<2x8x1xf32, #tpu.memory_space<vmem>>, vector<2x8x1xf32>,
      %cst_22 = arith.constant 0.000000e+00 : f32
      %31 = vector.broadcast %cst_22 : f32 to vector<2x8x64xf32>
      %c0_23 = arith.constant 0 : index
      %c0_24 = arith.constant 0 : index
      %c0_25 = arith.constant 0 : index
      %32 = vector.load %arg18[%c0_23, %c0_24, %c0_25] : memref<2x8x64xf32, #tpu.memory_space<vmem>>, vector<2x8x64xf32>
      tpu.vector_store %arg18[%c0_23, %c0_24, %c0_25], %31 {strides = array<i32>} : memref<2x8x64xf32, #tpu.memory_space<vmem>>, vector<2x8x64xf32>,
    } else {
    }
    %3 = arith.index_cast %arg0 : i32 to index
    %4 = memref.load %arg3[%3] : memref<2xi32, #tpu.memory_space<smem>>
    %c8_i32 = arith.constant 8 : i32
    %5 = arith.muli %arg2, %c8_i32 : i32
    %6 = arith.cmpi slt, %5, %4 : i32
    %c8_i32_1 = arith.constant 8 : i32
    %7 = arith.muli %arg1, %c8_i32_1 : i32
    %c7_i32 = arith.constant 7 : i32
    %8 = arith.addi %7, %c7_i32 : i32
    %9 = arith.cmpi sle, %5, %8 : i32
    %10 = arith.andi %6, %9 : i1
    %11 = arith.extui %10 : i1 to i32
    %c0_i32_2 = arith.constant 0 : i32
    %12 = arith.cmpi ne, %11, %c0_i32_2 : i32
    scf.if %12 {
      %c0 = arith.constant 0 : index
      %c0_5 = arith.constant 0 : index
      %c0_6 = arith.constant 0 : index
      %16 = vector.load %arg5[%c0, %c0_5, %c0_6] : memref<1x8x128xbf16, #tpu.memory_space<vmem>>, vector<1x8x128xbf16>
      %17 = vector.shape_cast %16 : vector<1x8x128xbf16> to vector<8x128xbf16>
      %c0_7 = arith.constant 0 : index
      %c0_8 = arith.constant 0 : index
      %18 = vector.load %arg8[%c0_7, %c0_8] : memref<128x256xbf16, #tpu.memory_space<vmem>>, vector<128x256xbf16>
      %cst = arith.constant dense<0.000000e+00> : vector<8x256xf32>
      %19 = tpu.matmul %17, %18, %cst {dimension_numbers = #tpu.dot_dimension_numbers<[1], [0], [0], [1], [0, 0, 1, 1], [], []>} : vector<8x128xbf16>, vector<128x256xbf16>, vector<8x256xf32> -> vector<8x256xf32>
      %c0_9 = arith.constant 0 : index
      %c0_10 = arith.constant 0 : index
      %20 = vector.load %arg9[%c0_9, %c0_10] : memref<1x256xf32, #tpu.memory_space<vmem>>, vector<1x256xf32>
      %21 = vector.broadcast %20 : vector<1x256xf32> to vector<8x256xf32>
      %22 = arith.addf %19, %21 : vector<8x256xf32>
      %23 = vector.extract_strided_slice %22 {offsets = [0, 0], sizes = [8, 128], strides = [1, 1]} : vector<8x256xf32> to vector<8x128xf32>
      %24 = arith.truncf %23 : vector<8x128xf32> to vector<8x128xbf16>
      %25 = vector.extract_strided_slice %22 {offsets = [0, 128], sizes = [8, 128], strides = [1, 1]} : vector<8x256xf32> to vector<8x128xf32>
      %26 = arith.truncf %25 : vector<8x128xf32> to vector<8x128xbf16>
      %27 = tpu.iota {dimensions = array<i32: 1>} : vector<8x8xi32>
      %28 = vector.broadcast %5 : i32 to vector<8x8xi32>
      %29 = arith.addi %28, %27 : vector<8x8xi32>
      %30 = vector.broadcast %4 : i32 to vector<8x8xi32>
      %31 = arith.cmpi sge, %29, %30 : vector<8x8xi32>
      %c8_i32_11 = arith.constant 8 : i32
      %32 = arith.muli %arg1, %c8_i32_11 : i32
      %33 = tpu.iota {dimensions = array<i32: 0>} : vector<8x8xi32>
      %34 = vector.broadcast %32 : i32 to vector<8x8xi32>
      %35 = arith.addi %34, %33 : vector<8x8xi32>
      %36 = arith.cmpi sgt, %29, %35 : vector<8x8xi32>
      %37 = arith.ori %31, %36 : vector<8x8xi1>
      %c0_12 = arith.constant 0 : index
      %c0_13 = arith.constant 0 : index
      %38 = vector.load %arg15[%c0_12, %c0_13] : memref<8x128xbf16, #tpu.memory_space<vmem>>, vector<8x64xbf16>
      %39 = vector.extract_strided_slice %24 {offsets = [0, 0], sizes = [8, 64], strides = [1, 1]} : vector<8x128xbf16> to vector<8x64xbf16>
      %cst_14 = arith.constant dense<0.000000e+00> : vector<8x8xf32>
      %40 = tpu.matmul %38, %39, %cst_14 {dimension_numbers = #tpu.dot_dimension_numbers<[1], [1], [0], [0], [0, 0, 1, 0], [], []>} : vector<8x64xbf16>, vector<8x64xbf16>, vector<8x8xf32> -> vector<8x8xf32>
      %cst_15 = arith.constant -1.000000e+09 : f32
      %41 = vector.broadcast %cst_15 : f32 to vector<8x8xf32>
      %42 = arith.select %37, %41, %40 : vector<8x8xi1>, vector<8x8xf32>
      %c0_16 = arith.constant 0 : index
      %c0_17 = arith.constant 0 : index
      %c0_18 = arith.constant 0 : index
      %43 = vector.load %arg16[%c0_16, %c0_17, %c0_18] : memref<2x8x1xf32, #tpu.memory_space<vmem>>, vector<1x8x1xf32>
      %44 = vector.shape_cast %43 : vector<1x8x1xf32> to vector<8x1xf32>
      %cst_19 = arith.constant dense<0xFF800000> : vector<8xf32>
      %45 = vector.multi_reduction <maximumf>, %42, %cst_19 [1] : vector<8x8xf32> to vector<8xf32>
      %46 = vector.shape_cast %45 : vector<8xf32> to vector<8x1xf32>
      %47 = arith.maximumf %44, %46 : vector<8x1xf32>
      %48 = arith.subf %44, %47 : vector<8x1xf32>
      %49 = math.exp %48 : vector<8x1xf32>
      %50 = vector.broadcast %47 : vector<8x1xf32> to vector<8x8xf32>
      %51 = arith.subf %42, %50 : vector<8x8xf32>
      %52 = math.exp %51 : vector<8x8xf32>
      %c0_20 = arith.constant 0 : index
      %c0_21 = arith.constant 0 : index
      %c0_22 = arith.constant 0 : index
      %53 = vector.load %arg17[%c0_20, %c0_21, %c0_22] : memref<2x8x1xf32, #tpu.memory_space<vmem>>, vector<1x8x1xf32>
      %54 = vector.shape_cast %53 : vector<1x8x1xf32> to vector<8x1xf32>
      %55 = arith.mulf %49, %54 : vector<8x1xf32>
      %cst_23 = arith.constant dense<0.000000e+00> : vector<8xf32>
      %56 = vector.multi_reduction <add>, %52, %cst_23 [1] : vector<8x8xf32> to vector<8xf32>
      %57 = vector.shape_cast %56 : vector<8xf32> to vector<8x1xf32>
      %58 = arith.addf %55, %57 : vector<8x1xf32>
      %c0_24 = arith.constant 0 : index
      %c0_25 = arith.constant 0 : index
      %c0_26 = arith.constant 0 : index
      %59 = vector.load %arg17[%c0_24, %c0_25, %c0_26] : memref<2x8x1xf32, #tpu.memory_space<vmem>>, vector<1x8x1xf32>
      %60 = vector.shape_cast %59 : vector<1x8x1xf32> to vector<8x1xf32>
      %61 = vector.shape_cast %58 : vector<8x1xf32> to vector<1x8x1xf32>
      tpu.vector_store %arg17[%c0_24, %c0_25, %c0_26], %61 {strides = array<i32>} : memref<2x8x1xf32, #tpu.memory_space<vmem>>, vector<1x8x1xf32>,
      %c0_27 = arith.constant 0 : index
      %c0_28 = arith.constant 0 : index
      %c0_29 = arith.constant 0 : index
      %62 = vector.load %arg18[%c0_27, %c0_28, %c0_29] : memref<2x8x64xf32, #tpu.memory_space<vmem>>, vector<1x8x64xf32>
      %63 = vector.shape_cast %62 : vector<1x8x64xf32> to vector<8x64xf32>
      %64 = vector.broadcast %49 : vector<8x1xf32> to vector<8x64xf32>
      %65 = arith.mulf %64, %63 : vector<8x64xf32>
      %66 = arith.truncf %52 : vector<8x8xf32> to vector<8x8xbf16>
      %67 = vector.extract_strided_slice %26 {offsets = [0, 0], sizes = [8, 64], strides = [1, 1]} : vector<8x128xbf16> to vector<8x64xbf16>
      %cst_30 = arith.constant dense<0.000000e+00> : vector<8x64xf32>
      %68 = tpu.matmul %66, %67, %cst_30 {dimension_numbers = #tpu.dot_dimension_numbers<[1], [0], [0], [1], [0, 0, 1, 1], [], []>} : vector<8x8xbf16>, vector<8x64xbf16>, vector<8x64xf32> -> vector<8x64xf32>
      %69 = arith.addf %65, %68 : vector<8x64xf32>
      %c0_31 = arith.constant 0 : index
      %c0_32 = arith.constant 0 : index
      %c0_33 = arith.constant 0 : index
      %70 = vector.load %arg18[%c0_31, %c0_32, %c0_33] : memref<2x8x64xf32, #tpu.memory_space<vmem>>, vector<1x8x64xf32>
      %71 = vector.shape_cast %70 : vector<1x8x64xf32> to vector<8x64xf32>
      %72 = vector.shape_cast %69 : vector<8x64xf32> to vector<1x8x64xf32>
      tpu.vector_store %arg18[%c0_31, %c0_32, %c0_33], %72 {strides = array<i32>} : memref<2x8x64xf32, #tpu.memory_space<vmem>>, vector<1x8x64xf32>,
      %c0_34 = arith.constant 0 : index
      %c0_35 = arith.constant 0 : index
      %c0_36 = arith.constant 0 : index
      %73 = vector.load %arg16[%c0_34, %c0_35, %c0_36] : memref<2x8x1xf32, #tpu.memory_space<vmem>>, vector<1x8x1xf32>
      %74 = vector.shape_cast %73 : vector<1x8x1xf32> to vector<8x1xf32>
      %75 = vector.shape_cast %47 : vector<8x1xf32> to vector<1x8x1xf32>
      tpu.vector_store %arg16[%c0_34, %c0_35, %c0_36], %75 {strides = array<i32>} : memref<2x8x1xf32, #tpu.memory_space<vmem>>, vector<1x8x1xf32>,
      %c0_37 = arith.constant 0 : index
      %c64 = arith.constant 64 : index
      %76 = vector.load %arg15[%c0_37, %c64] : memref<8x128xbf16, #tpu.memory_space<vmem>>, vector<8x64xbf16>
      %77 = vector.extract_strided_slice %24 {offsets = [0, 64], sizes = [8, 64], strides = [1, 1]} : vector<8x128xbf16> to vector<8x64xbf16>
      %cst_38 = arith.constant dense<0.000000e+00> : vector<8x8xf32>
      %78 = tpu.matmul %76, %77, %cst_38 {dimension_numbers = #tpu.dot_dimension_numbers<[1], [1], [0], [0], [0, 0, 1, 0], [], []>} : vector<8x64xbf16>, vector<8x64xbf16>, vector<8x8xf32> -> vector<8x8xf32>
      %cst_39 = arith.constant -1.000000e+09 : f32
      %79 = vector.broadcast %cst_39 : f32 to vector<8x8xf32>
      %80 = arith.select %37, %79, %78 : vector<8x8xi1>, vector<8x8xf32>
      %c1 = arith.constant 1 : index
      %c0_40 = arith.constant 0 : index
      %c0_41 = arith.constant 0 : index
      %81 = vector.load %arg16[%c1, %c0_40, %c0_41] : memref<2x8x1xf32, #tpu.memory_space<vmem>>, vector<1x8x1xf32>
      %82 = vector.shape_cast %81 : vector<1x8x1xf32> to vector<8x1xf32>
      %cst_42 = arith.constant dense<0xFF800000> : vector<8xf32>
      %83 = vector.multi_reduction <maximumf>, %80, %cst_42 [1] : vector<8x8xf32> to vector<8xf32>
      %84 = vector.shape_cast %83 : vector<8xf32> to vector<8x1xf32>
      %85 = arith.maximumf %82, %84 : vector<8x1xf32>
      %86 = arith.subf %82, %85 : vector<8x1xf32>
      %87 = math.exp %86 : vector<8x1xf32>
      %88 = vector.broadcast %85 : vector<8x1xf32> to vector<8x8xf32>
      %89 = arith.subf %80, %88 : vector<8x8xf32>
      %90 = math.exp %89 : vector<8x8xf32>
      %c1_43 = arith.constant 1 : index
      %c0_44 = arith.constant 0 : index
      %c0_45 = arith.constant 0 : index
      %91 = vector.load %arg17[%c1_43, %c0_44, %c0_45] : memref<2x8x1xf32, #tpu.memory_space<vmem>>, vector<1x8x1xf32>
      %92 = vector.shape_cast %91 : vector<1x8x1xf32> to vector<8x1xf32>
      %93 = arith.mulf %87, %92 : vector<8x1xf32>
      %cst_46 = arith.constant dense<0.000000e+00> : vector<8xf32>
      %94 = vector.multi_reduction <add>, %90, %cst_46 [1] : vector<8x8xf32> to vector<8xf32>
      %95 = vector.shape_cast %94 : vector<8xf32> to vector<8x1xf32>
      %96 = arith.addf %93, %95 : vector<8x1xf32>
      %c1_47 = arith.constant 1 : index
      %c0_48 = arith.constant 0 : index
      %c0_49 = arith.constant 0 : index
      %97 = vector.load %arg17[%c1_47, %c0_48, %c0_49] : memref<2x8x1xf32, #tpu.memory_space<vmem>>, vector<1x8x1xf32>
      %98 = vector.shape_cast %97 : vector<1x8x1xf32> to vector<8x1xf32>
      %99 = vector.shape_cast %96 : vector<8x1xf32> to vector<1x8x1xf32>
      tpu.vector_store %arg17[%c1_47, %c0_48, %c0_49], %99 {strides = array<i32>} : memref<2x8x1xf32, #tpu.memory_space<vmem>>, vector<1x8x1xf32>,
      %c1_50 = arith.constant 1 : index
      %c0_51 = arith.constant 0 : index
      %c0_52 = arith.constant 0 : index
      %100 = vector.load %arg18[%c1_50, %c0_51, %c0_52] : memref<2x8x64xf32, #tpu.memory_space<vmem>>, vector<1x8x64xf32>
      %101 = vector.shape_cast %100 : vector<1x8x64xf32> to vector<8x64xf32>
      %102 = vector.broadcast %87 : vector<8x1xf32> to vector<8x64xf32>
      %103 = arith.mulf %102, %101 : vector<8x64xf32>
      %104 = arith.truncf %90 : vector<8x8xf32> to vector<8x8xbf16>
      %105 = vector.extract_strided_slice %26 {offsets = [0, 64], sizes = [8, 64], strides = [1, 1]} : vector<8x128xbf16> to vector<8x64xbf16>
      %cst_53 = arith.constant dense<0.000000e+00> : vector<8x64xf32>
      %106 = tpu.matmul %104, %105, %cst_53 {dimension_numbers = #tpu.dot_dimension_numbers<[1], [0], [0], [1], [0, 0, 1, 1], [], []>} : vector<8x8xbf16>, vector<8x64xbf16>, vector<8x64xf32> -> vector<8x64xf32>
      %107 = arith.addf %103, %106 : vector<8x64xf32>
      %c1_54 = arith.constant 1 : index
      %c0_55 = arith.constant 0 : index
      %c0_56 = arith.constant 0 : index
      %108 = vector.load %arg18[%c1_54, %c0_55, %c0_56] : memref<2x8x64xf32, #tpu.memory_space<vmem>>, vector<1x8x64xf32>
      %109 = vector.shape_cast %108 : vector<1x8x64xf32> to vector<8x64xf32>
      %110 = vector.shape_cast %107 : vector<8x64xf32> to vector<1x8x64xf32>
      tpu.vector_store %arg18[%c1_54, %c0_55, %c0_56], %110 {strides = array<i32>} : memref<2x8x64xf32, #tpu.memory_space<vmem>>, vector<1x8x64xf32>,
      %c1_57 = arith.constant 1 : index
      %c0_58 = arith.constant 0 : index
      %c0_59 = arith.constant 0 : index
      %111 = vector.load %arg16[%c1_57, %c0_58, %c0_59] : memref<2x8x1xf32, #tpu.memory_space<vmem>>, vector<1x8x1xf32>
      %112 = vector.shape_cast %111 : vector<1x8x1xf32> to vector<8x1xf32>
      %113 = vector.shape_cast %85 : vector<8x1xf32> to vector<1x8x1xf32>
      tpu.vector_store %arg16[%c1_57, %c0_58, %c0_59], %113 {strides = array<i32>} : memref<2x8x1xf32, #tpu.memory_space<vmem>>, vector<1x8x1xf32>,
    } else {
    }
    %c0_i32_3 = arith.constant 0 : i32
    %13 = arith.cmpi eq, %arg2, %c0_i32_3 : i32
    %14 = arith.extui %13 : i1 to i32
    %c0_i32_4 = arith.constant 0 : i32
    %15 = arith.cmpi ne, %14, %c0_i32_4 : i32
    scf.if %15 {
      %cst = arith.constant 0.000000e+00 : f32
      %16 = vector.broadcast %cst : f32 to vector<8x128xf32>
      %c0 = arith.constant 0 : index
      %c0_5 = arith.constant 0 : index
      %c0_6 = arith.constant 0 : index
      %17 = vector.load %arg17[%c0, %c0_5, %c0_6] : memref<2x8x1xf32, #tpu.memory_space<vmem>>, vector<1x8x1xf32>
      %18 = vector.shape_cast %17 : vector<1x8x1xf32> to vector<8x1xf32>
      %19 = tpu.reciprocal %18 {approx = true} : vector<8x1xf32> -> vector<8x1xf32>
      %c0_7 = arith.constant 0 : index
      %c0_8 = arith.constant 0 : index
      %c0_9 = arith.constant 0 : index
      %20 = vector.load %arg18[%c0_7, %c0_8, %c0_9] : memref<2x8x64xf32, #tpu.memory_space<vmem>>, vector<1x8x64xf32>
      %21 = vector.shape_cast %20 : vector<1x8x64xf32> to vector<8x64xf32>
      %22 = vector.broadcast %19 : vector<8x1xf32> to vector<8x64xf32>
      %23 = arith.mulf %21, %22 : vector<8x64xf32>
      %24 = arith.truncf %23 : vector<8x64xf32> to vector<8x64xbf16>
      %c0_10 = arith.constant 0 : index
      %c0_11 = arith.constant 0 : index
      %25 = vector.load %arg10[%c0_10, %c0_11] : memref<128x128xbf16, #tpu.memory_space<vmem>>, vector<64x128xbf16>
      %cst_12 = arith.constant dense<0.000000e+00> : vector<8x128xf32>
      %26 = tpu.matmul %24, %25, %cst_12 {dimension_numbers = #tpu.dot_dimension_numbers<[1], [0], [0], [1], [0, 0, 1, 1], [], []>} : vector<8x64xbf16>, vector<64x128xbf16>, vector<8x128xf32> -> vector<8x128xf32>
      %27 = arith.addf %16, %26 : vector<8x128xf32>
      %c1 = arith.constant 1 : index
      %c0_13 = arith.constant 0 : index
      %c0_14 = arith.constant 0 : index
      %28 = vector.load %arg17[%c1, %c0_13, %c0_14] : memref<2x8x1xf32, #tpu.memory_space<vmem>>, vector<1x8x1xf32>
      %29 = vector.shape_cast %28 : vector<1x8x1xf32> to vector<8x1xf32>
      %30 = tpu.reciprocal %29 {approx = true} : vector<8x1xf32> -> vector<8x1xf32>
      %c1_15 = arith.constant 1 : index
      %c0_16 = arith.constant 0 : index
      %c0_17 = arith.constant 0 : index
      %31 = vector.load %arg18[%c1_15, %c0_16, %c0_17] : memref<2x8x64xf32, #tpu.memory_space<vmem>>, vector<1x8x64xf32>
      %32 = vector.shape_cast %31 : vector<1x8x64xf32> to vector<8x64xf32>
      %33 = vector.broadcast %30 : vector<8x1xf32> to vector<8x64xf32>
      %34 = arith.mulf %32, %33 : vector<8x64xf32>
      %35 = arith.truncf %34 : vector<8x64xf32> to vector<8x64xbf16>
      %c64 = arith.constant 64 : index
      %c0_18 = arith.constant 0 : index
      %36 = vector.load %arg10[%c64, %c0_18] : memref<128x128xbf16, #tpu.memory_space<vmem>>, vector<64x128xbf16>
      %cst_19 = arith.constant dense<0.000000e+00> : vector<8x128xf32>
      %37 = tpu.matmul %35, %36, %cst_19 {dimension_numbers = #tpu.dot_dimension_numbers<[1], [0], [0], [1], [0, 0, 1, 1], [], []>} : vector<8x64xbf16>, vector<64x128xbf16>, vector<8x128xf32> -> vector<8x128xf32>
      %38 = arith.addf %27, %37 : vector<8x128xf32>
      %c0_20 = arith.constant 0 : index
      %c0_21 = arith.constant 0 : index
      %39 = vector.load %arg11[%c0_20, %c0_21] : memref<1x128xf32, #tpu.memory_space<vmem>>, vector<1x128xf32>
      %40 = vector.broadcast %39 : vector<1x128xf32> to vector<8x128xf32>
      %41 = arith.addf %38, %40 : vector<8x128xf32>
      %c0_22 = arith.constant 0 : index
      %c0_23 = arith.constant 0 : index
      %c0_24 = arith.constant 0 : index
      %42 = vector.load %arg4[%c0_22, %c0_23, %c0_24] : memref<1x8x128xbf16, #tpu.memory_space<vmem>>, vector<1x8x128xbf16>
      %43 = vector.shape_cast %42 : vector<1x8x128xbf16> to vector<8x128xbf16>
      %44 = arith.extf %43 : vector<8x128xbf16> to vector<8x128xf32>
      %45 = arith.addf %44, %41 : vector<8x128xf32>
      %c0_25 = arith.constant 0 : index
      %c0_26 = arith.constant 0 : index
      %46 = vector.load %arg12[%c0_25, %c0_26] : memref<1x128xf32, #tpu.memory_space<vmem>>, vector<1x128xf32>
      %c0_27 = arith.constant 0 : index
      %c0_28 = arith.constant 0 : index
      %47 = vector.load %arg13[%c0_27, %c0_28] : memref<1x128xf32, #tpu.memory_space<vmem>>, vector<1x128xf32>
      %cst_29 = arith.constant dense<0.000000e+00> : vector<8xf32>
      %48 = vector.multi_reduction <add>, %45, %cst_29 [1] : vector<8x128xf32> to vector<8xf32>
      %49 = vector.shape_cast %48 : vector<8xf32> to vector<8x1xf32>
      %cst_30 = arith.constant 1.280000e+02 : f32
      %50 = vector.broadcast %cst_30 : f32 to vector<8x1xf32>
      %51 = arith.divf %49, %50 : vector<8x1xf32>
      %52 = vector.broadcast %51 : vector<8x1xf32> to vector<8x128xf32>
      %53 = arith.subf %45, %52 : vector<8x128xf32>
      %54 = arith.mulf %53, %53 : vector<8x128xf32>
      %cst_31 = arith.constant dense<0.000000e+00> : vector<8xf32>
      %55 = vector.multi_reduction <add>, %54, %cst_31 [1] : vector<8x128xf32> to vector<8xf32>
      %56 = vector.shape_cast %55 : vector<8xf32> to vector<8x1xf32>
      %cst_32 = arith.constant 1.280000e+02 : f32
      %57 = vector.broadcast %cst_32 : f32 to vector<8x1xf32>
      %58 = arith.divf %56, %57 : vector<8x1xf32>
      %59 = vector.broadcast %51 : vector<8x1xf32> to vector<8x128xf32>
      %60 = arith.subf %45, %59 : vector<8x128xf32>
      %cst_33 = arith.constant 9.99999974E-6 : f32
      %61 = vector.broadcast %cst_33 : f32 to vector<8x1xf32>
      %62 = arith.addf %58, %61 : vector<8x1xf32>
      %63 = math.rsqrt %62 : vector<8x1xf32>
      %64 = vector.broadcast %63 : vector<8x1xf32> to vector<8x128xf32>
      %65 = arith.mulf %60, %64 : vector<8x128xf32>
      %66 = vector.broadcast %46 : vector<1x128xf32> to vector<8x128xf32>
      %67 = arith.mulf %65, %66 : vector<8x128xf32>
      %68 = vector.broadcast %47 : vector<1x128xf32> to vector<8x128xf32>
      %69 = arith.addf %67, %68 : vector<8x128xf32>
      %70 = arith.truncf %69 : vector<8x128xf32> to vector<8x128xbf16>
      %c0_34 = arith.constant 0 : index
      %c0_35 = arith.constant 0 : index
      %c0_36 = arith.constant 0 : index
      %71 = vector.load %arg14[%c0_34, %c0_35, %c0_36] : memref<1x8x128xbf16, #tpu.memory_space<vmem>>, vector<1x8x128xbf16>
      %72 = vector.shape_cast %71 : vector<1x8x128xbf16> to vector<8x128xbf16>
      %73 = vector.shape_cast %70 : vector<8x128xbf16> to vector<1x8x128xbf16>
      tpu.vector_store %arg14[%c0_34, %c0_35, %c0_36], %73 {strides = array<i32>} : memref<1x8x128xbf16, #tpu.memory_space<vmem>>, vector<1x8x128xbf16>,
    } else {
    }
    return
  }
  func.func @transform_0(%arg0: i32, %arg1: i32, %arg2: i32, %arg3: memref<2xi32, #tpu.memory_space<smem>>) -> (i32, i32, i32) {
    %c0_i32 = arith.constant 0 : i32
    %c0_i32_0 = arith.constant 0 : i32
    return %arg0, %arg1, %c0_i32 : i32, i32, i32
  }
  func.func @transform_1(%arg0: i32, %arg1: i32, %arg2: i32, %arg3: memref<2xi32, #tpu.memory_space<smem>>) -> (i32, i32, i32) {
    %c0_i32 = arith.constant 0 : i32
    %c0_i32_0 = arith.constant 0 : i32
    return %arg0, %arg2, %c0_i32 : i32, i32, i32
  }
  func.func @transform_2(%arg0: i32, %arg1: i32, %arg2: i32, %arg3: memref<2xi32, #tpu.memory_space<smem>>) -> (i32, i32) {
    %c0_i32 = arith.constant 0 : i32
    %c0_i32_0 = arith.constant 0 : i32
    %c0_i32_1 = arith.constant 0 : i32
    return %c0_i32, %c0_i32_0 : i32, i32
  }
  func.func @transform_3(%arg0: i32, %arg1: i32, %arg2: i32, %arg3: memref<2xi32, #tpu.memory_space<smem>>) -> (i32, i32) {
    %c0_i32 = arith.constant 0 : i32
    %c0_i32_0 = arith.constant 0 : i32
    %c0_i32_1 = arith.constant 0 : i32
    return %c0_i32, %c0_i32_0 : i32, i32
  }
  func.func @transform_4(%arg0: i32, %arg1: i32, %arg2: i32, %arg3: memref<2xi32, #tpu.memory_space<smem>>) -> (i32, i32) {
    %c0_i32 = arith.constant 0 : i32
    %c0_i32_0 = arith.constant 0 : i32
    %c0_i32_1 = arith.constant 0 : i32
    return %c0_i32, %c0_i32_0 : i32, i32
  }
  func.func @transform_5(%arg0: i32, %arg1: i32, %arg2: i32, %arg3: memref<2xi32, #tpu.memory_space<smem>>) -> (i32, i32) {
    %c0_i32 = arith.constant 0 : i32
    %c0_i32_0 = arith.constant 0 : i32
    %c0_i32_1 = arith.constant 0 : i32
    return %c0_i32, %c0_i32_0 : i32, i32
  }
  func.func @transform_6(%arg0: i32, %arg1: i32, %arg2: i32, %arg3: memref<2xi32, #tpu.memory_space<smem>>) -> (i32, i32) {
    %c0_i32 = arith.constant 0 : i32
    %c0_i32_0 = arith.constant 0 : i32
    %c0_i32_1 = arith.constant 0 : i32
    return %c0_i32, %c0_i32_0 : i32, i32
  }
  func.func @transform_7(%arg0: i32, %arg1: i32, %arg2: i32, %arg3: memref<2xi32, #tpu.memory_space<smem>>) -> (i32, i32) {
    %c0_i32 = arith.constant 0 : i32
    %c0_i32_0 = arith.constant 0 : i32
    %c0_i32_1 = arith.constant 0 : i32
    return %c0_i32, %c0_i32_0 : i32, i32
  }
  func.func @transform_8(%arg0: i32, %arg1: i32, %arg2: i32, %arg3: memref<2xi32, #tpu.memory_space<smem>>) -> (i32, i32) {
    %c0_i32 = arith.constant 0 : i32
    %c0_i32_0 = arith.constant 0 : i32
    %c0_i32_1 = arith.constant 0 : i32
    return %c0_i32, %c0_i32_0 : i32, i32
  }
  func.func @transform_9(%arg0: i32, %arg1: i32, %arg2: i32, %arg3: memref<2xi32, #tpu.memory_space<smem>>) -> (i32, i32) {
    %c0_i32 = arith.constant 0 : i32
    %c0_i32_0 = arith.constant 0 : i32
    %c0_i32_1 = arith.constant 0 : i32
    return %c0_i32, %c0_i32_0 : i32, i32
  }
  func.func @transform_10(%arg0: i32, %arg1: i32, %arg2: i32, %arg3: memref<2xi32, #tpu.memory_space<smem>>) -> (i32, i32, i32) {
    %c0_i32 = arith.constant 0 : i32
    %c0_i32_0 = arith.constant 0 : i32
    return %arg0, %arg1, %c0_i32 : i32, i32, i32
  }
}

module attributes {stable_mosaic.version = 11 : i64} {
  func.func @kernel(%arg0: i32, %arg1: i32, %arg2: i32, %arg3: memref<2xi32, #tpu.memory_space<smem>>, %arg4: memref<1x8x128xbf16, #tpu.memory_space<vmem>>, %arg5: memref<1x8x128xbf16, #tpu.memory_space<vmem>>, %arg6: memref<128x128xbf16, #tpu.memory_space<vmem>>, %arg7: memref<1x128xf32, #tpu.memory_space<vmem>>, %arg8: memref<128x256xbf16, #tpu.memory_space<vmem>>, %arg9: memref<1x256xf32, #tpu.memory_space<vmem>>, %arg10: memref<128x128xbf16, #tpu.memory_space<vmem>>, %arg11: memref<1x128xf32, #tpu.memory_space<vmem>>, %arg12: memref<1x128xf32, #tpu.memory_space<vmem>>, %arg13: memref<1x128xf32, #tpu.memory_space<vmem>>, %arg14: memref<128x256xbf16, #tpu.memory_space<vmem>>, %arg15: memref<1x256xf32, #tpu.memory_space<vmem>>, %arg16: memref<256x128xbf16, #tpu.memory_space<vmem>>, %arg17: memref<1x128xf32, #tpu.memory_space<vmem>>, %arg18: memref<1x128xf32, #tpu.memory_space<vmem>>, %arg19: memref<1x128xf32, #tpu.memory_space<vmem>>, %arg20: memref<1x8x128xbf16, #tpu.memory_space<vmem>>, %arg21: memref<8x128xbf16, #tpu.memory_space<vmem>>, %arg22: memref<2x8x1xf32, #tpu.memory_space<vmem>>, %arg23: memref<2x8x1xf32, #tpu.memory_space<vmem>>, %arg24: memref<2x8x64xf32, #tpu.memory_space<vmem>>) attributes {dimension_semantics = [#tpu.dimension_semantics<parallel>, #tpu.dimension_semantics<parallel>, #tpu.dimension_semantics<arbitrary>], iteration_bounds = array<i64: 2, 1, 1>, scalar_prefetch = 1 : i64, scratch_operands = 4 : i64, tpu.core_type = #tpu.core_type<tc>, window_params = [{transform_indices = @transform_0, window_bounds = array<i64: 1, 8, 128>}, {transform_indices = @transform_1, window_bounds = array<i64: 1, 8, 128>}, {pipeline_mode = #tpu.pipeline_mode<synchronous>, transform_indices = @transform_2, window_bounds = array<i64: 128, 128>}, {pipeline_mode = #tpu.pipeline_mode<synchronous>, transform_indices = @transform_3, window_bounds = array<i64: 1, 128>}, {pipeline_mode = #tpu.pipeline_mode<synchronous>, transform_indices = @transform_4, window_bounds = array<i64: 128, 256>}, {pipeline_mode = #tpu.pipeline_mode<synchronous>, transform_indices = @transform_5, window_bounds = array<i64: 1, 256>}, {pipeline_mode = #tpu.pipeline_mode<synchronous>, transform_indices = @transform_6, window_bounds = array<i64: 128, 128>}, {pipeline_mode = #tpu.pipeline_mode<synchronous>, transform_indices = @transform_7, window_bounds = array<i64: 1, 128>}, {pipeline_mode = #tpu.pipeline_mode<synchronous>, transform_indices = @transform_8, window_bounds = array<i64: 1, 128>}, {pipeline_mode = #tpu.pipeline_mode<synchronous>, transform_indices = @transform_9, window_bounds = array<i64: 1, 128>}, {pipeline_mode = #tpu.pipeline_mode<synchronous>, transform_indices = @transform_10, window_bounds = array<i64: 128, 256>}, {pipeline_mode = #tpu.pipeline_mode<synchronous>, transform_indices = @transform_11, window_bounds = array<i64: 1, 256>}, {pipeline_mode = #tpu.pipeline_mode<synchronous>, transform_indices = @transform_12, window_bounds = array<i64: 256, 128>}, {pipeline_mode = #tpu.pipeline_mode<synchronous>, transform_indices = @transform_13, window_bounds = array<i64: 1, 128>}, {pipeline_mode = #tpu.pipeline_mode<synchronous>, transform_indices = @transform_14, window_bounds = array<i64: 1, 128>}, {pipeline_mode = #tpu.pipeline_mode<synchronous>, transform_indices = @transform_15, window_bounds = array<i64: 1, 128>}, {transform_indices = @transform_16, window_bounds = array<i64: 1, 8, 128>}]} {
    %c0_i32 = arith.constant 0 : i32
    %0 = arith.cmpi eq, %arg2, %c0_i32 : i32
    %1 = arith.extui %0 : i1 to i32
    %c0_i32_0 = arith.constant 0 : i32
    %2 = arith.cmpi ne, %1, %c0_i32_0 : i32
    scf.if %2 {
      %c0 = arith.constant 0 : index
      %c0_4 = arith.constant 0 : index
      %c0_5 = arith.constant 0 : index
      %12 = vector.load %arg4[%c0, %c0_4, %c0_5] : memref<1x8x128xbf16, #tpu.memory_space<vmem>>, vector<1x8x128xbf16>
      %13 = vector.shape_cast %12 : vector<1x8x128xbf16> to vector<8x128xbf16>
      %c0_6 = arith.constant 0 : index
      %c0_7 = arith.constant 0 : index
      %14 = vector.load %arg6[%c0_6, %c0_7] : memref<128x128xbf16, #tpu.memory_space<vmem>>, vector<128x128xbf16>
      %cst = arith.constant dense<0.000000e+00> : vector<8x128xf32>
      %15 = tpu.matmul %13, %14, %cst {dimension_numbers = #tpu.dot_dimension_numbers<[1], [0], [0], [1], [0, 0, 1, 1], [], []>} : vector<8x128xbf16>, vector<128x128xbf16>, vector<8x128xf32> -> vector<8x128xf32>
      %c0_8 = arith.constant 0 : index
      %c0_9 = arith.constant 0 : index
      %16 = vector.load %arg7[%c0_8, %c0_9] : memref<1x128xf32, #tpu.memory_space<vmem>>, vector<1x128xf32>
      %17 = vector.broadcast %16 : vector<1x128xf32> to vector<8x128xf32>
      %18 = arith.addf %15, %17 : vector<8x128xf32>
      %cst_10 = arith.constant 1.250000e-01 : f32
      %19 = vector.broadcast %cst_10 : f32 to vector<8x128xf32>
      %20 = arith.mulf %18, %19 : vector<8x128xf32>
      %21 = arith.truncf %20 : vector<8x128xf32> to vector<8x128xbf16>
      %c0_11 = arith.constant 0 : index
      %c0_12 = arith.constant 0 : index
      %22 = vector.load %arg21[%c0_11, %c0_12] : memref<8x128xbf16, #tpu.memory_space<vmem>>, vector<8x128xbf16>
      tpu.vector_store %arg21[%c0_11, %c0_12], %21 {strides = array<i32>} : memref<8x128xbf16, #tpu.memory_space<vmem>>, vector<8x128xbf16>,
      %cst_13 = arith.constant 0xFF800000 : f32
      %23 = vector.broadcast %cst_13 : f32 to vector<2x8x1xf32>
      %c0_14 = arith.constant 0 : index
      %c0_15 = arith.constant 0 : index
      %c0_16 = arith.constant 0 : index
      %24 = vector.load %arg22[%c0_14, %c0_15, %c0_16] : memref<2x8x1xf32, #tpu.memory_space<vmem>>, vector<2x8x1xf32>
      tpu.vector_store %arg22[%c0_14, %c0_15, %c0_16], %23 {strides = array<i32>} : memref<2x8x1xf32, #tpu.memory_space<vmem>>, vector<2x8x1xf32>,
      %cst_17 = arith.constant 0.000000e+00 : f32
      %25 = vector.broadcast %cst_17 : f32 to vector<2x8x1xf32>
      %c0_18 = arith.constant 0 : index
      %c0_19 = arith.constant 0 : index
      %c0_20 = arith.constant 0 : index
      %26 = vector.load %arg23[%c0_18, %c0_19, %c0_20] : memref<2x8x1xf32, #tpu.memory_space<vmem>>, vector<2x8x1xf32>
      tpu.vector_store %arg23[%c0_18, %c0_19, %c0_20], %25 {strides = array<i32>} : memref<2x8x1xf32, #tpu.memory_space<vmem>>, vector<2x8x1xf32>,
      %cst_21 = arith.constant 0.000000e+00 : f32
      %27 = vector.broadcast %cst_21 : f32 to vector<2x8x64xf32>
      %c0_22 = arith.constant 0 : index
      %c0_23 = arith.constant 0 : index
      %c0_24 = arith.constant 0 : index
      %28 = vector.load %arg24[%c0_22, %c0_23, %c0_24] : memref<2x8x64xf32, #tpu.memory_space<vmem>>, vector<2x8x64xf32>
      tpu.vector_store %arg24[%c0_22, %c0_23, %c0_24], %27 {strides = array<i32>} : memref<2x8x64xf32, #tpu.memory_space<vmem>>, vector<2x8x64xf32>,
    } else {
    }
    %3 = arith.index_cast %arg0 : i32 to index
    %4 = memref.load %arg3[%3] : memref<2xi32, #tpu.memory_space<smem>>
    %c8_i32 = arith.constant 8 : i32
    %5 = arith.muli %arg2, %c8_i32 : i32
    %6 = arith.cmpi slt, %5, %4 : i32
    %7 = arith.extui %6 : i1 to i32
    %c0_i32_1 = arith.constant 0 : i32
    %8 = arith.cmpi ne, %7, %c0_i32_1 : i32
    scf.if %8 {
      %c0 = arith.constant 0 : index
      %c0_4 = arith.constant 0 : index
      %c0_5 = arith.constant 0 : index
      %12 = vector.load %arg5[%c0, %c0_4, %c0_5] : memref<1x8x128xbf16, #tpu.memory_space<vmem>>, vector<1x8x128xbf16>
      %13 = vector.shape_cast %12 : vector<1x8x128xbf16> to vector<8x128xbf16>
      %c0_6 = arith.constant 0 : index
      %c0_7 = arith.constant 0 : index
      %14 = vector.load %arg8[%c0_6, %c0_7] : memref<128x256xbf16, #tpu.memory_space<vmem>>, vector<128x256xbf16>
      %cst = arith.constant dense<0.000000e+00> : vector<8x256xf32>
      %15 = tpu.matmul %13, %14, %cst {dimension_numbers = #tpu.dot_dimension_numbers<[1], [0], [0], [1], [0, 0, 1, 1], [], []>} : vector<8x128xbf16>, vector<128x256xbf16>, vector<8x256xf32> -> vector<8x256xf32>
      %c0_8 = arith.constant 0 : index
      %c0_9 = arith.constant 0 : index
      %16 = vector.load %arg9[%c0_8, %c0_9] : memref<1x256xf32, #tpu.memory_space<vmem>>, vector<1x256xf32>
      %17 = vector.broadcast %16 : vector<1x256xf32> to vector<8x256xf32>
      %18 = arith.addf %15, %17 : vector<8x256xf32>
      %19 = vector.extract_strided_slice %18 {offsets = [0, 0], sizes = [8, 128], strides = [1, 1]} : vector<8x256xf32> to vector<8x128xf32>
      %20 = arith.truncf %19 : vector<8x128xf32> to vector<8x128xbf16>
      %21 = vector.extract_strided_slice %18 {offsets = [0, 128], sizes = [8, 128], strides = [1, 1]} : vector<8x256xf32> to vector<8x128xf32>
      %22 = arith.truncf %21 : vector<8x128xf32> to vector<8x128xbf16>
      %23 = tpu.iota {dimensions = array<i32: 1>} : vector<8x8xi32>
      %24 = vector.broadcast %5 : i32 to vector<8x8xi32>
      %25 = arith.addi %24, %23 : vector<8x8xi32>
      %26 = vector.broadcast %4 : i32 to vector<8x8xi32>
      %27 = arith.cmpi sge, %25, %26 : vector<8x8xi32>
      %c0_10 = arith.constant 0 : index
      %c0_11 = arith.constant 0 : index
      %28 = vector.load %arg21[%c0_10, %c0_11] : memref<8x128xbf16, #tpu.memory_space<vmem>>, vector<8x64xbf16>
      %29 = vector.extract_strided_slice %20 {offsets = [0, 0], sizes = [8, 64], strides = [1, 1]} : vector<8x128xbf16> to vector<8x64xbf16>
      %cst_12 = arith.constant dense<0.000000e+00> : vector<8x8xf32>
      %30 = tpu.matmul %28, %29, %cst_12 {dimension_numbers = #tpu.dot_dimension_numbers<[1], [1], [0], [0], [0, 0, 1, 0], [], []>} : vector<8x64xbf16>, vector<8x64xbf16>, vector<8x8xf32> -> vector<8x8xf32>
      %cst_13 = arith.constant -1.000000e+09 : f32
      %31 = vector.broadcast %cst_13 : f32 to vector<8x8xf32>
      %32 = arith.select %27, %31, %30 : vector<8x8xi1>, vector<8x8xf32>
      %c0_14 = arith.constant 0 : index
      %c0_15 = arith.constant 0 : index
      %c0_16 = arith.constant 0 : index
      %33 = vector.load %arg22[%c0_14, %c0_15, %c0_16] : memref<2x8x1xf32, #tpu.memory_space<vmem>>, vector<1x8x1xf32>
      %34 = vector.shape_cast %33 : vector<1x8x1xf32> to vector<8x1xf32>
      %cst_17 = arith.constant dense<0xFF800000> : vector<8xf32>
      %35 = vector.multi_reduction <maximumf>, %32, %cst_17 [1] : vector<8x8xf32> to vector<8xf32>
      %36 = vector.shape_cast %35 : vector<8xf32> to vector<8x1xf32>
      %37 = arith.maximumf %34, %36 : vector<8x1xf32>
      %38 = arith.subf %34, %37 : vector<8x1xf32>
      %39 = math.exp %38 : vector<8x1xf32>
      %40 = vector.broadcast %37 : vector<8x1xf32> to vector<8x8xf32>
      %41 = arith.subf %32, %40 : vector<8x8xf32>
      %42 = math.exp %41 : vector<8x8xf32>
      %c0_18 = arith.constant 0 : index
      %c0_19 = arith.constant 0 : index
      %c0_20 = arith.constant 0 : index
      %43 = vector.load %arg23[%c0_18, %c0_19, %c0_20] : memref<2x8x1xf32, #tpu.memory_space<vmem>>, vector<1x8x1xf32>
      %44 = vector.shape_cast %43 : vector<1x8x1xf32> to vector<8x1xf32>
      %45 = arith.mulf %39, %44 : vector<8x1xf32>
      %cst_21 = arith.constant dense<0.000000e+00> : vector<8xf32>
      %46 = vector.multi_reduction <add>, %42, %cst_21 [1] : vector<8x8xf32> to vector<8xf32>
      %47 = vector.shape_cast %46 : vector<8xf32> to vector<8x1xf32>
      %48 = arith.addf %45, %47 : vector<8x1xf32>
      %c0_22 = arith.constant 0 : index
      %c0_23 = arith.constant 0 : index
      %c0_24 = arith.constant 0 : index
      %49 = vector.load %arg23[%c0_22, %c0_23, %c0_24] : memref<2x8x1xf32, #tpu.memory_space<vmem>>, vector<1x8x1xf32>
      %50 = vector.shape_cast %49 : vector<1x8x1xf32> to vector<8x1xf32>
      %51 = vector.shape_cast %48 : vector<8x1xf32> to vector<1x8x1xf32>
      tpu.vector_store %arg23[%c0_22, %c0_23, %c0_24], %51 {strides = array<i32>} : memref<2x8x1xf32, #tpu.memory_space<vmem>>, vector<1x8x1xf32>,
      %c0_25 = arith.constant 0 : index
      %c0_26 = arith.constant 0 : index
      %c0_27 = arith.constant 0 : index
      %52 = vector.load %arg24[%c0_25, %c0_26, %c0_27] : memref<2x8x64xf32, #tpu.memory_space<vmem>>, vector<1x8x64xf32>
      %53 = vector.shape_cast %52 : vector<1x8x64xf32> to vector<8x64xf32>
      %54 = vector.broadcast %39 : vector<8x1xf32> to vector<8x64xf32>
      %55 = arith.mulf %54, %53 : vector<8x64xf32>
      %56 = arith.truncf %42 : vector<8x8xf32> to vector<8x8xbf16>
      %57 = vector.extract_strided_slice %22 {offsets = [0, 0], sizes = [8, 64], strides = [1, 1]} : vector<8x128xbf16> to vector<8x64xbf16>
      %cst_28 = arith.constant dense<0.000000e+00> : vector<8x64xf32>
      %58 = tpu.matmul %56, %57, %cst_28 {dimension_numbers = #tpu.dot_dimension_numbers<[1], [0], [0], [1], [0, 0, 1, 1], [], []>} : vector<8x8xbf16>, vector<8x64xbf16>, vector<8x64xf32> -> vector<8x64xf32>
      %59 = arith.addf %55, %58 : vector<8x64xf32>
      %c0_29 = arith.constant 0 : index
      %c0_30 = arith.constant 0 : index
      %c0_31 = arith.constant 0 : index
      %60 = vector.load %arg24[%c0_29, %c0_30, %c0_31] : memref<2x8x64xf32, #tpu.memory_space<vmem>>, vector<1x8x64xf32>
      %61 = vector.shape_cast %60 : vector<1x8x64xf32> to vector<8x64xf32>
      %62 = vector.shape_cast %59 : vector<8x64xf32> to vector<1x8x64xf32>
      tpu.vector_store %arg24[%c0_29, %c0_30, %c0_31], %62 {strides = array<i32>} : memref<2x8x64xf32, #tpu.memory_space<vmem>>, vector<1x8x64xf32>,
      %c0_32 = arith.constant 0 : index
      %c0_33 = arith.constant 0 : index
      %c0_34 = arith.constant 0 : index
      %63 = vector.load %arg22[%c0_32, %c0_33, %c0_34] : memref<2x8x1xf32, #tpu.memory_space<vmem>>, vector<1x8x1xf32>
      %64 = vector.shape_cast %63 : vector<1x8x1xf32> to vector<8x1xf32>
      %65 = vector.shape_cast %37 : vector<8x1xf32> to vector<1x8x1xf32>
      tpu.vector_store %arg22[%c0_32, %c0_33, %c0_34], %65 {strides = array<i32>} : memref<2x8x1xf32, #tpu.memory_space<vmem>>, vector<1x8x1xf32>,
      %c0_35 = arith.constant 0 : index
      %c64 = arith.constant 64 : index
      %66 = vector.load %arg21[%c0_35, %c64] : memref<8x128xbf16, #tpu.memory_space<vmem>>, vector<8x64xbf16>
      %67 = vector.extract_strided_slice %20 {offsets = [0, 64], sizes = [8, 64], strides = [1, 1]} : vector<8x128xbf16> to vector<8x64xbf16>
      %cst_36 = arith.constant dense<0.000000e+00> : vector<8x8xf32>
      %68 = tpu.matmul %66, %67, %cst_36 {dimension_numbers = #tpu.dot_dimension_numbers<[1], [1], [0], [0], [0, 0, 1, 0], [], []>} : vector<8x64xbf16>, vector<8x64xbf16>, vector<8x8xf32> -> vector<8x8xf32>
      %cst_37 = arith.constant -1.000000e+09 : f32
      %69 = vector.broadcast %cst_37 : f32 to vector<8x8xf32>
      %70 = arith.select %27, %69, %68 : vector<8x8xi1>, vector<8x8xf32>
      %c1 = arith.constant 1 : index
      %c0_38 = arith.constant 0 : index
      %c0_39 = arith.constant 0 : index
      %71 = vector.load %arg22[%c1, %c0_38, %c0_39] : memref<2x8x1xf32, #tpu.memory_space<vmem>>, vector<1x8x1xf32>
      %72 = vector.shape_cast %71 : vector<1x8x1xf32> to vector<8x1xf32>
      %cst_40 = arith.constant dense<0xFF800000> : vector<8xf32>
      %73 = vector.multi_reduction <maximumf>, %70, %cst_40 [1] : vector<8x8xf32> to vector<8xf32>
      %74 = vector.shape_cast %73 : vector<8xf32> to vector<8x1xf32>
      %75 = arith.maximumf %72, %74 : vector<8x1xf32>
      %76 = arith.subf %72, %75 : vector<8x1xf32>
      %77 = math.exp %76 : vector<8x1xf32>
      %78 = vector.broadcast %75 : vector<8x1xf32> to vector<8x8xf32>
      %79 = arith.subf %70, %78 : vector<8x8xf32>
      %80 = math.exp %79 : vector<8x8xf32>
      %c1_41 = arith.constant 1 : index
      %c0_42 = arith.constant 0 : index
      %c0_43 = arith.constant 0 : index
      %81 = vector.load %arg23[%c1_41, %c0_42, %c0_43] : memref<2x8x1xf32, #tpu.memory_space<vmem>>, vector<1x8x1xf32>
      %82 = vector.shape_cast %81 : vector<1x8x1xf32> to vector<8x1xf32>
      %83 = arith.mulf %77, %82 : vector<8x1xf32>
      %cst_44 = arith.constant dense<0.000000e+00> : vector<8xf32>
      %84 = vector.multi_reduction <add>, %80, %cst_44 [1] : vector<8x8xf32> to vector<8xf32>
      %85 = vector.shape_cast %84 : vector<8xf32> to vector<8x1xf32>
      %86 = arith.addf %83, %85 : vector<8x1xf32>
      %c1_45 = arith.constant 1 : index
      %c0_46 = arith.constant 0 : index
      %c0_47 = arith.constant 0 : index
      %87 = vector.load %arg23[%c1_45, %c0_46, %c0_47] : memref<2x8x1xf32, #tpu.memory_space<vmem>>, vector<1x8x1xf32>
      %88 = vector.shape_cast %87 : vector<1x8x1xf32> to vector<8x1xf32>
      %89 = vector.shape_cast %86 : vector<8x1xf32> to vector<1x8x1xf32>
      tpu.vector_store %arg23[%c1_45, %c0_46, %c0_47], %89 {strides = array<i32>} : memref<2x8x1xf32, #tpu.memory_space<vmem>>, vector<1x8x1xf32>,
      %c1_48 = arith.constant 1 : index
      %c0_49 = arith.constant 0 : index
      %c0_50 = arith.constant 0 : index
      %90 = vector.load %arg24[%c1_48, %c0_49, %c0_50] : memref<2x8x64xf32, #tpu.memory_space<vmem>>, vector<1x8x64xf32>
      %91 = vector.shape_cast %90 : vector<1x8x64xf32> to vector<8x64xf32>
      %92 = vector.broadcast %77 : vector<8x1xf32> to vector<8x64xf32>
      %93 = arith.mulf %92, %91 : vector<8x64xf32>
      %94 = arith.truncf %80 : vector<8x8xf32> to vector<8x8xbf16>
      %95 = vector.extract_strided_slice %22 {offsets = [0, 64], sizes = [8, 64], strides = [1, 1]} : vector<8x128xbf16> to vector<8x64xbf16>
      %cst_51 = arith.constant dense<0.000000e+00> : vector<8x64xf32>
      %96 = tpu.matmul %94, %95, %cst_51 {dimension_numbers = #tpu.dot_dimension_numbers<[1], [0], [0], [1], [0, 0, 1, 1], [], []>} : vector<8x8xbf16>, vector<8x64xbf16>, vector<8x64xf32> -> vector<8x64xf32>
      %97 = arith.addf %93, %96 : vector<8x64xf32>
      %c1_52 = arith.constant 1 : index
      %c0_53 = arith.constant 0 : index
      %c0_54 = arith.constant 0 : index
      %98 = vector.load %arg24[%c1_52, %c0_53, %c0_54] : memref<2x8x64xf32, #tpu.memory_space<vmem>>, vector<1x8x64xf32>
      %99 = vector.shape_cast %98 : vector<1x8x64xf32> to vector<8x64xf32>
      %100 = vector.shape_cast %97 : vector<8x64xf32> to vector<1x8x64xf32>
      tpu.vector_store %arg24[%c1_52, %c0_53, %c0_54], %100 {strides = array<i32>} : memref<2x8x64xf32, #tpu.memory_space<vmem>>, vector<1x8x64xf32>,
      %c1_55 = arith.constant 1 : index
      %c0_56 = arith.constant 0 : index
      %c0_57 = arith.constant 0 : index
      %101 = vector.load %arg22[%c1_55, %c0_56, %c0_57] : memref<2x8x1xf32, #tpu.memory_space<vmem>>, vector<1x8x1xf32>
      %102 = vector.shape_cast %101 : vector<1x8x1xf32> to vector<8x1xf32>
      %103 = vector.shape_cast %75 : vector<8x1xf32> to vector<1x8x1xf32>
      tpu.vector_store %arg22[%c1_55, %c0_56, %c0_57], %103 {strides = array<i32>} : memref<2x8x1xf32, #tpu.memory_space<vmem>>, vector<1x8x1xf32>,
    } else {
    }
    %c0_i32_2 = arith.constant 0 : i32
    %9 = arith.cmpi eq, %arg2, %c0_i32_2 : i32
    %10 = arith.extui %9 : i1 to i32
    %c0_i32_3 = arith.constant 0 : i32
    %11 = arith.cmpi ne, %10, %c0_i32_3 : i32
    scf.if %11 {
      %cst = arith.constant 0.000000e+00 : f32
      %12 = vector.broadcast %cst : f32 to vector<8x128xf32>
      %c0 = arith.constant 0 : index
      %c0_4 = arith.constant 0 : index
      %c0_5 = arith.constant 0 : index
      %13 = vector.load %arg23[%c0, %c0_4, %c0_5] : memref<2x8x1xf32, #tpu.memory_space<vmem>>, vector<1x8x1xf32>
      %14 = vector.shape_cast %13 : vector<1x8x1xf32> to vector<8x1xf32>
      %15 = tpu.reciprocal %14 {approx = true} : vector<8x1xf32> -> vector<8x1xf32>
      %c0_6 = arith.constant 0 : index
      %c0_7 = arith.constant 0 : index
      %c0_8 = arith.constant 0 : index
      %16 = vector.load %arg24[%c0_6, %c0_7, %c0_8] : memref<2x8x64xf32, #tpu.memory_space<vmem>>, vector<1x8x64xf32>
      %17 = vector.shape_cast %16 : vector<1x8x64xf32> to vector<8x64xf32>
      %18 = vector.broadcast %15 : vector<8x1xf32> to vector<8x64xf32>
      %19 = arith.mulf %17, %18 : vector<8x64xf32>
      %20 = arith.truncf %19 : vector<8x64xf32> to vector<8x64xbf16>
      %c0_9 = arith.constant 0 : index
      %c0_10 = arith.constant 0 : index
      %21 = vector.load %arg10[%c0_9, %c0_10] : memref<128x128xbf16, #tpu.memory_space<vmem>>, vector<64x128xbf16>
      %cst_11 = arith.constant dense<0.000000e+00> : vector<8x128xf32>
      %22 = tpu.matmul %20, %21, %cst_11 {dimension_numbers = #tpu.dot_dimension_numbers<[1], [0], [0], [1], [0, 0, 1, 1], [], []>} : vector<8x64xbf16>, vector<64x128xbf16>, vector<8x128xf32> -> vector<8x128xf32>
      %23 = arith.addf %12, %22 : vector<8x128xf32>
      %c1 = arith.constant 1 : index
      %c0_12 = arith.constant 0 : index
      %c0_13 = arith.constant 0 : index
      %24 = vector.load %arg23[%c1, %c0_12, %c0_13] : memref<2x8x1xf32, #tpu.memory_space<vmem>>, vector<1x8x1xf32>
      %25 = vector.shape_cast %24 : vector<1x8x1xf32> to vector<8x1xf32>
      %26 = tpu.reciprocal %25 {approx = true} : vector<8x1xf32> -> vector<8x1xf32>
      %c1_14 = arith.constant 1 : index
      %c0_15 = arith.constant 0 : index
      %c0_16 = arith.constant 0 : index
      %27 = vector.load %arg24[%c1_14, %c0_15, %c0_16] : memref<2x8x64xf32, #tpu.memory_space<vmem>>, vector<1x8x64xf32>
      %28 = vector.shape_cast %27 : vector<1x8x64xf32> to vector<8x64xf32>
      %29 = vector.broadcast %26 : vector<8x1xf32> to vector<8x64xf32>
      %30 = arith.mulf %28, %29 : vector<8x64xf32>
      %31 = arith.truncf %30 : vector<8x64xf32> to vector<8x64xbf16>
      %c64 = arith.constant 64 : index
      %c0_17 = arith.constant 0 : index
      %32 = vector.load %arg10[%c64, %c0_17] : memref<128x128xbf16, #tpu.memory_space<vmem>>, vector<64x128xbf16>
      %cst_18 = arith.constant dense<0.000000e+00> : vector<8x128xf32>
      %33 = tpu.matmul %31, %32, %cst_18 {dimension_numbers = #tpu.dot_dimension_numbers<[1], [0], [0], [1], [0, 0, 1, 1], [], []>} : vector<8x64xbf16>, vector<64x128xbf16>, vector<8x128xf32> -> vector<8x128xf32>
      %34 = arith.addf %23, %33 : vector<8x128xf32>
      %c0_19 = arith.constant 0 : index
      %c0_20 = arith.constant 0 : index
      %35 = vector.load %arg11[%c0_19, %c0_20] : memref<1x128xf32, #tpu.memory_space<vmem>>, vector<1x128xf32>
      %36 = vector.broadcast %35 : vector<1x128xf32> to vector<8x128xf32>
      %37 = arith.addf %34, %36 : vector<8x128xf32>
      %c0_21 = arith.constant 0 : index
      %c0_22 = arith.constant 0 : index
      %c0_23 = arith.constant 0 : index
      %38 = vector.load %arg4[%c0_21, %c0_22, %c0_23] : memref<1x8x128xbf16, #tpu.memory_space<vmem>>, vector<1x8x128xbf16>
      %39 = vector.shape_cast %38 : vector<1x8x128xbf16> to vector<8x128xbf16>
      %40 = arith.extf %39 : vector<8x128xbf16> to vector<8x128xf32>
      %41 = arith.addf %40, %37 : vector<8x128xf32>
      %c0_24 = arith.constant 0 : index
      %c0_25 = arith.constant 0 : index
      %42 = vector.load %arg12[%c0_24, %c0_25] : memref<1x128xf32, #tpu.memory_space<vmem>>, vector<1x128xf32>
      %c0_26 = arith.constant 0 : index
      %c0_27 = arith.constant 0 : index
      %43 = vector.load %arg13[%c0_26, %c0_27] : memref<1x128xf32, #tpu.memory_space<vmem>>, vector<1x128xf32>
      %cst_28 = arith.constant dense<0.000000e+00> : vector<8xf32>
      %44 = vector.multi_reduction <add>, %41, %cst_28 [1] : vector<8x128xf32> to vector<8xf32>
      %45 = vector.shape_cast %44 : vector<8xf32> to vector<8x1xf32>
      %cst_29 = arith.constant 1.280000e+02 : f32
      %46 = vector.broadcast %cst_29 : f32 to vector<8x1xf32>
      %47 = arith.divf %45, %46 : vector<8x1xf32>
      %48 = vector.broadcast %47 : vector<8x1xf32> to vector<8x128xf32>
      %49 = arith.subf %41, %48 : vector<8x128xf32>
      %50 = arith.mulf %49, %49 : vector<8x128xf32>
      %cst_30 = arith.constant dense<0.000000e+00> : vector<8xf32>
      %51 = vector.multi_reduction <add>, %50, %cst_30 [1] : vector<8x128xf32> to vector<8xf32>
      %52 = vector.shape_cast %51 : vector<8xf32> to vector<8x1xf32>
      %cst_31 = arith.constant 1.280000e+02 : f32
      %53 = vector.broadcast %cst_31 : f32 to vector<8x1xf32>
      %54 = arith.divf %52, %53 : vector<8x1xf32>
      %55 = vector.broadcast %47 : vector<8x1xf32> to vector<8x128xf32>
      %56 = arith.subf %41, %55 : vector<8x128xf32>
      %cst_32 = arith.constant 9.99999974E-6 : f32
      %57 = vector.broadcast %cst_32 : f32 to vector<8x1xf32>
      %58 = arith.addf %54, %57 : vector<8x1xf32>
      %59 = math.rsqrt %58 : vector<8x1xf32>
      %60 = vector.broadcast %59 : vector<8x1xf32> to vector<8x128xf32>
      %61 = arith.mulf %56, %60 : vector<8x128xf32>
      %62 = vector.broadcast %42 : vector<1x128xf32> to vector<8x128xf32>
      %63 = arith.mulf %61, %62 : vector<8x128xf32>
      %64 = vector.broadcast %43 : vector<1x128xf32> to vector<8x128xf32>
      %65 = arith.addf %63, %64 : vector<8x128xf32>
      %66 = arith.truncf %65 : vector<8x128xf32> to vector<8x128xbf16>
      %c0_33 = arith.constant 0 : index
      %c0_34 = arith.constant 0 : index
      %67 = vector.load %arg14[%c0_33, %c0_34] : memref<128x256xbf16, #tpu.memory_space<vmem>>, vector<128x256xbf16>
      %cst_35 = arith.constant dense<0.000000e+00> : vector<8x256xf32>
      %68 = tpu.matmul %66, %67, %cst_35 {dimension_numbers = #tpu.dot_dimension_numbers<[1], [0], [0], [1], [0, 0, 1, 1], [], []>} : vector<8x128xbf16>, vector<128x256xbf16>, vector<8x256xf32> -> vector<8x256xf32>
      %c0_36 = arith.constant 0 : index
      %c0_37 = arith.constant 0 : index
      %69 = vector.load %arg15[%c0_36, %c0_37] : memref<1x256xf32, #tpu.memory_space<vmem>>, vector<1x256xf32>
      %70 = vector.broadcast %69 : vector<1x256xf32> to vector<8x256xf32>
      %71 = arith.addf %68, %70 : vector<8x256xf32>
      %cst_38 = arith.constant 0.000000e+00 : f32
      %72 = vector.broadcast %cst_38 : f32 to vector<8x256xf32>
      %73 = arith.maximumf %71, %72 : vector<8x256xf32>
      %74 = arith.truncf %73 : vector<8x256xf32> to vector<8x256xbf16>
      %c0_39 = arith.constant 0 : index
      %c0_40 = arith.constant 0 : index
      %75 = vector.load %arg16[%c0_39, %c0_40] : memref<256x128xbf16, #tpu.memory_space<vmem>>, vector<256x128xbf16>
      %cst_41 = arith.constant dense<0.000000e+00> : vector<8x128xf32>
      %76 = tpu.matmul %74, %75, %cst_41 {dimension_numbers = #tpu.dot_dimension_numbers<[1], [0], [0], [1], [0, 0, 1, 1], [], []>} : vector<8x256xbf16>, vector<256x128xbf16>, vector<8x128xf32> -> vector<8x128xf32>
      %c0_42 = arith.constant 0 : index
      %c0_43 = arith.constant 0 : index
      %77 = vector.load %arg17[%c0_42, %c0_43] : memref<1x128xf32, #tpu.memory_space<vmem>>, vector<1x128xf32>
      %78 = vector.broadcast %77 : vector<1x128xf32> to vector<8x128xf32>
      %79 = arith.addf %76, %78 : vector<8x128xf32>
      %80 = arith.addf %65, %79 : vector<8x128xf32>
      %c0_44 = arith.constant 0 : index
      %c0_45 = arith.constant 0 : index
      %81 = vector.load %arg18[%c0_44, %c0_45] : memref<1x128xf32, #tpu.memory_space<vmem>>, vector<1x128xf32>
      %c0_46 = arith.constant 0 : index
      %c0_47 = arith.constant 0 : index
      %82 = vector.load %arg19[%c0_46, %c0_47] : memref<1x128xf32, #tpu.memory_space<vmem>>, vector<1x128xf32>
      %cst_48 = arith.constant dense<0.000000e+00> : vector<8xf32>
      %83 = vector.multi_reduction <add>, %80, %cst_48 [1] : vector<8x128xf32> to vector<8xf32>
      %84 = vector.shape_cast %83 : vector<8xf32> to vector<8x1xf32>
      %cst_49 = arith.constant 1.280000e+02 : f32
      %85 = vector.broadcast %cst_49 : f32 to vector<8x1xf32>
      %86 = arith.divf %84, %85 : vector<8x1xf32>
      %87 = vector.broadcast %86 : vector<8x1xf32> to vector<8x128xf32>
      %88 = arith.subf %80, %87 : vector<8x128xf32>
      %89 = arith.mulf %88, %88 : vector<8x128xf32>
      %cst_50 = arith.constant dense<0.000000e+00> : vector<8xf32>
      %90 = vector.multi_reduction <add>, %89, %cst_50 [1] : vector<8x128xf32> to vector<8xf32>
      %91 = vector.shape_cast %90 : vector<8xf32> to vector<8x1xf32>
      %cst_51 = arith.constant 1.280000e+02 : f32
      %92 = vector.broadcast %cst_51 : f32 to vector<8x1xf32>
      %93 = arith.divf %91, %92 : vector<8x1xf32>
      %94 = vector.broadcast %86 : vector<8x1xf32> to vector<8x128xf32>
      %95 = arith.subf %80, %94 : vector<8x128xf32>
      %cst_52 = arith.constant 9.99999974E-6 : f32
      %96 = vector.broadcast %cst_52 : f32 to vector<8x1xf32>
      %97 = arith.addf %93, %96 : vector<8x1xf32>
      %98 = math.rsqrt %97 : vector<8x1xf32>
      %99 = vector.broadcast %98 : vector<8x1xf32> to vector<8x128xf32>
      %100 = arith.mulf %95, %99 : vector<8x128xf32>
      %101 = vector.broadcast %81 : vector<1x128xf32> to vector<8x128xf32>
      %102 = arith.mulf %100, %101 : vector<8x128xf32>
      %103 = vector.broadcast %82 : vector<1x128xf32> to vector<8x128xf32>
      %104 = arith.addf %102, %103 : vector<8x128xf32>
      %105 = arith.truncf %104 : vector<8x128xf32> to vector<8x128xbf16>
      %c0_53 = arith.constant 0 : index
      %c0_54 = arith.constant 0 : index
      %c0_55 = arith.constant 0 : index
      %106 = vector.load %arg20[%c0_53, %c0_54, %c0_55] : memref<1x8x128xbf16, #tpu.memory_space<vmem>>, vector<1x8x128xbf16>
      %107 = vector.shape_cast %106 : vector<1x8x128xbf16> to vector<8x128xbf16>
      %108 = vector.shape_cast %105 : vector<8x128xbf16> to vector<1x8x128xbf16>
      tpu.vector_store %arg20[%c0_53, %c0_54, %c0_55], %108 {strides = array<i32>} : memref<1x8x128xbf16, #tpu.memory_space<vmem>>, vector<1x8x128xbf16>,
    } else {
    }
    return
  }
  func.func @transform_0(%arg0: i32, %arg1: i32, %arg2: i32, %arg3: memref<2xi32, #tpu.memory_space<smem>>) -> (i32, i32, i32) {
    %c0_i32 = arith.constant 0 : i32
    %c0_i32_0 = arith.constant 0 : i32
    return %arg0, %arg1, %c0_i32 : i32, i32, i32
  }
  func.func @transform_1(%arg0: i32, %arg1: i32, %arg2: i32, %arg3: memref<2xi32, #tpu.memory_space<smem>>) -> (i32, i32, i32) {
    %c0_i32 = arith.constant 0 : i32
    %c0_i32_0 = arith.constant 0 : i32
    return %arg0, %arg2, %c0_i32 : i32, i32, i32
  }
  func.func @transform_2(%arg0: i32, %arg1: i32, %arg2: i32, %arg3: memref<2xi32, #tpu.memory_space<smem>>) -> (i32, i32) {
    %c0_i32 = arith.constant 0 : i32
    %c0_i32_0 = arith.constant 0 : i32
    %c0_i32_1 = arith.constant 0 : i32
    return %c0_i32, %c0_i32_0 : i32, i32
  }
  func.func @transform_3(%arg0: i32, %arg1: i32, %arg2: i32, %arg3: memref<2xi32, #tpu.memory_space<smem>>) -> (i32, i32) {
    %c0_i32 = arith.constant 0 : i32
    %c0_i32_0 = arith.constant 0 : i32
    %c0_i32_1 = arith.constant 0 : i32
    return %c0_i32, %c0_i32_0 : i32, i32
  }
  func.func @transform_4(%arg0: i32, %arg1: i32, %arg2: i32, %arg3: memref<2xi32, #tpu.memory_space<smem>>) -> (i32, i32) {
    %c0_i32 = arith.constant 0 : i32
    %c0_i32_0 = arith.constant 0 : i32
    %c0_i32_1 = arith.constant 0 : i32
    return %c0_i32, %c0_i32_0 : i32, i32
  }
  func.func @transform_5(%arg0: i32, %arg1: i32, %arg2: i32, %arg3: memref<2xi32, #tpu.memory_space<smem>>) -> (i32, i32) {
    %c0_i32 = arith.constant 0 : i32
    %c0_i32_0 = arith.constant 0 : i32
    %c0_i32_1 = arith.constant 0 : i32
    return %c0_i32, %c0_i32_0 : i32, i32
  }
  func.func @transform_6(%arg0: i32, %arg1: i32, %arg2: i32, %arg3: memref<2xi32, #tpu.memory_space<smem>>) -> (i32, i32) {
    %c0_i32 = arith.constant 0 : i32
    %c0_i32_0 = arith.constant 0 : i32
    %c0_i32_1 = arith.constant 0 : i32
    return %c0_i32, %c0_i32_0 : i32, i32
  }
  func.func @transform_7(%arg0: i32, %arg1: i32, %arg2: i32, %arg3: memref<2xi32, #tpu.memory_space<smem>>) -> (i32, i32) {
    %c0_i32 = arith.constant 0 : i32
    %c0_i32_0 = arith.constant 0 : i32
    %c0_i32_1 = arith.constant 0 : i32
    return %c0_i32, %c0_i32_0 : i32, i32
  }
  func.func @transform_8(%arg0: i32, %arg1: i32, %arg2: i32, %arg3: memref<2xi32, #tpu.memory_space<smem>>) -> (i32, i32) {
    %c0_i32 = arith.constant 0 : i32
    %c0_i32_0 = arith.constant 0 : i32
    %c0_i32_1 = arith.constant 0 : i32
    return %c0_i32, %c0_i32_0 : i32, i32
  }
  func.func @transform_9(%arg0: i32, %arg1: i32, %arg2: i32, %arg3: memref<2xi32, #tpu.memory_space<smem>>) -> (i32, i32) {
    %c0_i32 = arith.constant 0 : i32
    %c0_i32_0 = arith.constant 0 : i32
    %c0_i32_1 = arith.constant 0 : i32
    return %c0_i32, %c0_i32_0 : i32, i32
  }
  func.func @transform_10(%arg0: i32, %arg1: i32, %arg2: i32, %arg3: memref<2xi32, #tpu.memory_space<smem>>) -> (i32, i32) {
    %c0_i32 = arith.constant 0 : i32
    %c0_i32_0 = arith.constant 0 : i32
    %c0_i32_1 = arith.constant 0 : i32
    return %c0_i32, %c0_i32_0 : i32, i32
  }
  func.func @transform_11(%arg0: i32, %arg1: i32, %arg2: i32, %arg3: memref<2xi32, #tpu.memory_space<smem>>) -> (i32, i32) {
    %c0_i32 = arith.constant 0 : i32
    %c0_i32_0 = arith.constant 0 : i32
    %c0_i32_1 = arith.constant 0 : i32
    return %c0_i32, %c0_i32_0 : i32, i32
  }
  func.func @transform_12(%arg0: i32, %arg1: i32, %arg2: i32, %arg3: memref<2xi32, #tpu.memory_space<smem>>) -> (i32, i32) {
    %c0_i32 = arith.constant 0 : i32
    %c0_i32_0 = arith.constant 0 : i32
    %c0_i32_1 = arith.constant 0 : i32
    return %c0_i32, %c0_i32_0 : i32, i32
  }
  func.func @transform_13(%arg0: i32, %arg1: i32, %arg2: i32, %arg3: memref<2xi32, #tpu.memory_space<smem>>) -> (i32, i32) {
    %c0_i32 = arith.constant 0 : i32
    %c0_i32_0 = arith.constant 0 : i32
    %c0_i32_1 = arith.constant 0 : i32
    return %c0_i32, %c0_i32_0 : i32, i32
  }
  func.func @transform_14(%arg0: i32, %arg1: i32, %arg2: i32, %arg3: memref<2xi32, #tpu.memory_space<smem>>) -> (i32, i32) {
    %c0_i32 = arith.constant 0 : i32
    %c0_i32_0 = arith.constant 0 : i32
    %c0_i32_1 = arith.constant 0 : i32
    return %c0_i32, %c0_i32_0 : i32, i32
  }
  func.func @transform_15(%arg0: i32, %arg1: i32, %arg2: i32, %arg3: memref<2xi32, #tpu.memory_space<smem>>) -> (i32, i32) {
    %c0_i32 = arith.constant 0 : i32
    %c0_i32_0 = arith.constant 0 : i32
    %c0_i32_1 = arith.constant 0 : i32
    return %c0_i32, %c0_i32_0 : i32, i32
  }
  func.func @transform_16(%arg0: i32, %arg1: i32, %arg2: i32, %arg3: memref<2xi32, #tpu.memory_space<smem>>) -> (i32, i32, i32) {
    %c0_i32 = arith.constant 0 : i32
    %c0_i32_0 = arith.constant 0 : i32
    return %arg0, %arg1, %c0_i32 : i32, i32, i32
  }
}

</mosaic_0001>

<bundles_post_ra>
// kernel: decoder_forward.6
= control target key start
LH: loop header
LB: loop body
LE: loop exit
PB: predicated region body
PF: predicated region fallthrough
CT: control target
= control target key end

     0   :  { %s1604_s20 = smov [#allocation7]   ;;  %s1841_s0 = inlined_call_operand.vmem [shape: s32[2], index: 0, kind: input, shape index: {}]   ;;  %s1842_s1 = inlined_call_operand.vmem [shape: bf16[2,8,128], index: 1, kind: input, shape index: {}, may-alias: {1,2}]   ;;  %s1843_s2 = inlined_call_operand.vmem [shape: bf16[2,8,128], index: 2, kind: input, shape index: {}, may-alias: {1,2}]   ;;  %s1844_s3 = inlined_call_operand.hbm [shape: bf16[128,128], index: 3, kind: input, shape index: {}]   ;;  %s1845_s4 = inlined_call_operand.vmem [shape: f32[1,128], index: 4, kind: input, shape index: {}]   ;;  %s1846_s5 = inlined_call_operand.hbm [shape: bf16[128,256], index: 5, kind: input, shape index: {}]   ;;  %s1847_s6 = inlined_call_operand.vmem [shape: f32[1,256], index: 6, kind: input, shape index: {}]   ;;  %s1848_s7 = inlined_call_operand.hbm [shape: bf16[128,128], index: 7, kind: input, shape index: {}]   ;;  %s1849_s8 = inlined_call_operand.vmem [shape: f32[1,128], index: 8, kind: input, shape index: {}]   ;;  %s1850_s9 = inlined_call_operand.vmem [shape: f32[1,128], index: 9, kind: input, shape index: {}]   ;;  %s1851_s10 = inlined_call_operand.vmem [shape: f32[1,128], index: 10, kind: input, shape index: {}]   ;;  %s1852_s11 = inlined_call_operand.vmem [shape: bf16[2,8,128], index: 11, kind: output, shape index: {}]  }
   0x1   :  { %1853 = sst [smem:[#allocation16_spill]] %s1846_s5  ;;  %s17_s19 = sshll.u32 %s1841_s0, 4  ;;  %s18_s19 = int_to_ptr.vmem [resolvable:$true] %s17_s19 }
   0x2   :  { %20 = dma.vmem_to_smem %s18_s19, 16, %s1604_s20, [#allocation6] }
   0x3   :  { %1582 = dma.done.wait [#allocation6], 16 }
   0x4   :  { %1583 = vsyncadd [#allocation6], 4294967280 }
   0x5   :  { %23 = sfence }
   0x6   :  { %24 = vsyncpa [#allocation9], 0 }
   0x7   :  { %25 = vsyncpa [#allocation11], 0  ;;  %s1681_s21 = smov 0   ;;  %s1683_s22 = smov 0  }
   0x8   :  { %s1685_s23 = smov 0  }
   0x9 LB: > { %s1854_s5 = sld [smem:[#allocation16_spill]]  ;;  %s1194_s26 = sadd.s32 4294967295, %s1602_s23   ;;  %s1602_s23 = sphi %s1685_s23, %s31_s23   ;;  %s1598_s22 = sphi %s1683_s22, %s1861_s22   ;;  %s1594_s21 = sphi %s1681_s21, %s1860_s21  }
   0xa   : > { %p1196_p0 = scmp.ge.s32.totalorder %s1602_s23, 1  ;;  %p307_p1 = scmp.lt.s32.totalorder %s1602_s23, 3 }
   0xb   : > { %p1702_p2 = scmp.eq.s32.totalorder %s1194_s26, 0  ;;  %s1605_s29 = smov [#allocation10]  }
   0xc   : > { %p1706_p3 = pnand %p1196_p0, %p307_p1  ;;  %s337_s30 = sshll.u32 %s1605_s29, 4  ;;  %s338_s30 = int_to_ptr.vmem [resolvable:$true] %s337_s30 }
   0xd   : > { %s50_s13 = sadd.s32 1, %s1598_s22  ;;  %s1606_s14 = smov 128  }
   0xe   : > { %p1391_p4 = pneg %p1706_p3  ;;  %p52_p6 = scmp.ge.s32.totalorder %s50_s13, 2 }
   0xf   : > { %s335_s25 = sshll.u32 %s1854_s5, 4  ;;  %s1607_s15 = smov 8   ;;  %s336_s25 = int_to_ptr.hbm [resolvable:$true] %s335_s25 }
  0x10   : > { %p1714_p5 = pnand %p1702_p2, %p1391_p4  ;;  %s1863_s13 = smov (%p52_p6, %s50_s13), 0 }
  0x11   : > { %s318_s18 = sshll.u32 %s1844_s3, 4  ;;  %s1608_s19 = smov [#allocation8]   ;;  %s319_s18 = int_to_ptr.hbm [resolvable:$true] %s318_s18 }
  0x12   : > { %1397 = dma.hbm_to_vmem [thread:$0]  (!%p1714_p5), %s336_s25, 2048, %s338_s30, [#allocation11], %s1606_s14, %s1606_s14, %s1607_s15  }
  0x13   : > { %s320_s20 = sshll.u32 %s1608_s19, 4  ;;  %s352_s26 = sshll.u32 %s1848_s7, 4  ;;  %s321_s20 = int_to_ptr.vmem [resolvable:$true] %s320_s20  ;;  %s353_s26 = int_to_ptr.hbm [resolvable:$true] %s352_s26 }
  0x14   : > { %s1609_s29 = smov 64   ;;  %s1610_s5 = smov 4  }
  0x15   : > { %1394 = dma.hbm_to_vmem [thread:$0]  (!%p1714_p5), %s319_s18, 1024, %s321_s20, [#allocation9], %s1609_s29, %s1609_s29, %s1610_s5  }
  0x16   : > { %s1611_s25 = smov [#allocation12]   ;;  %399 = sbr.rel (%p1706_p3) target bundleno = 1661 (0x67d), region = 60 }
  0x17   : > { %s354_s30 = sshll.u32 %s1611_s25, 4  ;;  %s355_s30 = int_to_ptr.vmem [resolvable:$true] %s354_s30 }
  0x18   : > { %1400 = dma.hbm_to_vmem [thread:$0]  (!%p1714_p5), %s353_s26, 1024, %s355_s30, [#allocation11], %s1609_s29, %s1609_s29, %s1610_s5  }
  0x1b   : > { %1585 = dma.done.wait (%p1702_p2), [#allocation9], 1024  }
  0x1c   : > { %1587 = vsyncadd (%p1702_p2), [#allocation9], 4294966272 }
  0x1d   : > { %1589 = dma.done.wait (%p1702_p2), [#allocation11], 3072  }
  0x1e   : > { %1591 = vsyncadd (%p1702_p2), [#allocation11], 4294964224  ;;  %vm570_vm0 = vcmask 7168   ;;  %v1612_v0 = vmov -inf   ;;  %s1745_s5 = sld [smem:[#allocation7 + %s1594_s21]]  ;;  %p459_p7 = scmp.lt.s32.totalorder %s1594_s21, 1 }
  0x1f   : > { %571 = vst.msk [vmem:[#allocation3] sm:$0xff] %vm570_vm0, %v1612_v0  ;;  %vm575_vm1 = vcmask 523264   ;;  %v1613_v1 = vmov 0.0   ;;  %v1353_v2 = vld [vmem:[#allocation8 + $0x38] sm:$0xff]  ;;  %v1352_v3 = vld [vmem:[#allocation8 + $0x30] sm:$0xff]  ;;  %v1351_v4 = vld [vmem:[#allocation8 + $0x28] sm:$0xff] }
  0x20   : > { %572 = vst.msk [vmem:[#allocation3 + $0x8] sm:$0xff] %vm570_vm0, %v1612_v0  ;;  %s1865_s21 = smov (!%p459_p7, %s1594_s21), 1  ;;  %554 = vmatpush.bf16.msra.mxu0 %v1353_v2  ;;  %v1350_v5 = vld [vmem:[#allocation8 + $0x20] sm:$0xff]  ;;  %v1349_v6 = vld [vmem:[#allocation8 + $0x18] sm:$0xff]  ;;  %v1348_v7 = vld [vmem:[#allocation8 + $0x10] sm:$0xff] }
  0x21   : > { %573 = vst.msk [vmem:[#allocation4] sm:$0xff] %vm570_vm0, %v1613_v1  ;;  %s1753_s27 = sshll.u32 %s1865_s21, 2  ;;  %v1347_v8 = vld [vmem:[#allocation8 + $0x8] sm:$0xff]  ;;  %v1346_v9 = vld [vmem:[#allocation8] sm:$0xff] }
  0x22   : > { %574 = vst.msk [vmem:[#allocation4 + $0x8] sm:$0xff] %vm570_vm0, %v1613_v1  ;;  %s472_s14 = scalar_lea.vmem %s1843_s2, %s1753_s27  ;;  %s479_s17 = scalar_lea.vmem %s1852_s11, %s1753_s27  ;;  %v1445_v11 = vld [vmem:[%s1845_s4] ss:$0 sm:$0xff] }
  0x23   : > { %576 = vst.msk [vmem:[#allocation5] sm:$0xff] %vm575_vm1, %v1613_v1  ;;  %s1769_s19 = scalar_lea.vmem %s1842_s1, %s1753_s27 }
  0x24   : > { %577 = vst.msk [vmem:[#allocation5 + $0x8] sm:$0xff] %vm575_vm1, %v1613_v1  ;;  %p1240_p8 = scmp.gt.s32.totalorder %s1745_s5, 0  ;;  %555 = vmatpush.bf16.msra.mxu0 %v1352_v3  ;;  %v485_v10 = vld [vmem:[%s1769_s19] sm:$0xf] }
  0x25   : > { %v1300_v17 = vld [vmem:[#allocation10 + $0x70] sm:$0xf] (%p1240_p8)  ;;  %v1370_v18 = vld [vmem:[#allocation10 + $0x74] sm:$0xf0] (%p1240_p8)  ;;  %v1292_v19 = vld [vmem:[#allocation10 + $0x60] sm:$0xf] (%p1240_p8) }
  0x26   : > { %v1301_v20 = vor.u32 (%p1240_p8), %v1370_v18, %v1300_v17  ;;  %v1368_v21 = vld [vmem:[#allocation10 + $0x64] sm:$0xf0] (%p1240_p8)  ;;  %v1284_v23 = vld [vmem:[#allocation10 + $0x50] sm:$0xf] (%p1240_p8)  ;;  %v1366_v24 = vld [vmem:[#allocation10 + $0x54] sm:$0xf0] (%p1240_p8) }
  0x27   : > { %v1293_v22 = vor.u32 (%p1240_p8), %v1368_v21, %v1292_v19  ;;  %v1369_v25 = vld [vmem:[#allocation10 + $0x74] sm:$0xf] (%p1240_p8)  ;;  %v1302_v26 = vld [vmem:[#allocation10 + $0x78] sm:$0xf0] (%p1240_p8)  ;;  %v1367_v27 = vld [vmem:[#allocation10 + $0x64] sm:$0xf] (%p1240_p8)  ;;  %v1285_v29 = vor.u32 (%p1240_p8), %v1366_v24, %v1284_v23  ;;  %v723_v23 = vstv (%p1240_p8), %s1745_s5 }
  0x28   : > { %556 = vmatpush.bf16.msra.mxu0 %v1351_v4  ;;  %v1294_v28 = vld [vmem:[#allocation10 + $0x68] sm:$0xf0] (%p1240_p8)  ;;  %v1305_v30 = vor.u32 (%p1240_p8), %v1369_v25, %v1302_v26  ;;  %v1276_v31 = vld [vmem:[#allocation10 + $0x40] sm:$0xf] (%p1240_p8)  ;;  %v1364_v32 = vld [vmem:[#allocation10 + $0x44] sm:$0xf0] (%p1240_p8) }
  0x29   : > { %v1297_v33 = vor.u32 (%p1240_p8), %v1367_v27, %v1294_v28  ;;  %v1365_v34 = vld [vmem:[#allocation10 + $0x54] sm:$0xf] (%p1240_p8)  ;;  %v1286_v35 = vld [vmem:[#allocation10 + $0x58] sm:$0xf0] (%p1240_p8)  ;;  %v1277_v36 = vor.u32 (%p1240_p8), %v1364_v32, %v1276_v31  ;;  %v1268_v37 = vld [vmem:[#allocation10 + $0x30] sm:$0xf] (%p1240_p8) }
  0x2a   : > { %704 = vmatpush.bf16.msra.mxu1 (%p1240_p8), %v1305_v30  ;;  %v1362_v38 = vld [vmem:[#allocation10 + $0x34] sm:$0xf0] (%p1240_p8)  ;;  %v1289_v39 = vor.u32 (%p1240_p8), %v1365_v34, %v1286_v35  ;;  %v1363_v40 = vld [vmem:[#allocation10 + $0x44] sm:$0xf] (%p1240_p8)  ;;  %v1278_v41 = vld [vmem:[#allocation10 + $0x48] sm:$0xf0] (%p1240_p8) }
  0x2b   : > { %v1269_v42 = vor.u32 (%p1240_p8), %v1362_v38, %v1268_v37  ;;  %v1260_v43 = vld [vmem:[#allocation10 + $0x20] sm:$0xf] (%p1240_p8)  ;;  %v1360_v44 = vld [vmem:[#allocation10 + $0x24] sm:$0xf0] (%p1240_p8)  ;;  %v1281_v45 = vor.u32 (%p1240_p8), %v1363_v40, %v1278_v41  ;;  %v1361_v46 = vld [vmem:[#allocation10 + $0x34] sm:$0xf] (%p1240_p8) }
  0x2c   : > { %557 = vmatpush.bf16.msra.mxu0 %v1350_v5  ;;  %v1270_v47 = vld [vmem:[#allocation10 + $0x38] sm:$0xf0] (%p1240_p8)  ;;  %v1261_v48 = vor.u32 (%p1240_p8), %v1360_v44, %v1260_v43  ;;  %v1252_v49 = vld [vmem:[#allocation10 + $0x10] sm:$0xf] (%p1240_p8)  ;;  %v1358_v50 = vld [vmem:[#allocation10 + $0x14] sm:$0xf0] (%p1240_p8) }
  0x2d   : > { %v1273_v51 = vor.u32 (%p1240_p8), %v1361_v46, %v1270_v47  ;;  %v1359_v52 = vld [vmem:[#allocation10 + $0x24] sm:$0xf] (%p1240_p8)  ;;  %v1262_v53 = vld [vmem:[#allocation10 + $0x28] sm:$0xf0] (%p1240_p8)  ;;  %v1253_v54 = vor.u32 (%p1240_p8), %v1358_v50, %v1252_v49  ;;  %v1244_v55 = vld [vmem:[#allocation10] sm:$0xf] (%p1240_p8) }
  0x2e   : > { %705 = vmatpush.bf16.msra.mxu1 (%p1240_p8), %v1297_v33  ;;  %v1356_v56 = vld [vmem:[#allocation10 + $0x4] sm:$0xf0] (%p1240_p8)  ;;  %v1265_v57 = vor.u32 (%p1240_p8), %v1359_v52, %v1262_v53  ;;  %v1357_v58 = vld [vmem:[#allocation10 + $0x14] sm:$0xf] (%p1240_p8)  ;;  %v1254_v59 = vld [vmem:[#allocation10 + $0x18] sm:$0xf0] (%p1240_p8) }
  0x2f   : > { %v1245_v60 = vor.u32 (%p1240_p8), %v1356_v56, %v1244_v55  ;;  %v1257_v61 = vor.u32 (%p1240_p8), %v1357_v58, %v1254_v59  ;;  %v1355_v62 = vld [vmem:[#allocation10 + $0x4] sm:$0xf] (%p1240_p8)  ;;  %v1246_v63 = vld [vmem:[#allocation10 + $0x8] sm:$0xf0] (%p1240_p8)  ;;  %s1614_s30 = smov (%p1240_p8), 64   ;;  %vm789_vm2 = vcmask (%p1240_p8), 1043456  }
  0x30   : > { %558 = vmatpush.bf16.msra.mxu0 %v1349_v6  ;;  %v588_v0 = vld [vmem:[%s472_s14] sm:$0xf] (%p1240_p8)  ;;  %v1249_v1 = vor.u32 (%p1240_p8), %v1355_v62, %v1246_v63  ;;  %vm754_vm6 = vcmask (%p1240_p8), 64512   ;;  %v753_v35 = vld [vmem:[#allocation3] sm:$0xff] (%p1240_p8)  ;;  %v770_v50 = vld [vmem:[#allocation4] sm:$0xff] (%p1240_p8) }
  0x31   : > { %v605_v2 = vld [vmem:[%s1847_s6] sm:$0x3] (%p1240_p8) }
  0x32   : > { %706 = vmatpush.bf16.msra.mxu1 (%p1240_p8), %v1289_v39  ;;  %v607_v3 = vperm.slane (%p1240_p8), %v605_v2, 0 }
  0x34   : > { %559 = vmatpush.bf16.msra.mxu0 %v1348_v7 }
  0x36   : > { %707 = vmatpush.bf16.msra.mxu1 (%p1240_p8), %v1281_v45 }
  0x38   : > { %560 = vmatpush.bf16.msra.mxu0 %v1347_v8 }
  0x3a   : > { %708 = vmatpush.bf16.msra.mxu1 (%p1240_p8), %v1273_v51 }
  0x3c   : > { %561 = vmatpush.bf16.msra.mxu0 %v1346_v9 }
  0x3e   : > { %709 = vmatpush.bf16.msra.mxu1 (%p1240_p8), %v1265_v57 }
  0x3f   : > { %562 = vmatmul.bf16.vlgmr.msra.gmra.mxu0 %v485_v10 }
  0x40   : > { %691 = vmatpush.bf16.msra.mxu0 (%p1240_p8), %v1301_v20  ;;  %v719_v20 = vlaneseq (%p1240_p8) }
  0x42   : > { %710 = vmatpush.bf16.msra.mxu1 (%p1240_p8), %v1257_v61  ;;  %v720_v21 = vand.u32 (%p1240_p8), 127, %v719_v20 }
  0x44   : > { %692 = vmatpush.bf16.msra.mxu0 (%p1240_p8), %v1293_v22  ;;  %v726_v22 = vshrl.u32 (%p1240_p8), %v719_v20, 7  ;;  %vm724_vm3 = vcmp.ge.s32.totalorder (%p1240_p8), %v720_v21, %v723_v23 }
  0x46   : > { %711 = vmatpush.bf16.msra.mxu1 (%p1240_p8), %v1249_v1  ;;  %vm729_vm4 = vcmp.gt.s32.totalorder (%p1240_p8), %v720_v21, %v726_v22 }
  0x47   : > { %vm1791_vm5 = vmor (%p1240_p8), %vm724_vm3, %vm729_vm4 }
  0x48   : > { %693 = vmatpush.bf16.msra.mxu0 (%p1240_p8), %v1285_v29  ;;  %v1615_v29 = vmov (%p1240_p8), 0  }
  0x49   : > { %712 = vmatmul.bf16.vlgmr.msra.gmra.mxu1 (%p1240_p8), %v588_v0  ;;  %1446 = vset.pattern.permute.xlu0 (%p1240_p8), %v1615_v29 }
  0x4a   : > { %1447 = vset.pattern.permute.xlu2 (%p1240_p8), %v1615_v29 }
  0x4c   : > { %694 = vmatpush.bf16.msra.mxu0 (%p1240_p8), %v1277_v36 }
  0x50   : > { %695 = vmatpush.bf16.msra.mxu0 (%p1240_p8), %v1269_v42 }
  0x54   : > { %696 = vmatpush.bf16.msra.mxu0 (%p1240_p8), %v1261_v48 }
  0x58   : > { %697 = vmatpush.bf16.msra.mxu0 (%p1240_p8), %v1253_v54 }
  0x5c   : > { %698 = vmatpush.bf16.msra.mxu0 (%p1240_p8), %v1245_v60  ;;  %v841_v60 = vld [vmem:[#allocation3 + $0x8] sm:$0xff] (%p1240_p8) }
  0x5f   : > { %699 = vmatmul.bf16.vlgmr.msra.gmra.mxu0 (%p1240_p8), %v588_v0 }
  0xbc   : > { %v563_v12 = vpop.f32.mrf.mxu0 }
  0xbd   : > { %v564_v13 = vadd.f32 %v1445_v11, %v563_v12 }
  0xbf   : > { %v567_v14 = vmul.f32 0.125, %v564_v13 }
  0xc0   : > { %587 = sbr.rel (!%p1240_p8) target bundleno = 1125 (0x465), region = 80 }
  0xc1   : > { %v568_v15 = vpack.c.bf16 %v567_v14, %v567_v14  ;;  %v608_v14 = vperm.slane (%p1240_p8), %v605_v2, 1 }
  0xc3   : > { %569 = vst [vmem:[#allocation2] sm:$0xf] %v568_v15 }
  0xc4   : > { %v565_v16 = vpop.f32.mrf.mxu0 }
  0xc6   : > { %v713_v9 = vpop.f32.mrf.mxu1 }
  0xc7   : > { %v714_v15 = vadd.f32 %v713_v9, %v608_v14 }
  0xc9   : > { %v718_v16 = vpack.c.bf16 %v714_v15, %v714_v15 }
  0xca   : > { %v731_v12 = vld [vmem:[#allocation2] sm:$0xf] }
  0xcb   : > { %v791_v17 = vsel %vm789_vm2, %v718_v16, 0  ;;  %v809_v30 = vld [vmem:[#allocation2] sm:$0xf]  ;;  %v875_v33 = vunpack.c.l.b16 %v718_v16  ;;  %v866_v16 = vld [vmem:[#allocation5 + $0x8] sm:$0xff] }
  0xcc   : > { %800 = vmatpush.bf16.msra.mxu3 %v791_v17  ;;  %v811_v31 = vunpack.c.l.b16 %v809_v30 }
  0xcd   : > { %v876_v34 = vpack.c.b16 %v875_v33, %v875_v33 }
  0xce   : > { %v715_v13 = vpop.f32.mrf.mxu1  ;;  %v812_v32 = vpack.c.b16 %v811_v31, %v811_v31 }
  0xdc   : > { %v700_v4 = vpop.f32.mrf.mxu0 }
  0xdd   : > { %v701_v5 = vadd.f32 %v700_v4, %v607_v3 }
  0xdf   : > { %v717_v6 = vpack.c.bf16 %v701_v5, %v701_v5  ;;  %v778_v5 = vld [vmem:[#allocation5] sm:$0xff] }
  0xe1   : > { %v737_v7 = vsel %vm575_vm1, %v717_v6, 0  ;;  %v816_v8 = vunpack.c.l.b16 %v717_v6 }
  0xe2   : > { %746 = vmatpush.bf16.xpose.msra.mxu2 %v737_v7 }
  0xe3   : > { %v817_v10 = vpack.c.b16 %v816_v8, %v816_v8 }
  0xe4   : > { %v702_v11 = vpop.f32.mrf.mxu0 }
  0xe5   : > { %818 = vrot.lane.b32.xlu1 %v817_v10, %s1614_s30 }
  0xe9   : > { %1306 = vmatmul.msk.bf16.vlgmr.msra.gmra.mxu2 %vm575_vm1, %v731_v12  ;;  %v858_v12 = vld [vmem:[#allocation4 + $0x8] sm:$0xff] }
  0xed   : > { %813 = vrot.lane.b32.xlu1 %v812_v32, %s1614_s30 }
  0xf5   : > { %877 = vrot.lane.b32.xlu1 %v876_v34, %s1614_s30 }
 0x157   : > { %v819_v18 = vpop.permute.xlu1 %818 }
 0x158   : > { %v824_v19 = vsel %vm575_vm1, %v819_v18, 0 }
 0x159   : > { %833 = vmatpush.bf16.xpose.msrb.mxu3 %v824_v19 }
 0x15f   : > { %v814_v45 = vpop.permute.xlu1 %813 }
 0x167   : > { %v878_v46 = vpop.permute.xlu1 %877 }
 0x168   : > { %v883_v47 = vsel %vm789_vm2, %v878_v46, 0 }
 0x169   : > { %892 = vmatpush.bf16.msrb.mxu2 %v883_v47 }
 0x16c   : > { %v748_v25 = vpop.f32.mrf.mxu2 }
 0x16d   : > { %v752_v26 = vsel %vm1791_vm5, -1e+09, %v748_v25 }
 0x16e   : > { %v755_v27 = vsel %vm754_vm6, %v752_v26, -inf }
 0x16f   : > { %756 = vmax.xlane.f32.xlu0 %v755_v27 }
 0x174   : > { %v750_v28 = vpop.f32.mrf.mxu2 }
 0x1e2   : > { %v757_v36 = vpop.xlane.xlu0 %756 }
 0x1e3   : > { %v758_v37 = vmax.f32 %v753_v35, %v757_v36 }
 0x1e5   : > { %v759_v38 = vsub.f32 %v753_v35, %v758_v37  ;;  %808 = vst.msk [vmem:[#allocation3] sm:$0xff] %vm570_vm0, %v758_v37  ;;  %764 = vperm.xlu0 %1446, %v758_v37  }
 0x1e7   : > { %v760_v48 = vmul.f32 1.442695, %v759_v38 }
 0x257   : > { %v765_v39 = vpop.permute.xlu0 %764 }
 0x258   : > { %v767_v40 = vsub.f32 %v752_v26, %v765_v39 }
 0x25a   : > { %v768_v41 = vmul.f32 1.442695, %v767_v40 }
 0x25c   : > { %1448 = vpow2.f32 %v768_v41 }
 0x25d   : > { %1450 = vpow2.f32 %v760_v48 }
 0x262   : > { %v1449_v42 = vpop.eup %1448 }
 0x263   : > { %v772_v43 = vsel %vm754_vm6, %v1449_v42, 0.0  ;;  %v785_v44 = vpack.c.bf16 %v1449_v42, %v1449_v42  ;;  %v1451_v49 = vpop.eup %1450 }
 0x264   : > { %773 = vadd.xlane.f32.xlu1 %v772_v43  ;;  %v771_v51 = vmul.f32 %v1451_v49, %v770_v50 }
 0x265   : > { %1307 = vmatmul.msk.bf16.vlgmr.msra.gmra.mxu3 %vm754_vm6, %v785_v44 }
 0x275   : > { %1308 = vmatmul.msk.bf16.vlgmr.msrb.gmra.mxu3 %vm575_vm1, %v814_v45 }
 0x2d7   : > { %v774_v52 = vpop.xlane.xlu1 %773 }
 0x2d8   : > { %v775_v53 = vadd.f32 %v774_v52, %v771_v51 }
 0x2da   : > { %777 = vst.msk [vmem:[#allocation4] sm:$0xff] %vm570_vm0, %v775_v53 }
 0x2e8   : > { %v802_v54 = vpop.f32.mrf.mxu3 }
 0x2f0   : > { %v804_v55 = vpop.f32.mrf.mxu3 }
 0x2f8   : > { %v835_v56 = vpop.f32.mrf.mxu3 }
 0x2f9   : > { %v839_v57 = vsel %vm1791_vm5, -1e+09, %v835_v56 }
 0x2fa   : > { %v842_v58 = vsel %vm754_vm6, %v839_v57, -inf }
 0x2fb   : > { %843 = vmax.xlane.f32.xlu2 %v842_v58 }
 0x300   : > { %v837_v59 = vpop.f32.mrf.mxu3 }
 0x36e   : > { %v844_v61 = vpop.xlane.xlu2 %843 }
 0x36f   : > { %v845_v62 = vmax.f32 %v841_v60, %v844_v61 }
 0x371   : > { %900 = vst.msk [vmem:[#allocation3 + $0x8] sm:$0xff] %vm570_vm0, %v845_v62  ;;  %851 = vperm.xlu2 %1447, %v845_v62   ;;  %v846_v63 = vsub.f32 %v841_v60, %v845_v62 }
 0x373   : > { %v847_v0 = vmul.f32 1.442695, %v846_v63 }
 0x375   : > { %1452 = vpow2.f32 %v847_v0 }
 0x379   : > { %781 = vperm.xlu2 %1447, %v1451_v49  }
 0x37b   : > { %v1453_v1 = vpop.eup %1452 }
 0x37c   : > { %v859_v13 = vmul.f32 %v1453_v1, %v858_v12 }
 0x381   : > { %869 = vperm.xlu2 %1447, %v1453_v1  }
 0x3cb   : > { %v852_v2 = vpop.permute.xlu2 %851 }
 0x3cc   : > { %v854_v3 = vsub.f32 %v839_v57, %v852_v2 }
 0x3ce   : > { %v855_v4 = vmul.f32 1.442695, %v854_v3 }
 0x3d0   : > { %1454 = vpow2.f32 %v855_v4 }
 0x3d3   : > { %v782_v6 = vpop.permute.xlu2 %781 }
 0x3d4   : > { %v784_v7 = vmul.f32 %v782_v6, %v778_v5 }
 0x3d6   : > { %v1455_v8 = vpop.eup %1454  ;;  %v806_v9 = vadd.f32 %v802_v54, %v784_v7 }
 0x3d7   : > { %v860_v10 = vsel %vm754_vm6, %v1455_v8, 0.0  ;;  %v873_v11 = vpack.c.bf16 %v1455_v8, %v1455_v8 }
 0x3d8   : > { %807 = vst.msk [vmem:[#allocation5] sm:$0xff] %vm575_vm1, %v806_v9  ;;  %861 = vadd.xlane.f32.xlu0 %v860_v10 }
 0x3d9   : > { %1309 = vmatmul.msk.bf16.vlgmr.msrb.gmra.mxu2 %vm754_vm6, %v873_v11 }
 0x3db   : > { %v870_v17 = vpop.permute.xlu2 %869 }
 0x3dc   : > { %v872_v18 = vmul.f32 %v870_v17, %v866_v16 }
 0x44b   : > { %v862_v14 = vpop.xlane.xlu0 %861 }
 0x44c   : > { %v863_v15 = vadd.f32 %v862_v14, %v859_v13 }
 0x44e   : > { %864 = vst.msk [vmem:[#allocation4 + $0x8] sm:$0xff] %vm570_vm0, %v863_v15 }
 0x45c   : > { %v894_v19 = vpop.f32.mrf.mxu2 }
 0x45d   : > { %v898_v20 = vadd.f32 %v894_v19, %v872_v18 }
 0x45f   : > { %899 = vst.msk [vmem:[#allocation5 + $0x8] sm:$0xff] %vm575_vm1, %v898_v20 }
 0x464   : > { %v896_v21 = vpop.f32.mrf.mxu2 }
 0x465 PF: > { %v904_v22 = vld [vmem:[#allocation4] sm:$0xff]  ;;  %v1374_v23 = vld [vmem:[#allocation12 + $0x18] sm:$0xff]  ;;  %v1616_v24 = vmov 0   ;;  %v1373_v26 = vld [vmem:[#allocation12 + $0x10] sm:$0xff]  ;;  %v1617_v53 = vmov 128.0  }
 0x466   : > { %1456 = vset.pattern.permute.xlu0 %v1616_v24  ;;  %1460 = vrcp.f32 %v904_v22  ;;  %v1378_v25 = vld [vmem:[#allocation12 + $0x38] sm:$0xff]  ;;  %1014 = vmatpush.bf16.msra.mxu1 %v1374_v23  ;;  %v923_v27 = vld [vmem:[#allocation4 + $0x8] sm:$0xff]  ;;  %v1377_v31 = vld [vmem:[#allocation12 + $0x30] sm:$0xff] }
 0x467   : > { %974 = vmatpush.bf16.msra.mxu0 %v1378_v25  ;;  %v1372_v28 = vld [vmem:[#allocation12 + $0x8] sm:$0xff]  ;;  %1462 = vrcp.f32 %v923_v27  ;;  %v1371_v32 = vld [vmem:[#allocation12] sm:$0xff]  ;;  %v906_v35 = vld [vmem:[#allocation5] sm:$0xff] }
 0x468   : > { %v1376_v33 = vld [vmem:[#allocation12 + $0x28] sm:$0xff]  ;;  %v1375_v34 = vld [vmem:[#allocation12 + $0x20] sm:$0xff]  ;;  %v926_v39 = vld [vmem:[#allocation5 + $0x8] sm:$0xff]  ;;  %1464 = vrcp.f32 %v1617_v53 }
 0x469   : > { %v1028_v44 = vld [vmem:[%s1769_s19] sm:$0xf] }
 0x46a   : > { %1015 = vmatpush.bf16.msra.mxu1 %v1373_v26  ;;  %v1457_v45 = vld [vmem:[%s1849_s8] ss:$0 sm:$0xff]  ;;  %v1029_v49 = vunpack.c.l.bf16 %v1028_v44 }
 0x46b   : > { %975 = vmatpush.bf16.msra.mxu0 %v1377_v31  ;;  %v1458_v9 = vld [vmem:[%s1850_s9] ss:$0 sm:$0xff] }
 0x46c   : > { %v1461_v29 = vpop.eup %1460  ;;  %v1459_v11 = vld [vmem:[%s1851_s10] ss:$0 sm:$0xff] }
 0x46d   : > { %909 = vperm.xlu0 %1456, %v1461_v29   ;;  %v1463_v30 = vpop.eup %1462 }
 0x46e   : > { %1016 = vmatpush.bf16.msra.mxu1 %v1372_v28  ;;  %v1465_v54 = vpop.eup %1464 }
 0x46f   : > { %976 = vmatpush.bf16.msra.mxu0 %v1376_v33  ;;  %v1036_v55 = vmul.f32 128.0, %v1465_v54  ;;  %vm1040_vm7 = vweird.f32 %v1465_v54 }
 0x471   : > { %v1037_v56 = vsub.f32 1.0, %v1036_v55 }
 0x472   : > { %1017 = vmatpush.bf16.msra.mxu1 %v1371_v32 }
 0x473   : > { %977 = vmatpush.bf16.msra.mxu0 %v1375_v34  ;;  %v1038_v57 = vmul.f32 %v1465_v54, %v1037_v56 }
 0x475   : > { %929 = vperm.xlu0 %1456, %v1463_v30   ;;  %v1039_v58 = vadd.f32 %v1465_v54, %v1038_v57 }
 0x477   : > { %v1041_v59 = vsel %vm1040_vm7, %v1465_v54, %v1039_v58 }
 0x4df   : > { %v910_v36 = vpop.permute.xlu0 %909 }
 0x4e0   : > { %v912_v37 = vmul.f32 %v910_v36, %v906_v35 }
 0x4e2   : > { %v913_v38 = vpack.c.bf16 %v912_v37, %v912_v37 }
 0x4e4   : > { %1343 = vmatmul.msk.bf16.vlgmr.msra.gmra.mxu1 %vm575_vm1, %v913_v38 }
 0x4e7   : > { %v930_v40 = vpop.permute.xlu0 %929 }
 0x4e8   : > { %v932_v41 = vmul.f32 %v930_v40, %v926_v39 }
 0x4ea   : > { %v933_v42 = vpack.c.bf16 %v932_v41, %v932_v41 }
 0x4ec   : > { %1326 = vmatmul.msk.bf16.vlgmr.msra.gmra.mxu0 %vm575_vm1, %v933_v42 }
 0x561   : > { %v1019_v43 = vpop.f32.mrf.mxu1 }
 0x569   : > { %v979_v46 = vpop.f32.mrf.mxu0  ;;  %v1021_v47 = vpop.f32.mrf.mxu1 }
 0x56a   : > { %v1020_v48 = vadd.f32 %v1019_v43, %v979_v46 }
 0x56c   : > { %v1027_v50 = vadd.f32 %v1457_v45, %v1020_v48 }
 0x56e   : > { %v1030_v51 = vadd.f32 %v1029_v49, %v1027_v50 }
 0x570   : > { %1033 = vadd.xlane.f32.xlu1 %v1030_v51 }
 0x571   : > { %v981_v52 = vpop.f32.mrf.mxu0 }
 0x5e3   : > { %v1034_v60 = vpop.xlane.xlu1 %1033 }
 0x5e4   : > { %v1042_v61 = vmul.f32 %v1041_v59, %v1034_v60 }
 0x5e6   : > { %v1043_v62 = vsub.f32 %v1030_v51, %v1042_v61 }
 0x5e8   : > { %v1044_v63 = vmul.f32 %v1043_v62, %v1043_v62 }
 0x5ea   : > { %1045 = vadd.xlane.f32.xlu1 %v1044_v63 }
 0x65d   : > { %v1046_v0 = vpop.xlane.xlu1 %1045 }
 0x65e   : > { %v1047_v1 = vmul.f32 %v1046_v0, %v1041_v59 }
 0x660   : > { %v1048_v2 = vadd.f32 1e-05, %v1047_v1 }
 0x662   : > { %1466 = vrsqrt.f32 %v1048_v2  ;;  %vm1055_vm9 = vweird.f32 %v1048_v2 }
 0x668   : > { %v1467_v3 = vpop.eup %1466 }
 0x669   : > { %v1050_v4 = vmul.f32 %v1467_v3, %v1048_v2  ;;  %vm1056_vm8 = vweird.f32 %v1467_v3 }
 0x66a   : > { %vm1057_vm10 = vmor %vm1055_vm9, %vm1056_vm8 }
 0x66b   : > { %v1051_v5 = vmul.f32 %v1467_v3, %v1050_v4 }
 0x66d   : > { %v1052_v6 = vmul.f32 0.5, %v1051_v5 }
 0x66f   : > { %v1053_v7 = vsub.f32 1.5, %v1052_v6 }
 0x671   : > { %v1054_v8 = vmul.f32 %v1467_v3, %v1053_v7 }
 0x673   : > { %v1058_v10 = vsel %vm1057_vm10, %v1467_v3, %v1054_v8 }
 0x674   : > { %v1059_v12 = vmul.f32 %v1058_v10, %v1043_v62 }
 0x676   : > { %v1063_v13 = vmul.f32 %v1458_v9, %v1059_v12 }
 0x678   : > { %v1067_v14 = vadd.f32 %v1459_v11, %v1063_v13 }
 0x67a   : > { %v1068_v15 = vpack.c.bf16 %v1067_v14, %v1067_v14 }
 0x67c   : > { %1069 = vst [vmem:[%s479_s17] sm:$0xf] %v1068_v15 }
 0x67d PF: > { %s31_s23 = sadd.s32 1, %s1602_s23   ;;  %s1860_s21 = smov %s1598_s22 }
 0x67e   : > { %p28_p9 = scmp.ge.s32.totalorder %s31_s23, 4   ;;  %s1861_s22 = smov %s1863_s13 }
 0x680   :  { %30 = sbr.rel (!%p28_p9) target bundleno = 9 (0x9), region = 123 }
 0x685   :  { %1095 = vsyncpa [#allocation9], 1 }
 0x686   :  { %1097 = vsyncpa [#allocation9 + $0x1], 1 }
 0x687   :  { %1098 = vsyncpa [#allocation11], 1 }

// kernel: decoder_forward.4
= control target key start
LH: loop header
LB: loop body
LE: loop exit
PB: predicated region body
PF: predicated region fallthrough
CT: control target
= control target key end

     0   :  { %s1535_s20 = smov [#allocation7]   ;;  %s1852_s0 = inlined_call_operand.vmem [shape: s32[2], index: 0, kind: input, shape index: {}]   ;;  %s1853_s1 = inlined_call_operand.vmem [shape: bf16[2,8,128], index: 1, kind: input, shape index: {}, may-alias: {1,2}]   ;;  %s1854_s2 = inlined_call_operand.vmem [shape: bf16[2,8,128], index: 2, kind: input, shape index: {}, may-alias: {1,2}]   ;;  %s1855_s3 = inlined_call_operand.hbm [shape: bf16[128,128], index: 3, kind: input, shape index: {}]   ;;  %s1856_s4 = inlined_call_operand.vmem [shape: f32[1,128], index: 4, kind: input, shape index: {}]   ;;  %s1857_s5 = inlined_call_operand.vmem [shape: bf16[128,256], index: 5, kind: input, shape index: {}]   ;;  %s1858_s6 = inlined_call_operand.vmem [shape: f32[1,256], index: 6, kind: input, shape index: {}]   ;;  %s1859_s7 = inlined_call_operand.hbm [shape: bf16[128,128], index: 7, kind: input, shape index: {}]   ;;  %s1860_s8 = inlined_call_operand.vmem [shape: f32[1,128], index: 8, kind: input, shape index: {}]   ;;  %s1861_s9 = inlined_call_operand.vmem [shape: f32[1,128], index: 9, kind: input, shape index: {}]   ;;  %s1862_s10 = inlined_call_operand.vmem [shape: f32[1,128], index: 10, kind: input, shape index: {}]   ;;  %s1863_s11 = inlined_call_operand.vmem [shape: bf16[2,8,128], index: 11, kind: output, shape index: {}]  }
   0x1   :  { %s17_s19 = sshll.u32 %s1852_s0, 4  ;;  %s18_s19 = int_to_ptr.vmem [resolvable:$true] %s17_s19 }
   0x2   :  { %20 = dma.vmem_to_smem %s18_s19, 16, %s1535_s20, [#allocation6] }
   0x3   :  { %1513 = dma.done.wait [#allocation6], 16 }
   0x4   :  { %1514 = vsyncadd [#allocation6], 4294967280 }
   0x5   :  { %23 = sfence }
   0x6   :  { %24 = vsyncpa [#allocation9], 0 }
   0x7   :  { %25 = vsyncpa [#allocation11], 0  ;;  %s1609_s21 = smov 0   ;;  %s1611_s22 = smov 0  }
   0x8   :  { %s1613_s23 = smov 0  }
   0x9 LB: > { %s1169_s0 = sadd.s32 4294967295, %s1533_s23   ;;  %s50_s24 = sadd.s32 1, %s1529_s22  ;;  %s1533_s23 = sphi %s1613_s23, %s31_s23   ;;  %s1529_s22 = sphi %s1611_s22, %s1869_s22   ;;  %s1525_s21 = sphi %s1609_s21, %s1868_s21  }
   0xa   : > { %p52_p0 = scmp.ge.s32.totalorder %s50_s24, 2  ;;  %p1171_p1 = scmp.ge.s32.totalorder %s1533_s23, 1 }
   0xb   : > { %p307_p2 = scmp.lt.s32.totalorder %s1533_s23, 3  ;;  %p1634_p4 = scmp.eq.s32.totalorder %s1169_s0, 0 }
   0xc   : > { %s1871_s24 = smov (%p52_p0, %s50_s24), 0  ;;  %s318_s29 = sshll.u32 %s1855_s3, 4  ;;  %s319_s29 = int_to_ptr.hbm [resolvable:$true] %s318_s29 }
   0xd   : > { %p1630_p3 = pnand %p1171_p1, %p307_p2  ;;  %s1536_s30 = smov [#allocation8]  }
   0xe   : > { %s320_s12 = sshll.u32 %s1536_s30, 4  ;;  %s341_s15 = sshll.u32 %s1859_s7, 4  ;;  %s321_s12 = int_to_ptr.vmem [resolvable:$true] %s320_s12  ;;  %s342_s15 = int_to_ptr.hbm [resolvable:$true] %s341_s15 }
   0xf   : > { %p1360_p5 = pneg %p1630_p3  ;;  %s1537_s16 = smov 64  }
  0x10   : > { %s1538_s17 = smov 4   ;;  %s1539_s18 = smov [#allocation10]  }
  0x11   : > { %p1361_p6 = pnand %p1634_p4, %p1360_p5  ;;  %s343_s19 = sshll.u32 %s1539_s18, 4  ;;  %s344_s19 = int_to_ptr.vmem [resolvable:$true] %s343_s19 }
  0x12   : > { %388 = sbr.rel (%p1630_p3) target bundleno = 1657 (0x679), region = 60 }
  0x13   : > { %1363 = dma.hbm_to_vmem [thread:$0]  (!%p1361_p6), %s319_s29, 1024, %s321_s12, [#allocation9], %s1537_s16, %s1537_s16, %s1538_s17  }
  0x14   : > { %1366 = dma.hbm_to_vmem [thread:$0]  (!%p1361_p6), %s342_s15, 1024, %s344_s19, [#allocation11], %s1537_s16, %s1537_s16, %s1538_s17  }
  0x17   : > { %1516 = dma.done.wait (%p1634_p4), [#allocation9], 1024  }
  0x18   : > { %1518 = vsyncadd (%p1634_p4), [#allocation9], 4294966272 }
  0x19   : > { %1520 = dma.done.wait (%p1634_p4), [#allocation11], 1024  }
  0x1a   : > { %1522 = vsyncadd (%p1634_p4), [#allocation11], 4294966272  ;;  %vm554_vm0 = vcmask 7168   ;;  %v1540_v0 = vmov -inf   ;;  %s1660_s20 = sld [smem:[#allocation7 + %s1525_s21]]  ;;  %p443_p7 = scmp.lt.s32.totalorder %s1525_s21, 1 }
  0x1b   : > { %555 = vst.msk [vmem:[#allocation3] sm:$0xff] %vm554_vm0, %v1540_v0  ;;  %vm559_vm1 = vcmask 523264   ;;  %v1541_v1 = vmov 0.0   ;;  %v1326_v2 = vld [vmem:[#allocation8 + $0x38] sm:$0xff]  ;;  %v1325_v3 = vld [vmem:[#allocation8 + $0x30] sm:$0xff]  ;;  %v1324_v4 = vld [vmem:[#allocation8 + $0x28] sm:$0xff] }
  0x1c   : > { %556 = vst.msk [vmem:[#allocation3 + $0x8] sm:$0xff] %vm554_vm0, %v1540_v0  ;;  %s1873_s21 = smov (!%p443_p7, %s1525_s21), 1  ;;  %538 = vmatpush.bf16.msra.mxu0 %v1326_v2  ;;  %v1323_v5 = vld [vmem:[#allocation8 + $0x20] sm:$0xff]  ;;  %v1322_v6 = vld [vmem:[#allocation8 + $0x18] sm:$0xff]  ;;  %v1321_v7 = vld [vmem:[#allocation8 + $0x10] sm:$0xff] }
  0x1d   : > { %557 = vst.msk [vmem:[#allocation4] sm:$0xff] %vm554_vm0, %v1541_v1  ;;  %s1668_s0 = sshll.u32 %s1873_s21, 2  ;;  %v1320_v8 = vld [vmem:[#allocation8 + $0x8] sm:$0xff]  ;;  %v1319_v9 = vld [vmem:[#allocation8] sm:$0xff] }
  0x1e   : > { %558 = vst.msk [vmem:[#allocation4 + $0x8] sm:$0xff] %vm554_vm0, %v1541_v1  ;;  %s456_s27 = scalar_lea.vmem %s1854_s2, %s1668_s0  ;;  %s463_s30 = scalar_lea.vmem %s1863_s11, %s1668_s0  ;;  %v1406_v11 = vld [vmem:[%s1856_s4] ss:$0 sm:$0xff] }
  0x1f   : > { %560 = vst.msk [vmem:[#allocation5] sm:$0xff] %vm559_vm1, %v1541_v1  ;;  %s1684_s13 = scalar_lea.vmem %s1853_s1, %s1668_s0 }
  0x20   : > { %561 = vst.msk [vmem:[#allocation5 + $0x8] sm:$0xff] %vm559_vm1, %v1541_v1  ;;  %p1213_p8 = scmp.gt.s32.totalorder %s1660_s20, 0  ;;  %539 = vmatpush.bf16.msra.mxu0 %v1325_v3  ;;  %v469_v10 = vld [vmem:[%s1684_s13] sm:$0xf] }
  0x21   : > { %v1273_v17 = vld [vmem:[%s1857_s5 + $0x70] sm:$0xf] (%p1213_p8)  ;;  %v1343_v18 = vld [vmem:[%s1857_s5 + $0x74] sm:$0xf0] (%p1213_p8)  ;;  %v1265_v19 = vld [vmem:[%s1857_s5 + $0x60] sm:$0xf] (%p1213_p8) }
  0x22   : > { %v1274_v20 = vor.u32 (%p1213_p8), %v1343_v18, %v1273_v17  ;;  %v1341_v21 = vld [vmem:[%s1857_s5 + $0x64] sm:$0xf0] (%p1213_p8)  ;;  %v1257_v23 = vld [vmem:[%s1857_s5 + $0x50] sm:$0xf] (%p1213_p8)  ;;  %v1339_v24 = vld [vmem:[%s1857_s5 + $0x54] sm:$0xf0] (%p1213_p8) }
  0x23   : > { %v1266_v22 = vor.u32 (%p1213_p8), %v1341_v21, %v1265_v19  ;;  %v1342_v25 = vld [vmem:[%s1857_s5 + $0x74] sm:$0xf] (%p1213_p8)  ;;  %v1275_v26 = vld [vmem:[%s1857_s5 + $0x78] sm:$0xf0] (%p1213_p8)  ;;  %v1340_v27 = vld [vmem:[%s1857_s5 + $0x64] sm:$0xf] (%p1213_p8)  ;;  %v1258_v29 = vor.u32 (%p1213_p8), %v1339_v24, %v1257_v23  ;;  %v707_v23 = vstv (%p1213_p8), %s1660_s20 }
  0x24   : > { %540 = vmatpush.bf16.msra.mxu0 %v1324_v4  ;;  %v1267_v28 = vld [vmem:[%s1857_s5 + $0x68] sm:$0xf0] (%p1213_p8)  ;;  %v1278_v30 = vor.u32 (%p1213_p8), %v1342_v25, %v1275_v26  ;;  %v1249_v31 = vld [vmem:[%s1857_s5 + $0x40] sm:$0xf] (%p1213_p8)  ;;  %v1337_v32 = vld [vmem:[%s1857_s5 + $0x44] sm:$0xf0] (%p1213_p8) }
  0x25   : > { %v1270_v33 = vor.u32 (%p1213_p8), %v1340_v27, %v1267_v28  ;;  %v1338_v34 = vld [vmem:[%s1857_s5 + $0x54] sm:$0xf] (%p1213_p8)  ;;  %v1259_v35 = vld [vmem:[%s1857_s5 + $0x58] sm:$0xf0] (%p1213_p8)  ;;  %v1250_v36 = vor.u32 (%p1213_p8), %v1337_v32, %v1249_v31  ;;  %v1241_v37 = vld [vmem:[%s1857_s5 + $0x30] sm:$0xf] (%p1213_p8) }
  0x26   : > { %688 = vmatpush.bf16.msra.mxu1 (%p1213_p8), %v1278_v30  ;;  %v1335_v38 = vld [vmem:[%s1857_s5 + $0x34] sm:$0xf0] (%p1213_p8)  ;;  %v1262_v39 = vor.u32 (%p1213_p8), %v1338_v34, %v1259_v35  ;;  %v1336_v40 = vld [vmem:[%s1857_s5 + $0x44] sm:$0xf] (%p1213_p8)  ;;  %v1251_v41 = vld [vmem:[%s1857_s5 + $0x48] sm:$0xf0] (%p1213_p8) }
  0x27   : > { %v1242_v42 = vor.u32 (%p1213_p8), %v1335_v38, %v1241_v37  ;;  %v1233_v43 = vld [vmem:[%s1857_s5 + $0x20] sm:$0xf] (%p1213_p8)  ;;  %v1333_v44 = vld [vmem:[%s1857_s5 + $0x24] sm:$0xf0] (%p1213_p8)  ;;  %v1254_v45 = vor.u32 (%p1213_p8), %v1336_v40, %v1251_v41  ;;  %v1334_v46 = vld [vmem:[%s1857_s5 + $0x34] sm:$0xf] (%p1213_p8) }
  0x28   : > { %541 = vmatpush.bf16.msra.mxu0 %v1323_v5  ;;  %v1243_v47 = vld [vmem:[%s1857_s5 + $0x38] sm:$0xf0] (%p1213_p8)  ;;  %v1234_v48 = vor.u32 (%p1213_p8), %v1333_v44, %v1233_v43  ;;  %v1225_v49 = vld [vmem:[%s1857_s5 + $0x10] sm:$0xf] (%p1213_p8)  ;;  %v1331_v50 = vld [vmem:[%s1857_s5 + $0x14] sm:$0xf0] (%p1213_p8) }
  0x29   : > { %v1246_v51 = vor.u32 (%p1213_p8), %v1334_v46, %v1243_v47  ;;  %v1332_v52 = vld [vmem:[%s1857_s5 + $0x24] sm:$0xf] (%p1213_p8)  ;;  %v1235_v53 = vld [vmem:[%s1857_s5 + $0x28] sm:$0xf0] (%p1213_p8)  ;;  %v1226_v54 = vor.u32 (%p1213_p8), %v1331_v50, %v1225_v49  ;;  %v1217_v55 = vld [vmem:[%s1857_s5] sm:$0xf] (%p1213_p8) }
  0x2a   : > { %689 = vmatpush.bf16.msra.mxu1 (%p1213_p8), %v1270_v33  ;;  %v1329_v56 = vld [vmem:[%s1857_s5 + $0x4] sm:$0xf0] (%p1213_p8)  ;;  %v1238_v57 = vor.u32 (%p1213_p8), %v1332_v52, %v1235_v53  ;;  %v1330_v58 = vld [vmem:[%s1857_s5 + $0x14] sm:$0xf] (%p1213_p8)  ;;  %v1227_v59 = vld [vmem:[%s1857_s5 + $0x18] sm:$0xf0] (%p1213_p8) }
  0x2b   : > { %v1218_v60 = vor.u32 (%p1213_p8), %v1329_v56, %v1217_v55  ;;  %v1230_v61 = vor.u32 (%p1213_p8), %v1330_v58, %v1227_v59  ;;  %v1328_v62 = vld [vmem:[%s1857_s5 + $0x4] sm:$0xf] (%p1213_p8)  ;;  %v1219_v63 = vld [vmem:[%s1857_s5 + $0x8] sm:$0xf0] (%p1213_p8)  ;;  %v572_v0 = vld [vmem:[%s456_s27] sm:$0xf] (%p1213_p8) }
  0x2c   : > { %542 = vmatpush.bf16.msra.mxu0 %v1322_v6  ;;  %v1222_v1 = vor.u32 (%p1213_p8), %v1328_v62, %v1219_v63  ;;  %v589_v2 = vld [vmem:[%s1858_s6] sm:$0x3] (%p1213_p8)  ;;  %s1542_s27 = smov (%p1213_p8), 64   ;;  %vm773_vm2 = vcmask (%p1213_p8), 1043456   ;;  %vm738_vm6 = vcmask (%p1213_p8), 64512   ;;  %v737_v35 = vld [vmem:[#allocation3] sm:$0xff] (%p1213_p8) }
  0x2d   : > { %v591_v3 = vperm.slane (%p1213_p8), %v589_v2, 0  ;;  %v754_v50 = vld [vmem:[#allocation4] sm:$0xff] (%p1213_p8) }
  0x2e   : > { %690 = vmatpush.bf16.msra.mxu1 (%p1213_p8), %v1262_v39 }
  0x30   : > { %543 = vmatpush.bf16.msra.mxu0 %v1321_v7 }
  0x32   : > { %691 = vmatpush.bf16.msra.mxu1 (%p1213_p8), %v1254_v45 }
  0x34   : > { %544 = vmatpush.bf16.msra.mxu0 %v1320_v8 }
  0x36   : > { %692 = vmatpush.bf16.msra.mxu1 (%p1213_p8), %v1246_v51 }
  0x38   : > { %545 = vmatpush.bf16.msra.mxu0 %v1319_v9 }
  0x3a   : > { %693 = vmatpush.bf16.msra.mxu1 (%p1213_p8), %v1238_v57 }
  0x3b   : > { %546 = vmatmul.bf16.vlgmr.msra.gmra.mxu0 %v469_v10 }
  0x3c   : > { %675 = vmatpush.bf16.msra.mxu0 (%p1213_p8), %v1274_v20  ;;  %v703_v20 = vlaneseq (%p1213_p8) }
  0x3e   : > { %694 = vmatpush.bf16.msra.mxu1 (%p1213_p8), %v1230_v61  ;;  %v704_v21 = vand.u32 (%p1213_p8), 127, %v703_v20 }
  0x40   : > { %676 = vmatpush.bf16.msra.mxu0 (%p1213_p8), %v1266_v22  ;;  %v710_v22 = vshrl.u32 (%p1213_p8), %v703_v20, 7  ;;  %vm708_vm3 = vcmp.ge.s32.totalorder (%p1213_p8), %v704_v21, %v707_v23 }
  0x42   : > { %695 = vmatpush.bf16.msra.mxu1 (%p1213_p8), %v1222_v1  ;;  %vm713_vm4 = vcmp.gt.s32.totalorder (%p1213_p8), %v704_v21, %v710_v22 }
  0x43   : > { %vm1802_vm5 = vmor (%p1213_p8), %vm708_vm3, %vm713_vm4 }
  0x44   : > { %677 = vmatpush.bf16.msra.mxu0 (%p1213_p8), %v1258_v29  ;;  %v1543_v29 = vmov (%p1213_p8), 0  }
  0x45   : > { %696 = vmatmul.bf16.vlgmr.msra.gmra.mxu1 (%p1213_p8), %v572_v0  ;;  %1407 = vset.pattern.permute.xlu0 (%p1213_p8), %v1543_v29 }
  0x46   : > { %1408 = vset.pattern.permute.xlu2 (%p1213_p8), %v1543_v29 }
  0x48   : > { %678 = vmatpush.bf16.msra.mxu0 (%p1213_p8), %v1250_v36 }
  0x4c   : > { %679 = vmatpush.bf16.msra.mxu0 (%p1213_p8), %v1242_v42 }
  0x50   : > { %680 = vmatpush.bf16.msra.mxu0 (%p1213_p8), %v1234_v48 }
  0x54   : > { %681 = vmatpush.bf16.msra.mxu0 (%p1213_p8), %v1226_v54 }
  0x58   : > { %682 = vmatpush.bf16.msra.mxu0 (%p1213_p8), %v1218_v60  ;;  %v825_v60 = vld [vmem:[#allocation3 + $0x8] sm:$0xff] (%p1213_p8) }
  0x5b   : > { %683 = vmatmul.bf16.vlgmr.msra.gmra.mxu0 (%p1213_p8), %v572_v0 }
  0xb8   : > { %v547_v12 = vpop.f32.mrf.mxu0 }
  0xb9   : > { %v548_v13 = vadd.f32 %v1406_v11, %v547_v12 }
  0xbb   : > { %v551_v14 = vmul.f32 0.125, %v548_v13 }
  0xbc   : > { %571 = sbr.rel (!%p1213_p8) target bundleno = 1121 (0x461), region = 76 }
  0xbd   : > { %v552_v15 = vpack.c.bf16 %v551_v14, %v551_v14  ;;  %v592_v14 = vperm.slane (%p1213_p8), %v589_v2, 1 }
  0xbf   : > { %553 = vst [vmem:[#allocation2] sm:$0xf] %v552_v15 }
  0xc0   : > { %v549_v16 = vpop.f32.mrf.mxu0 }
  0xc2   : > { %v697_v9 = vpop.f32.mrf.mxu1 }
  0xc3   : > { %v698_v15 = vadd.f32 %v697_v9, %v592_v14 }
  0xc5   : > { %v702_v16 = vpack.c.bf16 %v698_v15, %v698_v15 }
  0xc6   : > { %v715_v12 = vld [vmem:[#allocation2] sm:$0xf] }
  0xc7   : > { %v775_v17 = vsel %vm773_vm2, %v702_v16, 0  ;;  %v793_v30 = vld [vmem:[#allocation2] sm:$0xf]  ;;  %v859_v33 = vunpack.c.l.b16 %v702_v16  ;;  %v850_v16 = vld [vmem:[#allocation5 + $0x8] sm:$0xff] }
  0xc8   : > { %784 = vmatpush.bf16.msra.mxu3 %v775_v17  ;;  %v795_v31 = vunpack.c.l.b16 %v793_v30 }
  0xc9   : > { %v860_v34 = vpack.c.b16 %v859_v33, %v859_v33 }
  0xca   : > { %v699_v13 = vpop.f32.mrf.mxu1  ;;  %v796_v32 = vpack.c.b16 %v795_v31, %v795_v31 }
  0xd8   : > { %v684_v4 = vpop.f32.mrf.mxu0 }
  0xd9   : > { %v685_v5 = vadd.f32 %v684_v4, %v591_v3 }
  0xdb   : > { %v701_v6 = vpack.c.bf16 %v685_v5, %v685_v5  ;;  %v762_v5 = vld [vmem:[#allocation5] sm:$0xff] }
  0xdd   : > { %v721_v7 = vsel %vm559_vm1, %v701_v6, 0  ;;  %v800_v8 = vunpack.c.l.b16 %v701_v6 }
  0xde   : > { %730 = vmatpush.bf16.xpose.msra.mxu2 %v721_v7 }
  0xdf   : > { %v801_v10 = vpack.c.b16 %v800_v8, %v800_v8 }
  0xe0   : > { %v686_v11 = vpop.f32.mrf.mxu0 }
  0xe1   : > { %802 = vrot.lane.b32.xlu1 %v801_v10, %s1542_s27 }
  0xe5   : > { %1279 = vmatmul.msk.bf16.vlgmr.msra.gmra.mxu2 %vm559_vm1, %v715_v12  ;;  %v842_v12 = vld [vmem:[#allocation4 + $0x8] sm:$0xff] }
  0xe9   : > { %797 = vrot.lane.b32.xlu1 %v796_v32, %s1542_s27 }
  0xf1   : > { %861 = vrot.lane.b32.xlu1 %v860_v34, %s1542_s27 }
 0x153   : > { %v803_v18 = vpop.permute.xlu1 %802 }
 0x154   : > { %v808_v19 = vsel %vm559_vm1, %v803_v18, 0 }
 0x155   : > { %817 = vmatpush.bf16.xpose.msrb.mxu3 %v808_v19 }
 0x15b   : > { %v798_v45 = vpop.permute.xlu1 %797 }
 0x163   : > { %v862_v46 = vpop.permute.xlu1 %861 }
 0x164   : > { %v867_v47 = vsel %vm773_vm2, %v862_v46, 0 }
 0x165   : > { %876 = vmatpush.bf16.msrb.mxu2 %v867_v47 }
 0x168   : > { %v732_v25 = vpop.f32.mrf.mxu2 }
 0x169   : > { %v736_v26 = vsel %vm1802_vm5, -1e+09, %v732_v25 }
 0x16a   : > { %v739_v27 = vsel %vm738_vm6, %v736_v26, -inf }
 0x16b   : > { %740 = vmax.xlane.f32.xlu0 %v739_v27 }
 0x170   : > { %v734_v28 = vpop.f32.mrf.mxu2 }
 0x1de   : > { %v741_v36 = vpop.xlane.xlu0 %740 }
 0x1df   : > { %v742_v37 = vmax.f32 %v737_v35, %v741_v36 }
 0x1e1   : > { %v743_v38 = vsub.f32 %v737_v35, %v742_v37  ;;  %792 = vst.msk [vmem:[#allocation3] sm:$0xff] %vm554_vm0, %v742_v37  ;;  %748 = vperm.xlu0 %1407, %v742_v37  }
 0x1e3   : > { %v744_v48 = vmul.f32 1.442695, %v743_v38 }
 0x253   : > { %v749_v39 = vpop.permute.xlu0 %748 }
 0x254   : > { %v751_v40 = vsub.f32 %v736_v26, %v749_v39 }
 0x256   : > { %v752_v41 = vmul.f32 1.442695, %v751_v40 }
 0x258   : > { %1409 = vpow2.f32 %v752_v41 }
 0x259   : > { %1411 = vpow2.f32 %v744_v48 }
 0x25e   : > { %v1410_v42 = vpop.eup %1409 }
 0x25f   : > { %v756_v43 = vsel %vm738_vm6, %v1410_v42, 0.0  ;;  %v769_v44 = vpack.c.bf16 %v1410_v42, %v1410_v42  ;;  %v1412_v49 = vpop.eup %1411 }
 0x260   : > { %757 = vadd.xlane.f32.xlu1 %v756_v43  ;;  %v755_v51 = vmul.f32 %v1412_v49, %v754_v50 }
 0x261   : > { %1280 = vmatmul.msk.bf16.vlgmr.msra.gmra.mxu3 %vm738_vm6, %v769_v44 }
 0x271   : > { %1281 = vmatmul.msk.bf16.vlgmr.msrb.gmra.mxu3 %vm559_vm1, %v798_v45 }
 0x2d3   : > { %v758_v52 = vpop.xlane.xlu1 %757 }
 0x2d4   : > { %v759_v53 = vadd.f32 %v758_v52, %v755_v51 }
 0x2d6   : > { %761 = vst.msk [vmem:[#allocation4] sm:$0xff] %vm554_vm0, %v759_v53 }
 0x2e4   : > { %v786_v54 = vpop.f32.mrf.mxu3 }
 0x2ec   : > { %v788_v55 = vpop.f32.mrf.mxu3 }
 0x2f4   : > { %v819_v56 = vpop.f32.mrf.mxu3 }
 0x2f5   : > { %v823_v57 = vsel %vm1802_vm5, -1e+09, %v819_v56 }
 0x2f6   : > { %v826_v58 = vsel %vm738_vm6, %v823_v57, -inf }
 0x2f7   : > { %827 = vmax.xlane.f32.xlu2 %v826_v58 }
 0x2fc   : > { %v821_v59 = vpop.f32.mrf.mxu3 }
 0x36a   : > { %v828_v61 = vpop.xlane.xlu2 %827 }
 0x36b   : > { %v829_v62 = vmax.f32 %v825_v60, %v828_v61 }
 0x36d   : > { %884 = vst.msk [vmem:[#allocation3 + $0x8] sm:$0xff] %vm554_vm0, %v829_v62  ;;  %835 = vperm.xlu2 %1408, %v829_v62   ;;  %v830_v63 = vsub.f32 %v825_v60, %v829_v62 }
 0x36f   : > { %v831_v0 = vmul.f32 1.442695, %v830_v63 }
 0x371   : > { %1413 = vpow2.f32 %v831_v0 }
 0x375   : > { %765 = vperm.xlu2 %1408, %v1412_v49  }
 0x377   : > { %v1414_v1 = vpop.eup %1413 }
 0x378   : > { %v843_v13 = vmul.f32 %v1414_v1, %v842_v12 }
 0x37d   : > { %853 = vperm.xlu2 %1408, %v1414_v1  }
 0x3c7   : > { %v836_v2 = vpop.permute.xlu2 %835 }
 0x3c8   : > { %v838_v3 = vsub.f32 %v823_v57, %v836_v2 }
 0x3ca   : > { %v839_v4 = vmul.f32 1.442695, %v838_v3 }
 0x3cc   : > { %1415 = vpow2.f32 %v839_v4 }
 0x3cf   : > { %v766_v6 = vpop.permute.xlu2 %765 }
 0x3d0   : > { %v768_v7 = vmul.f32 %v766_v6, %v762_v5 }
 0x3d2   : > { %v1416_v8 = vpop.eup %1415  ;;  %v790_v9 = vadd.f32 %v786_v54, %v768_v7 }
 0x3d3   : > { %v844_v10 = vsel %vm738_vm6, %v1416_v8, 0.0  ;;  %v857_v11 = vpack.c.bf16 %v1416_v8, %v1416_v8 }
 0x3d4   : > { %791 = vst.msk [vmem:[#allocation5] sm:$0xff] %vm559_vm1, %v790_v9  ;;  %845 = vadd.xlane.f32.xlu0 %v844_v10 }
 0x3d5   : > { %1282 = vmatmul.msk.bf16.vlgmr.msrb.gmra.mxu2 %vm738_vm6, %v857_v11 }
 0x3d7   : > { %v854_v17 = vpop.permute.xlu2 %853 }
 0x3d8   : > { %v856_v18 = vmul.f32 %v854_v17, %v850_v16 }
 0x447   : > { %v846_v14 = vpop.xlane.xlu0 %845 }
 0x448   : > { %v847_v15 = vadd.f32 %v846_v14, %v843_v13 }
 0x44a   : > { %848 = vst.msk [vmem:[#allocation4 + $0x8] sm:$0xff] %vm554_vm0, %v847_v15 }
 0x458   : > { %v878_v19 = vpop.f32.mrf.mxu2 }
 0x459   : > { %v882_v20 = vadd.f32 %v878_v19, %v856_v18 }
 0x45b   : > { %883 = vst.msk [vmem:[#allocation5 + $0x8] sm:$0xff] %vm559_vm1, %v882_v20 }
 0x460   : > { %v880_v21 = vpop.f32.mrf.mxu2 }
 0x461 PF: > { %v888_v22 = vld [vmem:[#allocation4] sm:$0xff]  ;;  %v1347_v23 = vld [vmem:[#allocation10 + $0x18] sm:$0xff]  ;;  %v1544_v24 = vmov 0   ;;  %v1346_v26 = vld [vmem:[#allocation10 + $0x10] sm:$0xff]  ;;  %v1545_v53 = vmov 128.0  }
 0x462   : > { %1417 = vset.pattern.permute.xlu0 %v1544_v24  ;;  %1421 = vrcp.f32 %v888_v22  ;;  %v1351_v25 = vld [vmem:[#allocation10 + $0x38] sm:$0xff]  ;;  %998 = vmatpush.bf16.msra.mxu1 %v1347_v23  ;;  %v907_v27 = vld [vmem:[#allocation4 + $0x8] sm:$0xff]  ;;  %v1350_v31 = vld [vmem:[#allocation10 + $0x30] sm:$0xff] }
 0x463   : > { %958 = vmatpush.bf16.msra.mxu0 %v1351_v25  ;;  %v1345_v28 = vld [vmem:[#allocation10 + $0x8] sm:$0xff]  ;;  %1423 = vrcp.f32 %v907_v27  ;;  %v1344_v32 = vld [vmem:[#allocation10] sm:$0xff]  ;;  %v890_v35 = vld [vmem:[#allocation5] sm:$0xff] }
 0x464   : > { %v1349_v33 = vld [vmem:[#allocation10 + $0x28] sm:$0xff]  ;;  %v1348_v34 = vld [vmem:[#allocation10 + $0x20] sm:$0xff]  ;;  %v910_v39 = vld [vmem:[#allocation5 + $0x8] sm:$0xff]  ;;  %1425 = vrcp.f32 %v1545_v53 }
 0x465   : > { %v1012_v44 = vld [vmem:[%s1684_s13] sm:$0xf] }
 0x466   : > { %999 = vmatpush.bf16.msra.mxu1 %v1346_v26  ;;  %v1418_v45 = vld [vmem:[%s1860_s8] ss:$0 sm:$0xff]  ;;  %v1013_v49 = vunpack.c.l.bf16 %v1012_v44 }
 0x467   : > { %959 = vmatpush.bf16.msra.mxu0 %v1350_v31  ;;  %v1419_v9 = vld [vmem:[%s1861_s9] ss:$0 sm:$0xff] }
 0x468   : > { %v1422_v29 = vpop.eup %1421  ;;  %v1420_v11 = vld [vmem:[%s1862_s10] ss:$0 sm:$0xff] }
 0x469   : > { %893 = vperm.xlu0 %1417, %v1422_v29   ;;  %v1424_v30 = vpop.eup %1423 }
 0x46a   : > { %1000 = vmatpush.bf16.msra.mxu1 %v1345_v28  ;;  %v1426_v54 = vpop.eup %1425 }
 0x46b   : > { %960 = vmatpush.bf16.msra.mxu0 %v1349_v33  ;;  %v1020_v55 = vmul.f32 128.0, %v1426_v54  ;;  %vm1024_vm7 = vweird.f32 %v1426_v54 }
 0x46d   : > { %v1021_v56 = vsub.f32 1.0, %v1020_v55 }
 0x46e   : > { %1001 = vmatpush.bf16.msra.mxu1 %v1344_v32 }
 0x46f   : > { %961 = vmatpush.bf16.msra.mxu0 %v1348_v34  ;;  %v1022_v57 = vmul.f32 %v1426_v54, %v1021_v56 }
 0x471   : > { %913 = vperm.xlu0 %1417, %v1424_v30   ;;  %v1023_v58 = vadd.f32 %v1426_v54, %v1022_v57 }
 0x473   : > { %v1025_v59 = vsel %vm1024_vm7, %v1426_v54, %v1023_v58 }
 0x4db   : > { %v894_v36 = vpop.permute.xlu0 %893 }
 0x4dc   : > { %v896_v37 = vmul.f32 %v894_v36, %v890_v35 }
 0x4de   : > { %v897_v38 = vpack.c.bf16 %v896_v37, %v896_v37 }
 0x4e0   : > { %1316 = vmatmul.msk.bf16.vlgmr.msra.gmra.mxu1 %vm559_vm1, %v897_v38 }
 0x4e3   : > { %v914_v40 = vpop.permute.xlu0 %913 }
 0x4e4   : > { %v916_v41 = vmul.f32 %v914_v40, %v910_v39 }
 0x4e6   : > { %v917_v42 = vpack.c.bf16 %v916_v41, %v916_v41 }
 0x4e8   : > { %1299 = vmatmul.msk.bf16.vlgmr.msra.gmra.mxu0 %vm559_vm1, %v917_v42 }
 0x55d   : > { %v1003_v43 = vpop.f32.mrf.mxu1 }
 0x565   : > { %v963_v46 = vpop.f32.mrf.mxu0  ;;  %v1005_v47 = vpop.f32.mrf.mxu1 }
 0x566   : > { %v1004_v48 = vadd.f32 %v1003_v43, %v963_v46 }
 0x568   : > { %v1011_v50 = vadd.f32 %v1418_v45, %v1004_v48 }
 0x56a   : > { %v1014_v51 = vadd.f32 %v1013_v49, %v1011_v50 }
 0x56c   : > { %1017 = vadd.xlane.f32.xlu1 %v1014_v51 }
 0x56d   : > { %v965_v52 = vpop.f32.mrf.mxu0 }
 0x5df   : > { %v1018_v60 = vpop.xlane.xlu1 %1017 }
 0x5e0   : > { %v1026_v61 = vmul.f32 %v1025_v59, %v1018_v60 }
 0x5e2   : > { %v1027_v62 = vsub.f32 %v1014_v51, %v1026_v61 }
 0x5e4   : > { %v1028_v63 = vmul.f32 %v1027_v62, %v1027_v62 }
 0x5e6   : > { %1029 = vadd.xlane.f32.xlu1 %v1028_v63 }
 0x659   : > { %v1030_v0 = vpop.xlane.xlu1 %1029 }
 0x65a   : > { %v1031_v1 = vmul.f32 %v1030_v0, %v1025_v59 }
 0x65c   : > { %v1032_v2 = vadd.f32 1e-05, %v1031_v1 }
 0x65e   : > { %1427 = vrsqrt.f32 %v1032_v2  ;;  %vm1039_vm9 = vweird.f32 %v1032_v2 }
 0x664   : > { %v1428_v3 = vpop.eup %1427 }
 0x665   : > { %v1034_v4 = vmul.f32 %v1428_v3, %v1032_v2  ;;  %vm1040_vm8 = vweird.f32 %v1428_v3 }
 0x666   : > { %vm1041_vm10 = vmor %vm1039_vm9, %vm1040_vm8 }
 0x667   : > { %v1035_v5 = vmul.f32 %v1428_v3, %v1034_v4 }
 0x669   : > { %v1036_v6 = vmul.f32 0.5, %v1035_v5 }
 0x66b   : > { %v1037_v7 = vsub.f32 1.5, %v1036_v6 }
 0x66d   : > { %v1038_v8 = vmul.f32 %v1428_v3, %v1037_v7 }
 0x66f   : > { %v1042_v10 = vsel %vm1041_vm10, %v1428_v3, %v1038_v8 }
 0x670   : > { %v1043_v12 = vmul.f32 %v1042_v10, %v1027_v62 }
 0x672   : > { %v1047_v13 = vmul.f32 %v1419_v9, %v1043_v12 }
 0x674   : > { %v1051_v14 = vadd.f32 %v1420_v11, %v1047_v13 }
 0x676   : > { %v1052_v15 = vpack.c.bf16 %v1051_v14, %v1051_v14 }
 0x678   : > { %1053 = vst [vmem:[%s463_s30] sm:$0xf] %v1052_v15 }
 0x679 PF: > { %s31_s23 = sadd.s32 1, %s1533_s23   ;;  %s1868_s21 = smov %s1529_s22 }
 0x67a   : > { %p28_p9 = scmp.ge.s32.totalorder %s31_s23, 4   ;;  %s1869_s22 = smov %s1871_s24 }
 0x67c   :  { %30 = sbr.rel (!%p28_p9) target bundleno = 9 (0x9), region = 119 }
 0x681   :  { %1079 = vsyncpa [#allocation9], 1 }
 0x682   :  { %1081 = vsyncpa [#allocation9 + $0x1], 1 }
 0x683   :  { %1082 = vsyncpa [#allocation11], 1 }

// kernel: decoder_forward.5
= control target key start
LH: loop header
LB: loop body
LE: loop exit
PB: predicated region body
PF: predicated region fallthrough
CT: control target
= control target key end

     0   :  { %s2240_s27 = smov [#allocation7]   ;;  %s2718_s0 = inlined_call_operand.vmem [shape: s32[2], index: 0, kind: input, shape index: {}]   ;;  %s2719_s1 = inlined_call_operand.vmem [shape: bf16[2,8,128], index: 1, kind: input, shape index: {}]   ;;  %s2720_s2 = inlined_call_operand.vmem [shape: bf16[2,8,128], index: 2, kind: input, shape index: {}]   ;;  %s2721_s3 = inlined_call_operand.hbm [shape: bf16[128,128], index: 3, kind: input, shape index: {}]   ;;  %s2722_s4 = inlined_call_operand.vmem [shape: f32[1,128], index: 4, kind: input, shape index: {}]   ;;  %s2723_s5 = inlined_call_operand.vmem [shape: bf16[128,256], index: 5, kind: input, shape index: {}]   ;;  %s2724_s6 = inlined_call_operand.vmem [shape: f32[1,256], index: 6, kind: input, shape index: {}]   ;;  %s2725_s7 = inlined_call_operand.hbm [shape: bf16[128,128], index: 7, kind: input, shape index: {}]   ;;  %s2726_s8 = inlined_call_operand.vmem [shape: f32[1,128], index: 8, kind: input, shape index: {}]   ;;  %s2727_s9 = inlined_call_operand.vmem [shape: f32[1,128], index: 9, kind: input, shape index: {}]   ;;  %s2728_s10 = inlined_call_operand.vmem [shape: f32[1,128], index: 10, kind: input, shape index: {}]   ;;  %s2729_s11 = inlined_call_operand.vmem [shape: bf16[128,256], index: 11, kind: input, shape index: {}]   ;;  %s2730_s12 = inlined_call_operand.vmem [shape: f32[1,256], index: 12, kind: input, shape index: {}]   ;;  %s2731_s13 = inlined_call_operand.hbm [shape: bf16[256,128], index: 13, kind: input, shape index: {}]   ;;  %s2732_s14 = inlined_call_operand.vmem [shape: f32[1,128], index: 14, kind: input, shape index: {}]   ;;  %s2733_s15 = inlined_call_operand.vmem [shape: f32[1,128], index: 15, kind: input, shape index: {}]   ;;  %s2734_s16 = inlined_call_operand.vmem [shape: f32[1,128], index: 16, kind: input, shape index: {}]   ;;  %s2735_s17 = inlined_call_operand.vmem [shape: bf16[2,8,128], index: 17, kind: output, shape index: {}]  }
   0x1   :  { %2738 = sst [smem:[#allocation18_spill]] %s2718_s0 }
   0x2   :  { %2739 = sst [smem:[#allocation19_spill]] %s2719_s1 }
   0x3   :  { %2740 = sst [smem:[#allocation20_spill]] %s2725_s7 }
   0x4   :  { %2741 = sst [smem:[#allocation21_spill]] %s2728_s10 }
   0x5   :  { %2742 = sst [smem:[#allocation22_spill]] %s2733_s15 }
   0x6   :  { %2743 = sst [smem:[#allocation23_spill]] %s2734_s16 }
   0x7   :  { %s2744_s26 = sld [smem:[#allocation18_spill]] }
   0xd   :  { %s23_s10 = sshll.u32 %s2744_s26, 4  ;;  %s24_s10 = int_to_ptr.vmem [resolvable:$true] %s23_s10 }
   0xe   :  { %26 = dma.vmem_to_smem %s24_s10, 16, %s2240_s27, [#allocation6] }
   0xf   :  { %2218 = dma.done.wait [#allocation6], 16 }
  0x10   :  { %2219 = vsyncadd [#allocation6], 4294967280 }
  0x11   :  { %29 = sfence }
  0x12   :  { %30 = vsyncpa [#allocation9], 0 }
  0x13   :  { %31 = vsyncpa [#allocation11], 0  ;;  %s2345_s28 = smov 0   ;;  %s2347_s29 = smov 0  }
  0x14   :  { %s2349_s0 = smov 0  }
  0x15 LB: > { %2745 = sst [smem:[#allocation16_spill]] %s2234_s29  ;;  %s1668_s10 = sadd.s32 4294967295, %s2238_s0   ;;  %s2238_s0 = sphi %s2349_s0, %s37_s0   ;;  %s2234_s29 = sphi %s2347_s29, %s2759_s29   ;;  %s2230_s28 = sphi %s2345_s28, %s2758_s28  }
  0x16   : > { %2746 = sst [smem:[#allocation17_spill]] %s2238_s0  ;;  %p1670_p0 = scmp.ge.s32.totalorder %s2238_s0, 1 }
  0x17   : > { %p439_p1 = scmp.lt.s32.totalorder %s2238_s0, 3  ;;  %p2363_p2 = scmp.eq.s32.totalorder %s1668_s10, 0 }
  0x18   : > { %s2748_s7 = sld [smem:[#allocation20_spill]]  ;;  %s2241_s21 = smov [#allocation10]  }
  0x19   : > { %p2370_p3 = pnand %p1670_p0, %p439_p1  ;;  %s475_s22 = sshll.u32 %s2241_s21, 4  ;;  %s476_s22 = int_to_ptr.vmem [resolvable:$true] %s475_s22 }
  0x1a   : > { %s56_s24 = sadd.s32 1, %s2234_s29  ;;  %s2242_s25 = smov 64  }
  0x1b   : > { %p2024_p4 = pneg %p2370_p3  ;;  %p58_p6 = scmp.ge.s32.totalorder %s56_s24, 2 }
  0x1c   : > { %s2243_s26 = smov 4   ;;  %s450_s18 = sshll.u32 %s2721_s3, 4  ;;  %s451_s18 = int_to_ptr.hbm [resolvable:$true] %s450_s18 }
  0x1d   : > { %p2378_p5 = pnand %p2363_p2, %p2024_p4  ;;  %s2761_s24 = smov (%p58_p6, %s56_s24), 0 }
  0x1e   : > { %s473_s1 = sshll.u32 %s2748_s7, 4  ;;  %s2244_s19 = smov [#allocation8]   ;;  %s474_s1 = int_to_ptr.hbm [resolvable:$true] %s473_s1 }
  0x1f   : > { %2030 = dma.hbm_to_vmem [thread:$0]  (!%p2378_p5), %s474_s1, 1024, %s476_s22, [#allocation11], %s2242_s25, %s2242_s25, %s2243_s26  }
  0x20   : > { %s452_s21 = sshll.u32 %s2244_s19, 4  ;;  %s502_s29 = sshll.u32 %s2731_s13, 4  ;;  %s453_s21 = int_to_ptr.vmem [resolvable:$true] %s452_s21  ;;  %s503_s29 = int_to_ptr.hbm [resolvable:$true] %s502_s29 }
  0x21   : > { %2027 = dma.hbm_to_vmem [thread:$0]  (!%p2378_p5), %s451_s18, 1024, %s453_s21, [#allocation9], %s2242_s25, %s2242_s25, %s2243_s26  }
  0x22   : > { %s2245_s16 = smov [#allocation12]   ;;  %549 = sbr.rel (%p2370_p3) target bundleno = 2347 (0x92b), region = 84 }
  0x23   : > { %s504_s15 = sshll.u32 %s2245_s16, 4  ;;  %s505_s15 = int_to_ptr.vmem [resolvable:$true] %s504_s15 }
  0x24   : > { %2033 = dma.hbm_to_vmem [thread:$0]  (!%p2378_p5), %s503_s29, 2048, %s505_s15, [#allocation11], %s2242_s25, %s2242_s25, %s2243_s26  }
  0x27   : > { %2221 = dma.done.wait (%p2363_p2), [#allocation9], 1024  }
  0x28   : > { %2223 = vsyncadd (%p2363_p2), [#allocation9], 4294966272 }
  0x29   : > { %2225 = dma.done.wait (%p2363_p2), [#allocation11], 3072  }
  0x2a   : > { %2227 = vsyncadd (%p2363_p2), [#allocation11], 4294964224  ;;  %vm732_vm0 = vcmask 7168   ;;  %v2246_v0 = vmov -inf   ;;  %s2409_s7 = sld [smem:[#allocation7 + %s2230_s28]]  ;;  %p621_p7 = scmp.lt.s32.totalorder %s2230_s28, 1 }
  0x2b   : > { %733 = vst.msk [vmem:[#allocation3] sm:$0xff] %vm732_vm0, %v2246_v0  ;;  %vm737_vm1 = vcmask 523264   ;;  %v2247_v1 = vmov 0.0   ;;  %v1955_v2 = vld [vmem:[#allocation8 + $0x38] sm:$0xff]  ;;  %v1954_v3 = vld [vmem:[#allocation8 + $0x30] sm:$0xff]  ;;  %v1953_v4 = vld [vmem:[#allocation8 + $0x28] sm:$0xff] }
  0x2c   : > { %734 = vst.msk [vmem:[#allocation3 + $0x8] sm:$0xff] %vm732_vm0, %v2246_v0  ;;  %s2763_s28 = smov (!%p621_p7, %s2230_s28), 1  ;;  %716 = vmatpush.bf16.msra.mxu0 %v1955_v2  ;;  %v1952_v5 = vld [vmem:[#allocation8 + $0x20] sm:$0xff]  ;;  %v1951_v6 = vld [vmem:[#allocation8 + $0x18] sm:$0xff]  ;;  %v1950_v7 = vld [vmem:[#allocation8 + $0x10] sm:$0xff]  ;;  %s2751_s23 = sld [smem:[#allocation19_spill]] }
  0x2d   : > { %735 = vst.msk [vmem:[#allocation4] sm:$0xff] %vm732_vm0, %v2247_v1  ;;  %s2417_s15 = sshll.u32 %s2763_s28, 2  ;;  %v1949_v8 = vld [vmem:[#allocation8 + $0x8] sm:$0xff]  ;;  %v1948_v9 = vld [vmem:[#allocation8] sm:$0xff] }
  0x2e   : > { %736 = vst.msk [vmem:[#allocation4 + $0x8] sm:$0xff] %vm732_vm0, %v2247_v1  ;;  %s634_s0 = scalar_lea.vmem %s2720_s2, %s2417_s15  ;;  %s641_s20 = scalar_lea.vmem %s2735_s17, %s2417_s15  ;;  %v2076_v11 = vld [vmem:[%s2722_s4] ss:$0 sm:$0xff] }
  0x2f   : > { %738 = vst.msk [vmem:[#allocation5] sm:$0xff] %vm737_vm1, %v2247_v1 }
  0x30   : > { %739 = vst.msk [vmem:[#allocation5 + $0x8] sm:$0xff] %vm737_vm1, %v2247_v1  ;;  %717 = vmatpush.bf16.msra.mxu0 %v1954_v3  ;;  %p1715_p8 = scmp.le.s32.totalorder %s2409_s7, 0 }
  0x32   : > { %s2432_s25 = scalar_lea.vmem %s2751_s23, %s2417_s15 }
  0x33   : > { %v647_v10 = vld [vmem:[%s2432_s25] sm:$0xf] }
  0x34   : > { %718 = vmatpush.bf16.msra.mxu0 %v1953_v4 }
  0x38   : > { %719 = vmatpush.bf16.msra.mxu0 %v1952_v5 }
  0x3c   : > { %720 = vmatpush.bf16.msra.mxu0 %v1951_v6 }
  0x40   : > { %721 = vmatpush.bf16.msra.mxu0 %v1950_v7 }
  0x44   : > { %722 = vmatpush.bf16.msra.mxu0 %v1949_v8 }
  0x48   : > { %723 = vmatpush.bf16.msra.mxu0 %v1948_v9 }
  0x4b   : > { %724 = vmatmul.bf16.vlgmr.msra.gmra.mxu0 %v647_v10 }
  0xc8   : > { %v725_v12 = vpop.f32.mrf.mxu0 }
  0xc9   : > { %v726_v13 = vadd.f32 %v2076_v11, %v725_v12 }
  0xcb   : > { %v729_v14 = vmul.f32 0.125, %v726_v13 }
  0xcc   : > { %745 = sbr.rel (%p1715_p8) target bundleno = 1273 (0x4f9), region = 104 }
  0xcd   : > { %v730_v15 = vpack.c.bf16 %v729_v14, %v729_v14 }
  0xcf   : > { %731 = vst [vmem:[#allocation2] sm:$0xf] %v730_v15 }
  0xd0   : > { %v727_v16 = vpop.f32.mrf.mxu0 }
  0xd1   : > { %v1774_v17 = vld [vmem:[%s2723_s5 + $0x70] sm:$0xf]  ;;  %v1971_v18 = vld [vmem:[%s2723_s5 + $0x74] sm:$0xf0]  ;;  %v1766_v19 = vld [vmem:[%s2723_s5 + $0x60] sm:$0xf] }
  0xd2   : > { %v1775_v20 = vor.u32 %v1971_v18, %v1774_v17  ;;  %v1969_v21 = vld [vmem:[%s2723_s5 + $0x64] sm:$0xf0]  ;;  %v1758_v23 = vld [vmem:[%s2723_s5 + $0x50] sm:$0xf]  ;;  %v1967_v24 = vld [vmem:[%s2723_s5 + $0x54] sm:$0xf0] }
  0xd3   : > { %v1767_v22 = vor.u32 %v1969_v21, %v1766_v19  ;;  %v1970_v25 = vld [vmem:[%s2723_s5 + $0x74] sm:$0xf]  ;;  %v1776_v26 = vld [vmem:[%s2723_s5 + $0x78] sm:$0xf0]  ;;  %v1968_v27 = vld [vmem:[%s2723_s5 + $0x64] sm:$0xf]  ;;  %v1759_v29 = vor.u32 %v1967_v24, %v1758_v23 }
  0xd4   : > { %849 = vmatpush.bf16.msra.mxu0 %v1775_v20  ;;  %v1768_v28 = vld [vmem:[%s2723_s5 + $0x68] sm:$0xf0]  ;;  %v1779_v30 = vor.u32 %v1970_v25, %v1776_v26  ;;  %v1750_v31 = vld [vmem:[%s2723_s5 + $0x40] sm:$0xf]  ;;  %v1965_v32 = vld [vmem:[%s2723_s5 + $0x44] sm:$0xf0]  ;;  %v877_v20 = vlaneseq }
  0xd5   : > { %v1771_v33 = vor.u32 %v1968_v27, %v1768_v28  ;;  %v1966_v34 = vld [vmem:[%s2723_s5 + $0x54] sm:$0xf]  ;;  %v1760_v35 = vld [vmem:[%s2723_s5 + $0x58] sm:$0xf0]  ;;  %v1751_v36 = vor.u32 %v1965_v32, %v1750_v31  ;;  %v1742_v37 = vld [vmem:[%s2723_s5 + $0x30] sm:$0xf] }
  0xd6   : > { %862 = vmatpush.bf16.msra.mxu1 %v1779_v30  ;;  %v1963_v38 = vld [vmem:[%s2723_s5 + $0x34] sm:$0xf0]  ;;  %v1763_v39 = vor.u32 %v1966_v34, %v1760_v35  ;;  %v1964_v40 = vld [vmem:[%s2723_s5 + $0x44] sm:$0xf]  ;;  %v1752_v41 = vld [vmem:[%s2723_s5 + $0x48] sm:$0xf0] }
  0xd7   : > { %v1743_v42 = vor.u32 %v1963_v38, %v1742_v37  ;;  %v1734_v43 = vld [vmem:[%s2723_s5 + $0x20] sm:$0xf]  ;;  %v1961_v44 = vld [vmem:[%s2723_s5 + $0x24] sm:$0xf0]  ;;  %v1755_v45 = vor.u32 %v1964_v40, %v1752_v41  ;;  %v1962_v46 = vld [vmem:[%s2723_s5 + $0x34] sm:$0xf] }
  0xd8   : > { %850 = vmatpush.bf16.msra.mxu0 %v1767_v22  ;;  %v1744_v47 = vld [vmem:[%s2723_s5 + $0x38] sm:$0xf0]  ;;  %v1735_v48 = vor.u32 %v1961_v44, %v1734_v43  ;;  %v1726_v49 = vld [vmem:[%s2723_s5 + $0x10] sm:$0xf]  ;;  %v1959_v50 = vld [vmem:[%s2723_s5 + $0x14] sm:$0xf0]  ;;  %v881_v22 = vstv %s2409_s7 }
  0xd9   : > { %v1747_v51 = vor.u32 %v1962_v46, %v1744_v47  ;;  %v1960_v52 = vld [vmem:[%s2723_s5 + $0x24] sm:$0xf]  ;;  %v1736_v53 = vld [vmem:[%s2723_s5 + $0x28] sm:$0xf0]  ;;  %v1727_v54 = vor.u32 %v1959_v50, %v1726_v49  ;;  %v1718_v55 = vld [vmem:[%s2723_s5] sm:$0xf] }
  0xda   : > { %863 = vmatpush.bf16.msra.mxu1 %v1771_v33  ;;  %v1957_v56 = vld [vmem:[%s2723_s5 + $0x4] sm:$0xf0]  ;;  %v1739_v57 = vor.u32 %v1960_v52, %v1736_v53  ;;  %v1958_v58 = vld [vmem:[%s2723_s5 + $0x14] sm:$0xf]  ;;  %v1728_v59 = vld [vmem:[%s2723_s5 + $0x18] sm:$0xf0] }
  0xdb   : > { %v1719_v60 = vor.u32 %v1957_v56, %v1718_v55  ;;  %v1731_v61 = vor.u32 %v1958_v58, %v1728_v59  ;;  %v1956_v62 = vld [vmem:[%s2723_s5 + $0x4] sm:$0xf]  ;;  %v1720_v63 = vld [vmem:[%s2723_s5 + $0x8] sm:$0xf0]  ;;  %v746_v0 = vld [vmem:[%s634_s0] sm:$0xf] }
  0xdc   : > { %851 = vmatpush.bf16.msra.mxu0 %v1759_v29  ;;  %v1723_v1 = vor.u32 %v1956_v62, %v1720_v63  ;;  %v763_v2 = vld [vmem:[%s2724_s6] sm:$0x3]  ;;  %s2248_s0 = smov 64   ;;  %vm941_vm2 = vcmask 1043456   ;;  %v878_v21 = vand.u32 127, %v877_v20  ;;  %vm906_vm4 = vcmask 64512  }
  0xdd   : > { %v765_v3 = vperm.slane %v763_v2, 0  ;;  %v883_v12 = vld [vmem:[#allocation2] sm:$0xf]  ;;  %v766_v14 = vperm.slane %v763_v2, 1  ;;  %v2249_v28 = vmov 0   ;;  %v905_v34 = vld [vmem:[#allocation3] sm:$0xff] }
  0xde   : > { %864 = vmatpush.bf16.msra.mxu1 %v1763_v39  ;;  %vm2549_vm3 = vcmp.ge.s32.totalorder %v878_v21, %v881_v22  ;;  %2077 = vset.pattern.permute.xlu0 %v2249_v28  ;;  %v961_v29 = vld [vmem:[#allocation2] sm:$0xf]  ;;  %v922_v49 = vld [vmem:[#allocation4] sm:$0xff]  ;;  %v993_v59 = vld [vmem:[#allocation3 + $0x8] sm:$0xff] }
  0xdf   : > { %2078 = vset.pattern.permute.xlu2 %v2249_v28  ;;  %v963_v30 = vunpack.c.l.b16 %v961_v29 }
  0xe0   : > { %852 = vmatpush.bf16.msra.mxu0 %v1751_v36 }
  0xe1   : > { %v964_v31 = vpack.c.b16 %v963_v30, %v963_v30 }
  0xe2   : > { %865 = vmatpush.bf16.msra.mxu1 %v1755_v45 }
  0xe4   : > { %853 = vmatpush.bf16.msra.mxu0 %v1743_v42 }
  0xe6   : > { %866 = vmatpush.bf16.msra.mxu1 %v1747_v51 }
  0xe8   : > { %854 = vmatpush.bf16.msra.mxu0 %v1735_v48 }
  0xea   : > { %867 = vmatpush.bf16.msra.mxu1 %v1739_v57 }
  0xec   : > { %855 = vmatpush.bf16.msra.mxu0 %v1727_v54 }
  0xee   : > { %868 = vmatpush.bf16.msra.mxu1 %v1731_v61 }
  0xf0   : > { %856 = vmatpush.bf16.msra.mxu0 %v1719_v60 }
  0xf2   : > { %869 = vmatpush.bf16.msra.mxu1 %v1723_v1 }
  0xf3   : > { %857 = vmatmul.bf16.vlgmr.msra.gmra.mxu0 %v746_v0 }
  0xf5   : > { %870 = vmatmul.bf16.vlgmr.msra.gmra.mxu1 %v746_v0 }
 0x170   : > { %v858_v4 = vpop.f32.mrf.mxu0 }
 0x171   : > { %v859_v5 = vadd.f32 %v858_v4, %v765_v3  ;;  %v930_v4 = vld [vmem:[#allocation5] sm:$0xff] }
 0x172   : > { %v871_v9 = vpop.f32.mrf.mxu1 }
 0x173   : > { %v875_v6 = vpack.c.bf16 %v859_v5, %v859_v5  ;;  %v872_v15 = vadd.f32 %v871_v9, %v766_v14 }
 0x175   : > { %v889_v7 = vsel %vm737_vm1, %v875_v6, 0  ;;  %v968_v8 = vunpack.c.l.b16 %v875_v6  ;;  %v876_v16 = vpack.c.bf16 %v872_v15, %v872_v15  ;;  %v1018_v15 = vld [vmem:[#allocation5 + $0x8] sm:$0xff] }
 0x176   : > { %898 = vmatpush.bf16.xpose.msra.mxu2 %v889_v7 }
 0x177   : > { %v969_v10 = vpack.c.b16 %v968_v8, %v968_v8  ;;  %v943_v17 = vsel %vm941_vm2, %v876_v16, 0  ;;  %v1027_v32 = vunpack.c.l.b16 %v876_v16 }
 0x178   : > { %v860_v11 = vpop.f32.mrf.mxu0  ;;  %952 = vmatpush.bf16.msra.mxu3 %v943_v17 }
 0x179   : > { %970 = vrot.lane.b32.xlu1 %v969_v10, %s2248_s0  ;;  %v1028_v33 = vpack.c.b16 %v1027_v32, %v1027_v32  ;;  %v1010_v11 = vld [vmem:[#allocation4 + $0x8] sm:$0xff] }
 0x17a   : > { %v873_v13 = vpop.f32.mrf.mxu1 }
 0x17d   : > { %1780 = vmatmul.msk.bf16.vlgmr.msra.gmra.mxu2 %vm737_vm1, %v883_v12 }
 0x181   : > { %965 = vrot.lane.b32.xlu1 %v964_v31, %s2248_s0 }
 0x189   : > { %1029 = vrot.lane.b32.xlu1 %v1028_v33, %s2248_s0 }
 0x1eb   : > { %v971_v18 = vpop.permute.xlu1 %970 }
 0x1ec   : > { %v976_v19 = vsel %vm737_vm1, %v971_v18, 0 }
 0x1ed   : > { %985 = vmatpush.bf16.xpose.msrb.mxu3 %v976_v19 }
 0x1f3   : > { %v966_v44 = vpop.permute.xlu1 %965 }
 0x1fb   : > { %v1030_v45 = vpop.permute.xlu1 %1029 }
 0x1fc   : > { %v1035_v46 = vsel %vm941_vm2, %v1030_v45, 0 }
 0x1fd   : > { %1044 = vmatpush.bf16.msrb.mxu2 %v1035_v46 }
 0x200   : > { %v900_v24 = vpop.f32.mrf.mxu2 }
 0x201   : > { %v904_v25 = vsel %vm2549_vm3, -1e+09, %v900_v24 }
 0x202   : > { %v907_v26 = vsel %vm906_vm4, %v904_v25, -inf }
 0x203   : > { %908 = vmax.xlane.f32.xlu0 %v907_v26 }
 0x208   : > { %v902_v27 = vpop.f32.mrf.mxu2 }
 0x276   : > { %v909_v35 = vpop.xlane.xlu0 %908 }
 0x277   : > { %v910_v36 = vmax.f32 %v905_v34, %v909_v35 }
 0x279   : > { %v911_v37 = vsub.f32 %v905_v34, %v910_v36  ;;  %960 = vst.msk [vmem:[#allocation3] sm:$0xff] %vm732_vm0, %v910_v36  ;;  %916 = vperm.xlu0 %2077, %v910_v36  }
 0x27b   : > { %v912_v47 = vmul.f32 1.442695, %v911_v37 }
 0x2eb   : > { %v917_v38 = vpop.permute.xlu0 %916 }
 0x2ec   : > { %v919_v39 = vsub.f32 %v904_v25, %v917_v38 }
 0x2ee   : > { %v920_v40 = vmul.f32 1.442695, %v919_v39 }
 0x2f0   : > { %2079 = vpow2.f32 %v920_v40 }
 0x2f1   : > { %2081 = vpow2.f32 %v912_v47 }
 0x2f6   : > { %v2080_v41 = vpop.eup %2079 }
 0x2f7   : > { %v924_v42 = vsel %vm906_vm4, %v2080_v41, 0.0  ;;  %v937_v43 = vpack.c.bf16 %v2080_v41, %v2080_v41  ;;  %v2082_v48 = vpop.eup %2081 }
 0x2f8   : > { %925 = vadd.xlane.f32.xlu1 %v924_v42  ;;  %v923_v50 = vmul.f32 %v2082_v48, %v922_v49 }
 0x2f9   : > { %1781 = vmatmul.msk.bf16.vlgmr.msra.gmra.mxu3 %vm906_vm4, %v937_v43 }
 0x309   : > { %1782 = vmatmul.msk.bf16.vlgmr.msrb.gmra.mxu3 %vm737_vm1, %v966_v44 }
 0x36b   : > { %v926_v51 = vpop.xlane.xlu1 %925 }
 0x36c   : > { %v927_v52 = vadd.f32 %v926_v51, %v923_v50 }
 0x36e   : > { %929 = vst.msk [vmem:[#allocation4] sm:$0xff] %vm732_vm0, %v927_v52 }
 0x37c   : > { %v954_v53 = vpop.f32.mrf.mxu3 }
 0x384   : > { %v956_v54 = vpop.f32.mrf.mxu3 }
 0x38c   : > { %v987_v55 = vpop.f32.mrf.mxu3 }
 0x38d   : > { %v991_v56 = vsel %vm2549_vm3, -1e+09, %v987_v55 }
 0x38e   : > { %v994_v57 = vsel %vm906_vm4, %v991_v56, -inf }
 0x38f   : > { %995 = vmax.xlane.f32.xlu2 %v994_v57 }
 0x394   : > { %v989_v58 = vpop.f32.mrf.mxu3 }
 0x402   : > { %v996_v60 = vpop.xlane.xlu2 %995 }
 0x403   : > { %v997_v61 = vmax.f32 %v993_v59, %v996_v60 }
 0x405   : > { %1052 = vst.msk [vmem:[#allocation3 + $0x8] sm:$0xff] %vm732_vm0, %v997_v61  ;;  %1003 = vperm.xlu2 %2078, %v997_v61   ;;  %v998_v62 = vsub.f32 %v993_v59, %v997_v61 }
 0x407   : > { %v999_v63 = vmul.f32 1.442695, %v998_v62 }
 0x409   : > { %2083 = vpow2.f32 %v999_v63 }
 0x40d   : > { %933 = vperm.xlu2 %2078, %v2082_v48  }
 0x40f   : > { %v2084_v0 = vpop.eup %2083 }
 0x410   : > { %v1011_v12 = vmul.f32 %v2084_v0, %v1010_v11 }
 0x415   : > { %1021 = vperm.xlu2 %2078, %v2084_v0  }
 0x45f   : > { %v1004_v1 = vpop.permute.xlu2 %1003 }
 0x460   : > { %v1006_v2 = vsub.f32 %v991_v56, %v1004_v1 }
 0x462   : > { %v1007_v3 = vmul.f32 1.442695, %v1006_v2 }
 0x464   : > { %2085 = vpow2.f32 %v1007_v3 }
 0x467   : > { %v934_v5 = vpop.permute.xlu2 %933 }
 0x468   : > { %v936_v6 = vmul.f32 %v934_v5, %v930_v4 }
 0x46a   : > { %v2086_v7 = vpop.eup %2085  ;;  %v958_v8 = vadd.f32 %v954_v53, %v936_v6 }
 0x46b   : > { %v1012_v9 = vsel %vm906_vm4, %v2086_v7, 0.0  ;;  %v1025_v10 = vpack.c.bf16 %v2086_v7, %v2086_v7 }
 0x46c   : > { %959 = vst.msk [vmem:[#allocation5] sm:$0xff] %vm737_vm1, %v958_v8  ;;  %1013 = vadd.xlane.f32.xlu0 %v1012_v9 }
 0x46d   : > { %1783 = vmatmul.msk.bf16.vlgmr.msrb.gmra.mxu2 %vm906_vm4, %v1025_v10 }
 0x46f   : > { %v1022_v16 = vpop.permute.xlu2 %1021 }
 0x470   : > { %v1024_v17 = vmul.f32 %v1022_v16, %v1018_v15 }
 0x4df   : > { %v1014_v13 = vpop.xlane.xlu0 %1013 }
 0x4e0   : > { %v1015_v14 = vadd.f32 %v1014_v13, %v1011_v12 }
 0x4e2   : > { %1016 = vst.msk [vmem:[#allocation4 + $0x8] sm:$0xff] %vm732_vm0, %v1015_v14 }
 0x4f0   : > { %v1046_v18 = vpop.f32.mrf.mxu2 }
 0x4f1   : > { %v1050_v19 = vadd.f32 %v1046_v18, %v1024_v17 }
 0x4f3   : > { %1051 = vst.msk [vmem:[#allocation5 + $0x8] sm:$0xff] %vm737_vm1, %v1050_v19 }
 0x4f8   : > { %v1048_v20 = vpop.f32.mrf.mxu2 }
 0x4f9 PF: > { %v1056_v21 = vld [vmem:[#allocation4] sm:$0xff]  ;;  %v1975_v22 = vld [vmem:[#allocation10 + $0x18] sm:$0xff]  ;;  %v2250_v23 = vmov 0   ;;  %v1974_v25 = vld [vmem:[#allocation10 + $0x10] sm:$0xff]  ;;  %v2251_v52 = vmov 128.0   ;;  %s2754_s1 = sld [smem:[#allocation21_spill]] }
 0x4fa   : > { %2087 = vset.pattern.permute.xlu0 %v2250_v23  ;;  %2094 = vrcp.f32 %v1056_v21  ;;  %v1979_v24 = vld [vmem:[#allocation10 + $0x38] sm:$0xff]  ;;  %1166 = vmatpush.bf16.msra.mxu1 %v1975_v22  ;;  %v1075_v26 = vld [vmem:[#allocation4 + $0x8] sm:$0xff]  ;;  %v1978_v30 = vld [vmem:[#allocation10 + $0x30] sm:$0xff]  ;;  %s2755_s18 = sld [smem:[#allocation22_spill]] }
 0x4fb   : > { %1126 = vmatpush.bf16.msra.mxu0 %v1979_v24  ;;  %v1973_v27 = vld [vmem:[#allocation10 + $0x8] sm:$0xff]  ;;  %2096 = vrcp.f32 %v1075_v26  ;;  %v1972_v31 = vld [vmem:[#allocation10] sm:$0xff]  ;;  %v1058_v34 = vld [vmem:[#allocation5] sm:$0xff]  ;;  %s2756_s7 = sld [smem:[#allocation23_spill]] }
 0x4fc   : > { %v1977_v32 = vld [vmem:[#allocation10 + $0x28] sm:$0xff]  ;;  %v1976_v33 = vld [vmem:[#allocation10 + $0x20] sm:$0xff]  ;;  %v1078_v38 = vld [vmem:[#allocation5 + $0x8] sm:$0xff]  ;;  %2098 = vrcp.f32 %v2251_v52 }
 0x4fd   : > { %v1180_v43 = vld [vmem:[%s2432_s25] sm:$0xf]  ;;  %v1876_v53 = vld [vmem:[%s2729_s11 + $0x70] sm:$0xf]  ;;  %v1995_v54 = vld [vmem:[%s2729_s11 + $0x74] sm:$0xf0] }
 0x4fe   : > { %1167 = vmatpush.bf16.msra.mxu1 %v1974_v25  ;;  %v2088_v44 = vld [vmem:[%s2726_s8] ss:$0 sm:$0xff]  ;;  %v1181_v48 = vunpack.c.l.bf16 %v1180_v43  ;;  %v1994_v55 = vld [vmem:[%s2729_s11 + $0x74] sm:$0xf]  ;;  %v1877_v56 = vor.u32 %v1995_v54, %v1876_v53  ;;  %v1878_v57 = vld [vmem:[%s2729_s11 + $0x78] sm:$0xf0] }
 0x4ff   : > { %1127 = vmatpush.bf16.msra.mxu0 %v1978_v30  ;;  %v1881_v58 = vor.u32 %v1994_v55, %v1878_v57  ;;  %v1868_v5 = vld [vmem:[%s2729_s11 + $0x60] sm:$0xf]  ;;  %v1993_v6 = vld [vmem:[%s2729_s11 + $0x64] sm:$0xf0]  ;;  %v1992_v7 = vld [vmem:[%s2729_s11 + $0x64] sm:$0xf] }
 0x500   : > { %v2095_v28 = vpop.eup %2094  ;;  %1323 = vmatpush.bf16.msra.mxu2 %v1877_v56  ;;  %v1869_v8 = vor.u32 %v1993_v6, %v1868_v5  ;;  %v1870_v9 = vld [vmem:[%s2729_s11 + $0x68] sm:$0xf0]  ;;  %v1860_v11 = vld [vmem:[%s2729_s11 + $0x50] sm:$0xf]  ;;  %v1991_v12 = vld [vmem:[%s2729_s11 + $0x54] sm:$0xf0] }
 0x501   : > { %1061 = vperm.xlu0 %2087, %v2095_v28   ;;  %v2097_v29 = vpop.eup %2096  ;;  %1336 = vmatpush.bf16.msra.mxu3 %v1881_v58  ;;  %v1873_v10 = vor.u32 %v1992_v7, %v1870_v9  ;;  %v1990_v13 = vld [vmem:[%s2729_s11 + $0x54] sm:$0xf]  ;;  %v1861_v14 = vor.u32 %v1991_v12, %v1860_v11  ;;  %v1862_v15 = vld [vmem:[%s2729_s11 + $0x58] sm:$0xf0]  ;;  %v1852_v17 = vld [vmem:[%s2729_s11 + $0x40] sm:$0xf] }
 0x502   : > { %1168 = vmatpush.bf16.msra.mxu1 %v1973_v27  ;;  %v2099_v59 = vpop.eup %2098  ;;  %v1865_v16 = vor.u32 %v1990_v13, %v1862_v15  ;;  %v1989_v18 = vld [vmem:[%s2729_s11 + $0x44] sm:$0xf0]  ;;  %v1988_v19 = vld [vmem:[%s2729_s11 + $0x44] sm:$0xf]  ;;  %v1854_v21 = vld [vmem:[%s2729_s11 + $0x48] sm:$0xf0] }
 0x503   : > { %1128 = vmatpush.bf16.msra.mxu0 %v1977_v32  ;;  %v1188_v60 = vmul.f32 128.0, %v2099_v59  ;;  %vm1192_vm5 = vweird.f32 %v2099_v59  ;;  %v1853_v20 = vor.u32 %v1989_v18, %v1852_v17  ;;  %v1857_v22 = vor.u32 %v1988_v19, %v1854_v21  ;;  %v1844_v23 = vld [vmem:[%s2729_s11 + $0x30] sm:$0xf]  ;;  %v1987_v24 = vld [vmem:[%s2729_s11 + $0x34] sm:$0xf0]  ;;  %v2010_v52 = vld [vmem:[#allocation12 + $0x70] sm:$0xff] }
 0x504   : > { %1324 = vmatpush.bf16.msra.mxu2 %v1869_v8  ;;  %v1986_v25 = vld [vmem:[%s2729_s11 + $0x34] sm:$0xf]  ;;  %v1845_v26 = vor.u32 %v1987_v24, %v1844_v23  ;;  %v1846_v27 = vld [vmem:[%s2729_s11 + $0x38] sm:$0xf0]  ;;  %v1985_v30 = vld [vmem:[%s2729_s11 + $0x24] sm:$0xf0] }
 0x505   : > { %v1189_v61 = vsub.f32 1.0, %v1188_v60  ;;  %1337 = vmatpush.bf16.msra.mxu3 %v1873_v10  ;;  %v1849_v28 = vor.u32 %v1986_v25, %v1846_v27  ;;  %v1980_v43 = vld [vmem:[%s2729_s11 + $0x4] sm:$0xf]  ;;  %v2001_v54 = vld [vmem:[#allocation12 + $0x28] sm:$0xff]  ;;  %v2000_v56 = vld [vmem:[#allocation12 + $0x20] sm:$0xff] }
 0x506   : > { %1169 = vmatpush.bf16.msra.mxu1 %v1972_v31  ;;  %v1984_v31 = vld [vmem:[%s2729_s11 + $0x24] sm:$0xf]  ;;  %v2009_v55 = vld [vmem:[#allocation12 + $0x68] sm:$0xff]  ;;  %v2008_v57 = vld [vmem:[#allocation12 + $0x60] sm:$0xff] }
 0x507   : > { %1129 = vmatpush.bf16.msra.mxu0 %v1976_v33  ;;  %v1190_v62 = vmul.f32 %v2099_v59, %v1189_v61  ;;  %v1838_v33 = vld [vmem:[%s2729_s11 + $0x28] sm:$0xf0]  ;;  %v2089_v6 = vld [vmem:[%s2727_s9] ss:$0 sm:$0xff]  ;;  %v1996_v15 = vld [vmem:[#allocation12] sm:$0xff] }
 0x508   : > { %1325 = vmatpush.bf16.msra.mxu2 %v1861_v14  ;;  %v1999_v60 = vld [vmem:[#allocation12 + $0x18] sm:$0xff]  ;;  %v2090_v9 = vld [vmem:[%s2754_s1] ss:$0 sm:$0xff] }
 0x509   : > { %1081 = vperm.xlu0 %2087, %v2097_v29   ;;  %v1191_v63 = vadd.f32 %v2099_v59, %v1190_v62  ;;  %1338 = vmatpush.bf16.msra.mxu3 %v1865_v16  ;;  %v1836_v29 = vld [vmem:[%s2729_s11 + $0x20] sm:$0xf]  ;;  %v2007_v61 = vld [vmem:[#allocation12 + $0x58] sm:$0xff]  ;;  %v2004_v16 = vld [vmem:[#allocation12 + $0x40] sm:$0xff] }
 0x50a   : > { %v1837_v32 = vor.u32 %v1985_v30, %v1836_v29  ;;  %v1997_v13 = vld [vmem:[#allocation12 + $0x8] sm:$0xff] }
 0x50b   : > { %v2591_v0 = vsel %vm1192_vm5, %v2099_v59, %v1191_v63  ;;  %v2005_v14 = vld [vmem:[#allocation12 + $0x48] sm:$0xff] }
 0x50c   : > { %1326 = vmatpush.bf16.msra.mxu2 %v1853_v20  ;;  %v2091_v29 = vld [vmem:[%s2732_s14] ss:$0 sm:$0xff] }
 0x50d   : > { %1339 = vmatpush.bf16.msra.mxu3 %v1857_v22 }
 0x510   : > { %1327 = vmatpush.bf16.msra.mxu2 %v1845_v26 }
 0x511   : > { %1340 = vmatpush.bf16.msra.mxu3 %v1849_v28 }
 0x514   : > { %1328 = vmatpush.bf16.msra.mxu2 %v1837_v32 }
 0x573   : > { %v1062_v35 = vpop.permute.xlu0 %1061 }
 0x574   : > { %v1064_v36 = vmul.f32 %v1062_v35, %v1058_v34  ;;  %v1841_v34 = vor.u32 %v1984_v31, %v1838_v33  ;;  %v1828_v35 = vld [vmem:[%s2729_s11 + $0x10] sm:$0xf] }
 0x576   : > { %v1065_v37 = vpack.c.bf16 %v1064_v36, %v1064_v36  ;;  %v1983_v36 = vld [vmem:[%s2729_s11 + $0x14] sm:$0xf0]  ;;  %1341 = vmatpush.bf16.msra.mxu3 %v1841_v34 }
 0x578   : > { %1817 = vmatmul.msk.bf16.vlgmr.msra.gmra.mxu1 %vm737_vm1, %v1065_v37  ;;  %v1982_v37 = vld [vmem:[%s2729_s11 + $0x14] sm:$0xf] }
 0x57b   : > { %v1082_v39 = vpop.permute.xlu0 %1081 }
 0x57c   : > { %v1084_v40 = vmul.f32 %v1082_v39, %v1078_v38  ;;  %v1829_v38 = vor.u32 %v1983_v36, %v1828_v35  ;;  %v1830_v39 = vld [vmem:[%s2729_s11 + $0x18] sm:$0xf0] }
 0x57e   : > { %v1085_v41 = vpack.c.bf16 %v1084_v40, %v1084_v40  ;;  %v1820_v40 = vld [vmem:[%s2729_s11] sm:$0xf]  ;;  %1329 = vmatpush.bf16.msra.mxu2 %v1829_v38 }
 0x580   : > { %1800 = vmatmul.msk.bf16.vlgmr.msra.gmra.mxu0 %vm737_vm1, %v1085_v41  ;;  %v1981_v41 = vld [vmem:[%s2729_s11 + $0x4] sm:$0xf0] }
 0x5f5   : > { %v1171_v42 = vpop.f32.mrf.mxu1 }
 0x5fd   : > { %v1131_v45 = vpop.f32.mrf.mxu0  ;;  %v1173_v46 = vpop.f32.mrf.mxu1 }
 0x5fe   : > { %v1172_v47 = vadd.f32 %v1171_v42, %v1131_v45  ;;  %v1833_v42 = vor.u32 %v1982_v37, %v1830_v39  ;;  %v1821_v45 = vor.u32 %v1981_v41, %v1820_v40 }
 0x600   : > { %v1179_v49 = vadd.f32 %v2088_v44, %v1172_v47  ;;  %v1822_v44 = vld [vmem:[%s2729_s11 + $0x8] sm:$0xf0]  ;;  %1342 = vmatpush.bf16.msra.mxu3 %v1833_v42  ;;  %1330 = vmatpush.bf16.msra.mxu2 %v1821_v45 }
 0x601   : > { %v1825_v46 = vor.u32 %v1980_v43, %v1822_v44  ;;  %v2003_v47 = vld [vmem:[#allocation12 + $0x38] sm:$0xff] }
 0x602   : > { %v1182_v50 = vadd.f32 %v1181_v48, %v1179_v49  ;;  %v2011_v48 = vld [vmem:[#allocation12 + $0x78] sm:$0xff]  ;;  %1485 = vmatpush.bf16.msrb.mxu0 %v2003_v47 }
 0x603   : > { %1498 = vmatpush.bf16.msrb.mxu1 %v2011_v48 }
 0x604   : > { %1185 = vadd.xlane.f32.xlu1 %v1182_v50  ;;  %1343 = vmatpush.bf16.msra.mxu3 %v1825_v46 }
 0x605   : > { %v1133_v51 = vpop.f32.mrf.mxu0 }
 0x606   : > { %v2002_v51 = vld [vmem:[#allocation12 + $0x30] sm:$0xff] }
 0x607   : > { %1486 = vmatpush.bf16.msrb.mxu0 %v2002_v51  ;;  %1499 = vmatpush.bf16.msrb.mxu1 %v2010_v52 }
 0x60b   : > { %1487 = vmatpush.bf16.msrb.mxu0 %v2001_v54  ;;  %1500 = vmatpush.bf16.msrb.mxu1 %v2009_v55 }
 0x60f   : > { %1488 = vmatpush.bf16.msrb.mxu0 %v2000_v56  ;;  %1501 = vmatpush.bf16.msrb.mxu1 %v2008_v57 }
 0x613   : > { %1489 = vmatpush.bf16.msrb.mxu0 %v1999_v60  ;;  %1502 = vmatpush.bf16.msrb.mxu1 %v2007_v61 }
 0x677   : > { %v1186_v1 = vpop.xlane.xlu1 %1185 }
 0x678   : > { %v1194_v2 = vmul.f32 %v2591_v0, %v1186_v1  ;;  %v1998_v1 = vld [vmem:[#allocation12 + $0x10] sm:$0xff] }
 0x679   : > { %1490 = vmatpush.bf16.msrb.mxu0 %v1998_v1 }
 0x67a   : > { %v2594_v3 = vsub.f32 %v1182_v50, %v1194_v2  ;;  %v2006_v2 = vld [vmem:[#allocation12 + $0x50] sm:$0xff] }
 0x67b   : > { %1503 = vmatpush.bf16.msrb.mxu1 %v2006_v2 }
 0x67c   : > { %v1196_v4 = vmul.f32 %v2594_v3, %v2594_v3 }
 0x67d   : > { %1491 = vmatpush.bf16.msrb.mxu0 %v1997_v13 }
 0x67e   : > { %1197 = vadd.xlane.f32.xlu1 %v1196_v4 }
 0x67f   : > { %1504 = vmatpush.bf16.msrb.mxu1 %v2005_v14 }
 0x681   : > { %1492 = vmatpush.bf16.msrb.mxu0 %v1996_v15 }
 0x683   : > { %1505 = vmatpush.bf16.msrb.mxu1 %v2004_v16 }
 0x6f1   : > { %v1198_v49 = vpop.xlane.xlu1 %1197 }
 0x6f2   : > { %v1199_v50 = vmul.f32 %v1198_v49, %v2591_v0 }
 0x6f4   : > { %v1200_v53 = vadd.f32 1e-05, %v1199_v50  ;;  %v2092_v50 = vld [vmem:[%s2755_s18] ss:$0 sm:$0xff] }
 0x6f6   : > { %2100 = vrsqrt.f32 %v1200_v53  ;;  %vm1207_vm7 = vweird.f32 %v1200_v53 }
 0x6fc   : > { %v2101_v58 = vpop.eup %2100 }
 0x6fd   : > { %v1202_v59 = vmul.f32 %v2101_v58, %v1200_v53  ;;  %vm1208_vm6 = vweird.f32 %v2101_v58 }
 0x6fe   : > { %vm1209_vm8 = vmor %vm1207_vm7, %vm1208_vm6 }
 0x6ff   : > { %v1203_v62 = vmul.f32 %v2101_v58, %v1202_v59 }
 0x701   : > { %v1204_v63 = vmul.f32 0.5, %v1203_v62 }
 0x703   : > { %v1205_v4 = vsub.f32 1.5, %v1204_v63 }
 0x705   : > { %v1206_v5 = vmul.f32 %v2101_v58, %v1205_v4 }
 0x707   : > { %v1210_v7 = vsel %vm1209_vm8, %v2101_v58, %v1206_v5 }
 0x708   : > { %v1211_v8 = vmul.f32 %v1210_v7, %v2594_v3  ;;  %v1237_v3 = vld [vmem:[%s2730_s12] sm:$0x3] }
 0x709   : > { %v1239_v17 = vperm.slane %v1237_v3, 0  ;;  %v1240_v18 = vperm.slane %v1237_v3, 1 }
 0x70a   : > { %v1215_v10 = vmul.f32 %v2089_v6, %v1211_v8 }
 0x70c   : > { %v1219_v11 = vadd.f32 %v2090_v9, %v1215_v10 }
 0x70e   : > { %v1220_v12 = vpack.c.bf16 %v1219_v11, %v1219_v11 }
 0x710   : > { %1331 = vmatmul.bf16.vlgmr.msra.gmra.mxu2 %v1220_v12  ;;  %1344 = vmatmul.bf16.vlgmr.msra.gmra.mxu3 %v1220_v12 }
 0x793   : > { %v1332_v19 = vpop.f32.mrf.mxu2  ;;  %v1345_v20 = vpop.f32.mrf.mxu3 }
 0x794   : > { %v1333_v21 = vadd.f32 %v1332_v19, %v1239_v17  ;;  %v1346_v22 = vadd.f32 %v1345_v20, %v1240_v18 }
 0x796   : > { %v1349_v23 = vmax.f32 %v1333_v21, 0.0  ;;  %v1350_v24 = vmax.f32 %v1346_v22, 0.0 }
 0x798   : > { %v1351_v25 = vpack.c.bf16 %v1349_v23, %v1349_v23  ;;  %v1352_v26 = vpack.c.bf16 %v1350_v24, %v1350_v24 }
 0x79a   : > { %1493 = vmatmul.bf16.vlgmr.msrb.gmra.mxu0 %v1351_v25  ;;  %1506 = vmatmul.bf16.vlgmr.msrb.gmra.mxu1 %v1352_v26 }
 0x79b   : > { %v1334_v27 = vpop.f32.mrf.mxu2  ;;  %v1347_v28 = vpop.f32.mrf.mxu3 }
 0x817   : > { %v1494_v30 = vpop.f32.mrf.mxu0  ;;  %v1507_v31 = vpop.f32.mrf.mxu1 }
 0x818   : > { %v1495_v32 = vadd.f32 %v2091_v29, %v1494_v30 }
 0x81a   : > { %v1508_v33 = vadd.f32 %v1507_v31, %v1495_v32 }
 0x81c   : > { %v1511_v34 = vadd.f32 %v1508_v33, %v1219_v11 }
 0x81e   : > { %1514 = vadd.xlane.f32.xlu2 %v1511_v34 }
 0x81f   : > { %v1496_v35 = vpop.f32.mrf.mxu0  ;;  %v1509_v36 = vpop.f32.mrf.mxu1 }
 0x891   : > { %v1515_v37 = vpop.xlane.xlu2 %1514 }
 0x892   : > { %v1516_v38 = vmul.f32 %v1515_v37, %v2591_v0 }
 0x894   : > { %v1517_v39 = vsub.f32 %v1511_v34, %v1516_v38 }
 0x896   : > { %v1518_v40 = vmul.f32 %v1517_v39, %v1517_v39 }
 0x898   : > { %1519 = vadd.xlane.f32.xlu2 %v1518_v40 }
 0x90b   : > { %v1520_v41 = vpop.xlane.xlu2 %1519 }
 0x90c   : > { %v1521_v42 = vmul.f32 %v1520_v41, %v2591_v0  ;;  %v2093_v0 = vld [vmem:[%s2756_s7] ss:$0 sm:$0xff] }
 0x90e   : > { %v1522_v43 = vadd.f32 1e-05, %v1521_v42 }
 0x910   : > { %2102 = vrsqrt.f32 %v1522_v43  ;;  %vm1529_vm10 = vweird.f32 %v1522_v43 }
 0x916   : > { %v2103_v44 = vpop.eup %2102 }
 0x917   : > { %v1524_v45 = vmul.f32 %v2103_v44, %v1522_v43  ;;  %vm1530_vm9 = vweird.f32 %v2103_v44 }
 0x918   : > { %vm1531_vm11 = vmor %vm1529_vm10, %vm1530_vm9 }
 0x919   : > { %v1525_v46 = vmul.f32 %v2103_v44, %v1524_v45 }
 0x91b   : > { %v1526_v47 = vmul.f32 0.5, %v1525_v46 }
 0x91d   : > { %v1527_v48 = vsub.f32 1.5, %v1526_v47 }
 0x91f   : > { %v1528_v49 = vmul.f32 %v2103_v44, %v1527_v48 }
 0x921   : > { %v1532_v51 = vsel %vm1531_vm11, %v2103_v44, %v1528_v49 }
 0x922   : > { %v1533_v52 = vmul.f32 %v1532_v51, %v1517_v39 }
 0x924   : > { %v1537_v53 = vmul.f32 %v2092_v50, %v1533_v52 }
 0x926   : > { %v1541_v54 = vadd.f32 %v2093_v0, %v1537_v53 }
 0x928   : > { %v1542_v55 = vpack.c.bf16 %v1541_v54, %v1541_v54 }
 0x92a   : > { %1543 = vst [vmem:[%s641_s20] sm:$0xf] %v1542_v55 }
 0x92b PF: > { %s2757_s29 = sld [smem:[#allocation17_spill]] }
 0x92c   : > { %s2758_s28 = sld [smem:[#allocation16_spill]] }
 0x931   : > { %s37_s0 = sadd.s32 1, %s2757_s29   ;;  %s2759_s29 = smov %s2761_s24 }
 0x932   : > { %p34_p9 = scmp.ge.s32.totalorder %s37_s0, 4  }
 0x934   :  { %36 = sbr.rel (!%p34_p9) target bundleno = 21 (0x15), region = 147 }
 0x939   :  { %1569 = vsyncpa [#allocation9], 1 }
 0x93a   :  { %1571 = vsyncpa [#allocation9 + $0x1], 1 }
 0x93b   :  { %1572 = vsyncpa [#allocation11], 1 }

// kernel: decoder_forward.7
= control target key start
LH: loop header
LB: loop body
LE: loop exit
PB: predicated region body
PF: predicated region fallthrough
CT: control target
= control target key end

     0   :  { %s2382_s27 = smov [#allocation7]   ;;  %s2686_s0 = inlined_call_operand.vmem [shape: s32[2], index: 0, kind: input, shape index: {}]   ;;  %s2687_s1 = inlined_call_operand.vmem [shape: bf16[2,8,128], index: 1, kind: input, shape index: {}]   ;;  %s2688_s2 = inlined_call_operand.vmem [shape: bf16[2,8,128], index: 2, kind: input, shape index: {}]   ;;  %s2689_s3 = inlined_call_operand.hbm [shape: bf16[128,128], index: 3, kind: input, shape index: {}]   ;;  %s2690_s4 = inlined_call_operand.vmem [shape: f32[1,128], index: 4, kind: input, shape index: {}]   ;;  %s2691_s5 = inlined_call_operand.hbm [shape: bf16[128,256], index: 5, kind: input, shape index: {}]   ;;  %s2692_s6 = inlined_call_operand.vmem [shape: f32[1,256], index: 6, kind: input, shape index: {}]   ;;  %s2693_s7 = inlined_call_operand.hbm [shape: bf16[128,128], index: 7, kind: input, shape index: {}]   ;;  %s2694_s8 = inlined_call_operand.vmem [shape: f32[1,128], index: 8, kind: input, shape index: {}]   ;;  %s2695_s9 = inlined_call_operand.vmem [shape: f32[1,128], index: 9, kind: input, shape index: {}]   ;;  %s2696_s10 = inlined_call_operand.vmem [shape: f32[1,128], index: 10, kind: input, shape index: {}]   ;;  %s2697_s11 = inlined_call_operand.hbm [shape: bf16[128,256], index: 11, kind: input, shape index: {}]   ;;  %s2698_s12 = inlined_call_operand.vmem [shape: f32[1,256], index: 12, kind: input, shape index: {}]   ;;  %s2699_s13 = inlined_call_operand.hbm [shape: bf16[256,128], index: 13, kind: input, shape index: {}]   ;;  %s2700_s14 = inlined_call_operand.vmem [shape: f32[1,128], index: 14, kind: input, shape index: {}]   ;;  %s2701_s15 = inlined_call_operand.vmem [shape: f32[1,128], index: 15, kind: input, shape index: {}]   ;;  %s2702_s16 = inlined_call_operand.vmem [shape: f32[1,128], index: 16, kind: input, shape index: {}]   ;;  %s2703_s17 = inlined_call_operand.vmem [shape: bf16[2,8,128], index: 17, kind: output, shape index: {}]  }
   0x1   :  { %2705 = sst [smem:[#allocation21_spill]] %s2686_s0 }
   0x2   :  { %2706 = sst [smem:[#allocation22_spill]] %s2687_s1 }
   0x3   :  { %2707 = sst [smem:[#allocation23_spill]] %s2689_s3 }
   0x4   :  { %2708 = sst [smem:[#allocation24_spill]] %s2691_s5 }
   0x5   :  { %2709 = sst [smem:[#allocation25_spill]] %s2696_s10 }
   0x6   :  { %2710 = sst [smem:[#allocation26_spill]] %s2697_s11 }
   0x7   :  { %2711 = sst [smem:[#allocation27_spill]] %s2702_s16 }
   0x8   :  { %s2712_s26 = sld [smem:[#allocation21_spill]] }
   0xe   :  { %s23_s10 = sshll.u32 %s2712_s26, 4  ;;  %s24_s10 = int_to_ptr.vmem [resolvable:$true] %s23_s10 }
   0xf   :  { %26 = dma.vmem_to_smem %s24_s10, 16, %s2382_s27, [#allocation6] }
  0x10   :  { %2356 = dma.done.wait [#allocation6], 16 }
  0x11   :  { %2357 = vsyncadd [#allocation6], 4294967280 }
  0x12   :  { %29 = sfence }
  0x13   :  { %30 = vsyncpa [#allocation9], 0 }
  0x14   :  { %31 = vsyncpa [#allocation11], 0 }
  0x15   :  { %32 = vsyncpa [#allocation14], 0  ;;  %s2491_s28 = smov 0   ;;  %s2493_s29 = smov 0  }
  0x16   :  { %s2495_s0 = smov 0  }
  0x17 LB: > { %2713 = sst [smem:[#allocation20_spill]] %s2380_s0  ;;  %s1720_s19 = sadd.s32 4294967295, %s2380_s0   ;;  %s2380_s0 = sphi %s2495_s0, %s38_s0   ;;  %s2376_s29 = sphi %s2493_s29, %s2727_s29   ;;  %s2372_s28 = sphi %s2491_s28, %s2726_s28  }
  0x18   : > { %s2714_s5 = sld [smem:[#allocation24_spill]]  ;;  %p1722_p0 = scmp.ge.s32.totalorder %s2380_s0, 1 }
  0x19   : > { %p440_p1 = scmp.lt.s32.totalorder %s2380_s0, 3  ;;  %p2512_p2 = scmp.eq.s32.totalorder %s1720_s19, 0 }
  0x1a   : > { %s2383_s21 = smov [#allocation10]   ;;  %s2717_s11 = sld [smem:[#allocation26_spill]] }
  0x1b   : > { %p2516_p3 = pnand %p1722_p0, %p440_p1  ;;  %s470_s22 = sshll.u32 %s2383_s21, 4  ;;  %s471_s22 = int_to_ptr.vmem [resolvable:$true] %s470_s22 }
  0x1c   : > { %s2384_s27 = smov [#allocation13]   ;;  %s2385_s30 = smov 128  }
  0x1d   : > { %p2088_p4 = pneg %p2516_p3  ;;  %s510_s10 = sshll.u32 %s2384_s27, 4  ;;  %s511_s10 = int_to_ptr.vmem [resolvable:$true] %s510_s10 }
  0x1e   : > { %s468_s18 = sshll.u32 %s2714_s5, 4  ;;  %s2386_s19 = smov 8   ;;  %s469_s18 = int_to_ptr.hbm [resolvable:$true] %s468_s18 }
  0x1f   : > { %p2527_p5 = pnand %p2512_p2, %p2088_p4  ;;  %s2719_s3 = sld [smem:[#allocation23_spill]] }
  0x20   : > { %s508_s25 = sshll.u32 %s2717_s11, 4  ;;  %s57_s5 = sadd.s32 1, %s2376_s29  ;;  %s509_s25 = int_to_ptr.hbm [resolvable:$true] %s508_s25 }
  0x21   : > { %2094 = dma.hbm_to_vmem [thread:$0]  (!%p2527_p5), %s469_s18, 2048, %s471_s22, [#allocation11], %s2385_s30, %s2385_s30, %s2386_s19  }
  0x22   : > { %2100 = dma.hbm_to_vmem [thread:$0]  (!%p2527_p5), %s509_s25, 2048, %s511_s10, [#allocation14], %s2385_s30, %s2385_s30, %s2386_s19  }
  0x23   : > { %p59_p6 = scmp.ge.s32.totalorder %s57_s5, 2  ;;  %s2387_s11 = smov [#allocation8]  }
  0x24   : > { %s453_s0 = sshll.u32 %s2387_s11, 4  ;;  %s2388_s27 = smov 64   ;;  %s454_s0 = int_to_ptr.vmem [resolvable:$true] %s453_s0 }
  0x25   : > { %s451_s24 = sshll.u32 %s2719_s3, 4  ;;  %s2729_s5 = smov (%p59_p6, %s57_s5), 0  ;;  %s452_s24 = int_to_ptr.hbm [resolvable:$true] %s451_s24 }
  0x26   : > { %s2389_s16 = smov 4   ;;  %s485_s25 = sshll.u32 %s2693_s7, 4  ;;  %s486_s25 = int_to_ptr.hbm [resolvable:$true] %s485_s25 }
  0x27   : > { %2091 = dma.hbm_to_vmem [thread:$0]  (!%p2527_p5), %s452_s24, 1024, %s454_s0, [#allocation9], %s2388_s27, %s2388_s27, %s2389_s16  }
  0x28   : > { %s2390_s10 = smov [#allocation12]   ;;  %s525_s11 = sshll.u32 %s2699_s13, 4  ;;  %s526_s11 = int_to_ptr.hbm [resolvable:$true] %s525_s11 }
  0x29   : > { %s487_s30 = sshll.u32 %s2390_s10, 4  ;;  %s2391_s23 = smov [#allocation15]   ;;  %s488_s30 = int_to_ptr.vmem [resolvable:$true] %s487_s30 }
  0x2a   : > { %2097 = dma.hbm_to_vmem [thread:$0]  (!%p2527_p5), %s486_s25, 1024, %s488_s30, [#allocation11], %s2388_s27, %s2388_s27, %s2389_s16  }
  0x2b   : > { %s527_s3 = sshll.u32 %s2391_s23, 4  ;;  %572 = sbr.rel (%p2516_p3) target bundleno = 2358 (0x936), region = 84  ;;  %s528_s3 = int_to_ptr.vmem [resolvable:$true] %s527_s3 }
  0x2c   : > { %2103 = dma.hbm_to_vmem [thread:$0]  (!%p2527_p5), %s526_s11, 2048, %s528_s3, [#allocation14], %s2388_s27, %s2388_s27, %s2389_s16  }
  0x30   : > { %2359 = dma.done.wait (%p2512_p2), [#allocation9], 1024  }
  0x31   : > { %2361 = vsyncadd (%p2512_p2), [#allocation9], 4294966272 }
  0x32   : > { %2363 = dma.done.wait (%p2512_p2), [#allocation11], 3072  }
  0x33   : > { %2365 = vsyncadd (%p2512_p2), [#allocation11], 4294964224 }
  0x34   : > { %2367 = dma.done.wait (%p2512_p2), [#allocation14], 4096  }
  0x35   : > { %2369 = vsyncadd (%p2512_p2), [#allocation14], 4294963200  ;;  %vm765_vm0 = vcmask 7168   ;;  %v2392_v0 = vmov -inf   ;;  %s2569_s3 = sld [smem:[#allocation7 + %s2372_s28]]  ;;  %p654_p7 = scmp.lt.s32.totalorder %s2372_s28, 1 }
  0x36   : > { %766 = vst.msk [vmem:[#allocation3] sm:$0xff] %vm765_vm0, %v2392_v0  ;;  %vm770_vm1 = vcmask 523264   ;;  %v2393_v1 = vmov 0.0   ;;  %v2011_v2 = vld [vmem:[#allocation8 + $0x38] sm:$0xff]  ;;  %v2010_v3 = vld [vmem:[#allocation8 + $0x30] sm:$0xff]  ;;  %v2009_v4 = vld [vmem:[#allocation8 + $0x28] sm:$0xff] }
  0x37   : > { %767 = vst.msk [vmem:[#allocation3 + $0x8] sm:$0xff] %vm765_vm0, %v2392_v0  ;;  %s2731_s28 = smov (!%p654_p7, %s2372_s28), 1  ;;  %749 = vmatpush.bf16.msra.mxu0 %v2011_v2  ;;  %v2008_v5 = vld [vmem:[#allocation8 + $0x20] sm:$0xff]  ;;  %v2007_v6 = vld [vmem:[#allocation8 + $0x18] sm:$0xff]  ;;  %v2006_v7 = vld [vmem:[#allocation8 + $0x10] sm:$0xff]  ;;  %s2720_s22 = sld [smem:[#allocation22_spill]] }
  0x38   : > { %768 = vst.msk [vmem:[#allocation4] sm:$0xff] %vm765_vm0, %v2393_v1  ;;  %s2577_s16 = sshll.u32 %s2731_s28, 2  ;;  %v2005_v8 = vld [vmem:[#allocation8 + $0x8] sm:$0xff]  ;;  %v2004_v9 = vld [vmem:[#allocation8] sm:$0xff] }
  0x39   : > { %769 = vst.msk [vmem:[#allocation4 + $0x8] sm:$0xff] %vm765_vm0, %v2393_v1  ;;  %s667_s20 = scalar_lea.vmem %s2688_s2, %s2577_s16  ;;  %s674_s27 = scalar_lea.vmem %s2703_s17, %s2577_s16  ;;  %v2154_v11 = vld [vmem:[%s2690_s4] ss:$0 sm:$0xff] }
  0x3a   : > { %771 = vst.msk [vmem:[#allocation5] sm:$0xff] %vm770_vm1, %v2393_v1 }
  0x3b   : > { %772 = vst.msk [vmem:[#allocation5 + $0x8] sm:$0xff] %vm770_vm1, %v2393_v1  ;;  %750 = vmatpush.bf16.msra.mxu0 %v2010_v3  ;;  %p1771_p8 = scmp.le.s32.totalorder %s2569_s3, 0 }
  0x3c   : > { %s2394_s0 = smov (!%p1771_p8), 64  }
  0x3d   : > { %s2592_s25 = scalar_lea.vmem %s2720_s22, %s2577_s16 }
  0x3e   : > { %v680_v10 = vld [vmem:[%s2592_s25] sm:$0xf] }
  0x3f   : > { %751 = vmatpush.bf16.msra.mxu0 %v2009_v4 }
  0x43   : > { %752 = vmatpush.bf16.msra.mxu0 %v2008_v5 }
  0x47   : > { %753 = vmatpush.bf16.msra.mxu0 %v2007_v6 }
  0x4b   : > { %754 = vmatpush.bf16.msra.mxu0 %v2006_v7 }
  0x4f   : > { %755 = vmatpush.bf16.msra.mxu0 %v2005_v8 }
  0x53   : > { %756 = vmatpush.bf16.msra.mxu0 %v2004_v9 }
  0x56   : > { %757 = vmatmul.bf16.vlgmr.msra.gmra.mxu0 %v680_v10 }
  0xd3   : > { %v758_v12 = vpop.f32.mrf.mxu0 }
  0xd4   : > { %v759_v13 = vadd.f32 %v2154_v11, %v758_v12 }
  0xd6   : > { %v762_v14 = vmul.f32 0.125, %v759_v13 }
  0xd7   : > { %778 = sbr.rel (%p1771_p8) target bundleno = 1284 (0x504), region = 112 }
  0xd8   : > { %v763_v15 = vpack.c.bf16 %v762_v14, %v762_v14 }
  0xda   : > { %764 = vst [vmem:[#allocation2] sm:$0xf] %v763_v15 }
  0xdb   : > { %v760_v16 = vpop.f32.mrf.mxu0 }
  0xdc   : > { %v1830_v17 = vld [vmem:[#allocation10 + $0x70] sm:$0xf]  ;;  %v2027_v18 = vld [vmem:[#allocation10 + $0x74] sm:$0xf0]  ;;  %v1822_v19 = vld [vmem:[#allocation10 + $0x60] sm:$0xf] }
  0xdd   : > { %v1831_v20 = vor.u32 %v2027_v18, %v1830_v17  ;;  %v2025_v21 = vld [vmem:[#allocation10 + $0x64] sm:$0xf0]  ;;  %v1814_v23 = vld [vmem:[#allocation10 + $0x50] sm:$0xf]  ;;  %v2023_v24 = vld [vmem:[#allocation10 + $0x54] sm:$0xf0] }
  0xde   : > { %v1823_v22 = vor.u32 %v2025_v21, %v1822_v19  ;;  %v2026_v25 = vld [vmem:[#allocation10 + $0x74] sm:$0xf]  ;;  %v1832_v26 = vld [vmem:[#allocation10 + $0x78] sm:$0xf0]  ;;  %v2024_v27 = vld [vmem:[#allocation10 + $0x64] sm:$0xf]  ;;  %v1815_v29 = vor.u32 %v2023_v24, %v1814_v23 }
  0xdf   : > { %882 = vmatpush.bf16.msra.mxu0 %v1831_v20  ;;  %v1824_v28 = vld [vmem:[#allocation10 + $0x68] sm:$0xf0]  ;;  %v1835_v30 = vor.u32 %v2026_v25, %v1832_v26  ;;  %v1806_v31 = vld [vmem:[#allocation10 + $0x40] sm:$0xf]  ;;  %v2021_v32 = vld [vmem:[#allocation10 + $0x44] sm:$0xf0]  ;;  %v910_v20 = vlaneseq }
  0xe0   : > { %v1827_v33 = vor.u32 %v2024_v27, %v1824_v28  ;;  %v2022_v34 = vld [vmem:[#allocation10 + $0x54] sm:$0xf]  ;;  %v1816_v35 = vld [vmem:[#allocation10 + $0x58] sm:$0xf0]  ;;  %v1807_v36 = vor.u32 %v2021_v32, %v1806_v31  ;;  %v1798_v37 = vld [vmem:[#allocation10 + $0x30] sm:$0xf] }
  0xe1   : > { %895 = vmatpush.bf16.msra.mxu1 %v1835_v30  ;;  %v2019_v38 = vld [vmem:[#allocation10 + $0x34] sm:$0xf0]  ;;  %v1819_v39 = vor.u32 %v2022_v34, %v1816_v35  ;;  %v2020_v40 = vld [vmem:[#allocation10 + $0x44] sm:$0xf]  ;;  %v1808_v41 = vld [vmem:[#allocation10 + $0x48] sm:$0xf0] }
  0xe2   : > { %v1799_v42 = vor.u32 %v2019_v38, %v1798_v37  ;;  %v1790_v43 = vld [vmem:[#allocation10 + $0x20] sm:$0xf]  ;;  %v2017_v44 = vld [vmem:[#allocation10 + $0x24] sm:$0xf0]  ;;  %v1811_v45 = vor.u32 %v2020_v40, %v1808_v41  ;;  %v2018_v46 = vld [vmem:[#allocation10 + $0x34] sm:$0xf] }
  0xe3   : > { %883 = vmatpush.bf16.msra.mxu0 %v1823_v22  ;;  %v1800_v47 = vld [vmem:[#allocation10 + $0x38] sm:$0xf0]  ;;  %v1791_v48 = vor.u32 %v2017_v44, %v1790_v43  ;;  %v1782_v49 = vld [vmem:[#allocation10 + $0x10] sm:$0xf]  ;;  %v2015_v50 = vld [vmem:[#allocation10 + $0x14] sm:$0xf0]  ;;  %v914_v22 = vstv %s2569_s3 }
  0xe4   : > { %v1803_v51 = vor.u32 %v2018_v46, %v1800_v47  ;;  %v2016_v52 = vld [vmem:[#allocation10 + $0x24] sm:$0xf]  ;;  %v1792_v53 = vld [vmem:[#allocation10 + $0x28] sm:$0xf0]  ;;  %v1783_v54 = vor.u32 %v2015_v50, %v1782_v49  ;;  %v1774_v55 = vld [vmem:[#allocation10] sm:$0xf] }
  0xe5   : > { %896 = vmatpush.bf16.msra.mxu1 %v1827_v33  ;;  %v2013_v56 = vld [vmem:[#allocation10 + $0x4] sm:$0xf0]  ;;  %v1795_v57 = vor.u32 %v2016_v52, %v1792_v53  ;;  %v2014_v58 = vld [vmem:[#allocation10 + $0x14] sm:$0xf]  ;;  %v1784_v59 = vld [vmem:[#allocation10 + $0x18] sm:$0xf0] }
  0xe6   : > { %v1775_v60 = vor.u32 %v2013_v56, %v1774_v55  ;;  %v1787_v61 = vor.u32 %v2014_v58, %v1784_v59  ;;  %v2012_v62 = vld [vmem:[#allocation10 + $0x4] sm:$0xf]  ;;  %v1776_v63 = vld [vmem:[#allocation10 + $0x8] sm:$0xf0]  ;;  %vm974_vm2 = vcmask 1043456   ;;  %v911_v21 = vand.u32 127, %v910_v20 }
  0xe7   : > { %884 = vmatpush.bf16.msra.mxu0 %v1815_v29  ;;  %v779_v0 = vld [vmem:[%s667_s20] sm:$0xf]  ;;  %v1779_v1 = vor.u32 %v2012_v62, %v1776_v63  ;;  %vm939_vm4 = vcmask 64512   ;;  %v2395_v28 = vmov 0   ;;  %v938_v34 = vld [vmem:[#allocation3] sm:$0xff]  ;;  %v955_v49 = vld [vmem:[#allocation4] sm:$0xff] }
  0xe8   : > { %v796_v2 = vld [vmem:[%s2692_s6] sm:$0x3]  ;;  %vm2613_vm3 = vcmp.ge.s32.totalorder %v911_v21, %v914_v22  ;;  %2155 = vset.pattern.permute.xlu0 %v2395_v28  ;;  %2156 = vset.pattern.permute.xlu2 %v2395_v28  ;;  %v1026_v59 = vld [vmem:[#allocation3 + $0x8] sm:$0xff] }
  0xe9   : > { %897 = vmatpush.bf16.msra.mxu1 %v1819_v39  ;;  %v798_v3 = vperm.slane %v796_v2, 0  ;;  %v916_v12 = vld [vmem:[#allocation2] sm:$0xf]  ;;  %v799_v14 = vperm.slane %v796_v2, 1 }
  0xea   : > { %v994_v29 = vld [vmem:[#allocation2] sm:$0xf] }
  0xeb   : > { %885 = vmatpush.bf16.msra.mxu0 %v1807_v36  ;;  %v996_v30 = vunpack.c.l.b16 %v994_v29 }
  0xed   : > { %898 = vmatpush.bf16.msra.mxu1 %v1811_v45  ;;  %v997_v31 = vpack.c.b16 %v996_v30, %v996_v30 }
  0xef   : > { %886 = vmatpush.bf16.msra.mxu0 %v1799_v42 }
  0xf1   : > { %899 = vmatpush.bf16.msra.mxu1 %v1803_v51 }
  0xf3   : > { %887 = vmatpush.bf16.msra.mxu0 %v1791_v48 }
  0xf5   : > { %900 = vmatpush.bf16.msra.mxu1 %v1795_v57 }
  0xf7   : > { %888 = vmatpush.bf16.msra.mxu0 %v1783_v54 }
  0xf9   : > { %901 = vmatpush.bf16.msra.mxu1 %v1787_v61 }
  0xfb   : > { %889 = vmatpush.bf16.msra.mxu0 %v1775_v60 }
  0xfd   : > { %902 = vmatpush.bf16.msra.mxu1 %v1779_v1 }
  0xfe   : > { %890 = vmatmul.bf16.vlgmr.msra.gmra.mxu0 %v779_v0 }
 0x100   : > { %903 = vmatmul.bf16.vlgmr.msra.gmra.mxu1 %v779_v0 }
 0x17b   : > { %v891_v4 = vpop.f32.mrf.mxu0 }
 0x17c   : > { %v892_v5 = vadd.f32 %v891_v4, %v798_v3  ;;  %v963_v4 = vld [vmem:[#allocation5] sm:$0xff] }
 0x17d   : > { %v904_v9 = vpop.f32.mrf.mxu1 }
 0x17e   : > { %v908_v6 = vpack.c.bf16 %v892_v5, %v892_v5  ;;  %v905_v15 = vadd.f32 %v904_v9, %v799_v14 }
 0x180   : > { %v922_v7 = vsel %vm770_vm1, %v908_v6, 0  ;;  %v1001_v8 = vunpack.c.l.b16 %v908_v6  ;;  %v909_v16 = vpack.c.bf16 %v905_v15, %v905_v15  ;;  %v1051_v15 = vld [vmem:[#allocation5 + $0x8] sm:$0xff] }
 0x181   : > { %931 = vmatpush.bf16.xpose.msra.mxu2 %v922_v7 }
 0x182   : > { %v1002_v10 = vpack.c.b16 %v1001_v8, %v1001_v8  ;;  %v976_v17 = vsel %vm974_vm2, %v909_v16, 0  ;;  %v1060_v32 = vunpack.c.l.b16 %v909_v16 }
 0x183   : > { %v893_v11 = vpop.f32.mrf.mxu0  ;;  %985 = vmatpush.bf16.msra.mxu3 %v976_v17 }
 0x184   : > { %1003 = vrot.lane.b32.xlu1 %v1002_v10, %s2394_s0  ;;  %v1061_v33 = vpack.c.b16 %v1060_v32, %v1060_v32  ;;  %v1043_v11 = vld [vmem:[#allocation4 + $0x8] sm:$0xff] }
 0x185   : > { %v906_v13 = vpop.f32.mrf.mxu1 }
 0x188   : > { %1836 = vmatmul.msk.bf16.vlgmr.msra.gmra.mxu2 %vm770_vm1, %v916_v12 }
 0x18c   : > { %998 = vrot.lane.b32.xlu1 %v997_v31, %s2394_s0 }
 0x194   : > { %1062 = vrot.lane.b32.xlu1 %v1061_v33, %s2394_s0 }
 0x1f6   : > { %v1004_v18 = vpop.permute.xlu1 %1003 }
 0x1f7   : > { %v1009_v19 = vsel %vm770_vm1, %v1004_v18, 0 }
 0x1f8   : > { %1018 = vmatpush.bf16.xpose.msrb.mxu3 %v1009_v19 }
 0x1fe   : > { %v999_v44 = vpop.permute.xlu1 %998 }
 0x206   : > { %v1063_v45 = vpop.permute.xlu1 %1062 }
 0x207   : > { %v1068_v46 = vsel %vm974_vm2, %v1063_v45, 0 }
 0x208   : > { %1077 = vmatpush.bf16.msrb.mxu2 %v1068_v46 }
 0x20b   : > { %v933_v24 = vpop.f32.mrf.mxu2 }
 0x20c   : > { %v937_v25 = vsel %vm2613_vm3, -1e+09, %v933_v24 }
 0x20d   : > { %v940_v26 = vsel %vm939_vm4, %v937_v25, -inf }
 0x20e   : > { %941 = vmax.xlane.f32.xlu0 %v940_v26 }
 0x213   : > { %v935_v27 = vpop.f32.mrf.mxu2 }
 0x281   : > { %v942_v35 = vpop.xlane.xlu0 %941 }
 0x282   : > { %v943_v36 = vmax.f32 %v938_v34, %v942_v35 }
 0x284   : > { %v944_v37 = vsub.f32 %v938_v34, %v943_v36  ;;  %993 = vst.msk [vmem:[#allocation3] sm:$0xff] %vm765_vm0, %v943_v36  ;;  %949 = vperm.xlu0 %2155, %v943_v36  }
 0x286   : > { %v945_v47 = vmul.f32 1.442695, %v944_v37 }
 0x2f6   : > { %v950_v38 = vpop.permute.xlu0 %949 }
 0x2f7   : > { %v952_v39 = vsub.f32 %v937_v25, %v950_v38 }
 0x2f9   : > { %v953_v40 = vmul.f32 1.442695, %v952_v39 }
 0x2fb   : > { %2157 = vpow2.f32 %v953_v40 }
 0x2fc   : > { %2159 = vpow2.f32 %v945_v47 }
 0x301   : > { %v2158_v41 = vpop.eup %2157 }
 0x302   : > { %v957_v42 = vsel %vm939_vm4, %v2158_v41, 0.0  ;;  %v970_v43 = vpack.c.bf16 %v2158_v41, %v2158_v41  ;;  %v2160_v48 = vpop.eup %2159 }
 0x303   : > { %958 = vadd.xlane.f32.xlu1 %v957_v42  ;;  %v956_v50 = vmul.f32 %v2160_v48, %v955_v49 }
 0x304   : > { %1837 = vmatmul.msk.bf16.vlgmr.msra.gmra.mxu3 %vm939_vm4, %v970_v43 }
 0x314   : > { %1838 = vmatmul.msk.bf16.vlgmr.msrb.gmra.mxu3 %vm770_vm1, %v999_v44 }
 0x376   : > { %v959_v51 = vpop.xlane.xlu1 %958 }
 0x377   : > { %v960_v52 = vadd.f32 %v959_v51, %v956_v50 }
 0x379   : > { %962 = vst.msk [vmem:[#allocation4] sm:$0xff] %vm765_vm0, %v960_v52 }
 0x387   : > { %v987_v53 = vpop.f32.mrf.mxu3 }
 0x38f   : > { %v989_v54 = vpop.f32.mrf.mxu3 }
 0x397   : > { %v1020_v55 = vpop.f32.mrf.mxu3 }
 0x398   : > { %v1024_v56 = vsel %vm2613_vm3, -1e+09, %v1020_v55 }
 0x399   : > { %v1027_v57 = vsel %vm939_vm4, %v1024_v56, -inf }
 0x39a   : > { %1028 = vmax.xlane.f32.xlu2 %v1027_v57 }
 0x39f   : > { %v1022_v58 = vpop.f32.mrf.mxu3 }
 0x40d   : > { %v1029_v60 = vpop.xlane.xlu2 %1028 }
 0x40e   : > { %v1030_v61 = vmax.f32 %v1026_v59, %v1029_v60 }
 0x410   : > { %1085 = vst.msk [vmem:[#allocation3 + $0x8] sm:$0xff] %vm765_vm0, %v1030_v61  ;;  %1036 = vperm.xlu2 %2156, %v1030_v61   ;;  %v1031_v62 = vsub.f32 %v1026_v59, %v1030_v61 }
 0x412   : > { %v1032_v63 = vmul.f32 1.442695, %v1031_v62 }
 0x414   : > { %2161 = vpow2.f32 %v1032_v63 }
 0x418   : > { %966 = vperm.xlu2 %2156, %v2160_v48  }
 0x41a   : > { %v2162_v0 = vpop.eup %2161 }
 0x41b   : > { %v1044_v12 = vmul.f32 %v2162_v0, %v1043_v11 }
 0x420   : > { %1054 = vperm.xlu2 %2156, %v2162_v0  }
 0x46a   : > { %v1037_v1 = vpop.permute.xlu2 %1036 }
 0x46b   : > { %v1039_v2 = vsub.f32 %v1024_v56, %v1037_v1 }
 0x46d   : > { %v1040_v3 = vmul.f32 1.442695, %v1039_v2 }
 0x46f   : > { %2163 = vpow2.f32 %v1040_v3 }
 0x472   : > { %v967_v5 = vpop.permute.xlu2 %966 }
 0x473   : > { %v969_v6 = vmul.f32 %v967_v5, %v963_v4 }
 0x475   : > { %v2164_v7 = vpop.eup %2163  ;;  %v991_v8 = vadd.f32 %v987_v53, %v969_v6 }
 0x476   : > { %v1045_v9 = vsel %vm939_vm4, %v2164_v7, 0.0  ;;  %v1058_v10 = vpack.c.bf16 %v2164_v7, %v2164_v7 }
 0x477   : > { %992 = vst.msk [vmem:[#allocation5] sm:$0xff] %vm770_vm1, %v991_v8  ;;  %1046 = vadd.xlane.f32.xlu0 %v1045_v9 }
 0x478   : > { %1839 = vmatmul.msk.bf16.vlgmr.msrb.gmra.mxu2 %vm939_vm4, %v1058_v10 }
 0x47a   : > { %v1055_v16 = vpop.permute.xlu2 %1054 }
 0x47b   : > { %v1057_v17 = vmul.f32 %v1055_v16, %v1051_v15 }
 0x4ea   : > { %v1047_v13 = vpop.xlane.xlu0 %1046 }
 0x4eb   : > { %v1048_v14 = vadd.f32 %v1047_v13, %v1044_v12 }
 0x4ed   : > { %1049 = vst.msk [vmem:[#allocation4 + $0x8] sm:$0xff] %vm765_vm0, %v1048_v14 }
 0x4fb   : > { %v1079_v18 = vpop.f32.mrf.mxu2 }
 0x4fc   : > { %v1083_v19 = vadd.f32 %v1079_v18, %v1057_v17 }
 0x4fe   : > { %1084 = vst.msk [vmem:[#allocation5 + $0x8] sm:$0xff] %vm770_vm1, %v1083_v19 }
 0x503   : > { %v1081_v20 = vpop.f32.mrf.mxu2 }
 0x504 PF: > { %v1089_v21 = vld [vmem:[#allocation4] sm:$0xff]  ;;  %v2031_v22 = vld [vmem:[#allocation12 + $0x18] sm:$0xff]  ;;  %v2396_v23 = vmov 0   ;;  %v2030_v25 = vld [vmem:[#allocation12 + $0x10] sm:$0xff]  ;;  %v2397_v52 = vmov 128.0   ;;  %s2723_s18 = sld [smem:[#allocation25_spill]] }
 0x505   : > { %2165 = vset.pattern.permute.xlu0 %v2396_v23  ;;  %2172 = vrcp.f32 %v1089_v21  ;;  %v2035_v24 = vld [vmem:[#allocation12 + $0x38] sm:$0xff]  ;;  %1199 = vmatpush.bf16.msra.mxu1 %v2031_v22  ;;  %v1108_v26 = vld [vmem:[#allocation4 + $0x8] sm:$0xff]  ;;  %v2034_v30 = vld [vmem:[#allocation12 + $0x30] sm:$0xff]  ;;  %s2724_s0 = sld [smem:[#allocation27_spill]] }
 0x506   : > { %1159 = vmatpush.bf16.msra.mxu0 %v2035_v24  ;;  %v2029_v27 = vld [vmem:[#allocation12 + $0x8] sm:$0xff]  ;;  %2174 = vrcp.f32 %v1108_v26  ;;  %v2028_v31 = vld [vmem:[#allocation12] sm:$0xff]  ;;  %v1091_v34 = vld [vmem:[#allocation5] sm:$0xff] }
 0x507   : > { %v2033_v32 = vld [vmem:[#allocation12 + $0x28] sm:$0xff]  ;;  %v2032_v33 = vld [vmem:[#allocation12 + $0x20] sm:$0xff]  ;;  %v1111_v38 = vld [vmem:[#allocation5 + $0x8] sm:$0xff]  ;;  %2176 = vrcp.f32 %v2397_v52 }
 0x508   : > { %v1213_v43 = vld [vmem:[%s2592_s25] sm:$0xf]  ;;  %v1932_v53 = vld [vmem:[#allocation13 + $0x70] sm:$0xf]  ;;  %v2051_v54 = vld [vmem:[#allocation13 + $0x74] sm:$0xf0] }
 0x509   : > { %1200 = vmatpush.bf16.msra.mxu1 %v2030_v25  ;;  %v2166_v44 = vld [vmem:[%s2694_s8] ss:$0 sm:$0xff]  ;;  %v1214_v48 = vunpack.c.l.bf16 %v1213_v43  ;;  %v2050_v55 = vld [vmem:[#allocation13 + $0x74] sm:$0xf]  ;;  %v1933_v56 = vor.u32 %v2051_v54, %v1932_v53  ;;  %v1934_v57 = vld [vmem:[#allocation13 + $0x78] sm:$0xf0] }
 0x50a   : > { %1160 = vmatpush.bf16.msra.mxu0 %v2034_v30  ;;  %v1937_v58 = vor.u32 %v2050_v55, %v1934_v57  ;;  %v1924_v5 = vld [vmem:[#allocation13 + $0x60] sm:$0xf]  ;;  %v2049_v6 = vld [vmem:[#allocation13 + $0x64] sm:$0xf0]  ;;  %v2048_v7 = vld [vmem:[#allocation13 + $0x64] sm:$0xf] }
 0x50b   : > { %v2173_v28 = vpop.eup %2172  ;;  %1356 = vmatpush.bf16.msra.mxu2 %v1933_v56  ;;  %v1925_v8 = vor.u32 %v2049_v6, %v1924_v5  ;;  %v1926_v9 = vld [vmem:[#allocation13 + $0x68] sm:$0xf0]  ;;  %v1916_v11 = vld [vmem:[#allocation13 + $0x50] sm:$0xf]  ;;  %v2047_v12 = vld [vmem:[#allocation13 + $0x54] sm:$0xf0] }
 0x50c   : > { %1094 = vperm.xlu0 %2165, %v2173_v28   ;;  %v2175_v29 = vpop.eup %2174  ;;  %1369 = vmatpush.bf16.msra.mxu3 %v1937_v58  ;;  %v1929_v10 = vor.u32 %v2048_v7, %v1926_v9  ;;  %v2046_v13 = vld [vmem:[#allocation13 + $0x54] sm:$0xf]  ;;  %v1917_v14 = vor.u32 %v2047_v12, %v1916_v11  ;;  %v1918_v15 = vld [vmem:[#allocation13 + $0x58] sm:$0xf0]  ;;  %v1908_v17 = vld [vmem:[#allocation13 + $0x40] sm:$0xf] }
 0x50d   : > { %1201 = vmatpush.bf16.msra.mxu1 %v2029_v27  ;;  %v2177_v59 = vpop.eup %2176  ;;  %v1921_v16 = vor.u32 %v2046_v13, %v1918_v15  ;;  %v2045_v18 = vld [vmem:[#allocation13 + $0x44] sm:$0xf0]  ;;  %v2044_v19 = vld [vmem:[#allocation13 + $0x44] sm:$0xf]  ;;  %v1910_v21 = vld [vmem:[#allocation13 + $0x48] sm:$0xf0] }
 0x50e   : > { %1161 = vmatpush.bf16.msra.mxu0 %v2033_v32  ;;  %v1221_v60 = vmul.f32 128.0, %v2177_v59  ;;  %vm1225_vm5 = vweird.f32 %v2177_v59  ;;  %v1909_v20 = vor.u32 %v2045_v18, %v1908_v17  ;;  %v1913_v22 = vor.u32 %v2044_v19, %v1910_v21  ;;  %v1900_v23 = vld [vmem:[#allocation13 + $0x30] sm:$0xf]  ;;  %v2043_v24 = vld [vmem:[#allocation13 + $0x34] sm:$0xf0]  ;;  %v2057_v54 = vld [vmem:[#allocation15 + $0x28] sm:$0xff] }
 0x50f   : > { %1357 = vmatpush.bf16.msra.mxu2 %v1925_v8  ;;  %v2042_v25 = vld [vmem:[#allocation13 + $0x34] sm:$0xf]  ;;  %v1901_v26 = vor.u32 %v2043_v24, %v1900_v23  ;;  %v1902_v27 = vld [vmem:[#allocation13 + $0x38] sm:$0xf0]  ;;  %v2041_v30 = vld [vmem:[#allocation13 + $0x24] sm:$0xf0] }
 0x510   : > { %v1222_v61 = vsub.f32 1.0, %v1221_v60  ;;  %1370 = vmatpush.bf16.msra.mxu3 %v1929_v10  ;;  %v1905_v28 = vor.u32 %v2042_v25, %v1902_v27  ;;  %v2036_v43 = vld [vmem:[#allocation13 + $0x4] sm:$0xf]  ;;  %v2066_v52 = vld [vmem:[#allocation15 + $0x70] sm:$0xff]  ;;  %v2065_v55 = vld [vmem:[#allocation15 + $0x68] sm:$0xff] }
 0x511   : > { %1202 = vmatpush.bf16.msra.mxu1 %v2028_v31  ;;  %v2040_v31 = vld [vmem:[#allocation13 + $0x24] sm:$0xf]  ;;  %v2055_v60 = vld [vmem:[#allocation15 + $0x18] sm:$0xff]  ;;  %v2167_v6 = vld [vmem:[%s2695_s9] ss:$0 sm:$0xff] }
 0x512   : > { %1162 = vmatpush.bf16.msra.mxu0 %v2032_v33  ;;  %v1223_v62 = vmul.f32 %v2177_v59, %v1222_v61  ;;  %v1894_v33 = vld [vmem:[#allocation13 + $0x28] sm:$0xf0]  ;;  %v2056_v56 = vld [vmem:[#allocation15 + $0x20] sm:$0xff]  ;;  %v2063_v61 = vld [vmem:[#allocation15 + $0x58] sm:$0xff] }
 0x513   : > { %1358 = vmatpush.bf16.msra.mxu2 %v1917_v14  ;;  %v2064_v57 = vld [vmem:[#allocation15 + $0x60] sm:$0xff]  ;;  %v2168_v9 = vld [vmem:[%s2723_s18] ss:$0 sm:$0xff] }
 0x514   : > { %1114 = vperm.xlu0 %2165, %v2175_v29   ;;  %v1224_v63 = vadd.f32 %v2177_v59, %v1223_v62  ;;  %1371 = vmatpush.bf16.msra.mxu3 %v1921_v16  ;;  %v1892_v29 = vld [vmem:[#allocation13 + $0x20] sm:$0xf]  ;;  %v2053_v13 = vld [vmem:[#allocation15 + $0x8] sm:$0xff] }
 0x515   : > { %v1893_v32 = vor.u32 %v2041_v30, %v1892_v29  ;;  %v2061_v14 = vld [vmem:[#allocation15 + $0x48] sm:$0xff]  ;;  %v2052_v15 = vld [vmem:[#allocation15] sm:$0xff] }
 0x516   : > { %v2643_v0 = vsel %vm1225_vm5, %v2177_v59, %v1224_v63  ;;  %v2060_v16 = vld [vmem:[#allocation15 + $0x40] sm:$0xff]  ;;  %v2169_v29 = vld [vmem:[%s2700_s14] ss:$0 sm:$0xff] }
 0x517   : > { %1359 = vmatpush.bf16.msra.mxu2 %v1909_v20 }
 0x518   : > { %1372 = vmatpush.bf16.msra.mxu3 %v1913_v22 }
 0x51b   : > { %1360 = vmatpush.bf16.msra.mxu2 %v1901_v26 }
 0x51c   : > { %1373 = vmatpush.bf16.msra.mxu3 %v1905_v28 }
 0x51f   : > { %1361 = vmatpush.bf16.msra.mxu2 %v1893_v32 }
 0x57e   : > { %v1095_v35 = vpop.permute.xlu0 %1094 }
 0x57f   : > { %v1097_v36 = vmul.f32 %v1095_v35, %v1091_v34  ;;  %v1897_v34 = vor.u32 %v2040_v31, %v1894_v33  ;;  %v1884_v35 = vld [vmem:[#allocation13 + $0x10] sm:$0xf] }
 0x581   : > { %v1098_v37 = vpack.c.bf16 %v1097_v36, %v1097_v36  ;;  %v2039_v36 = vld [vmem:[#allocation13 + $0x14] sm:$0xf0]  ;;  %1374 = vmatpush.bf16.msra.mxu3 %v1897_v34 }
 0x583   : > { %1873 = vmatmul.msk.bf16.vlgmr.msra.gmra.mxu1 %vm770_vm1, %v1098_v37  ;;  %v2038_v37 = vld [vmem:[#allocation13 + $0x14] sm:$0xf] }
 0x586   : > { %v1115_v39 = vpop.permute.xlu0 %1114 }
 0x587   : > { %v1117_v40 = vmul.f32 %v1115_v39, %v1111_v38  ;;  %v1885_v38 = vor.u32 %v2039_v36, %v1884_v35  ;;  %v1886_v39 = vld [vmem:[#allocation13 + $0x18] sm:$0xf0] }
 0x589   : > { %v1118_v41 = vpack.c.bf16 %v1117_v40, %v1117_v40  ;;  %v1876_v40 = vld [vmem:[#allocation13] sm:$0xf]  ;;  %1362 = vmatpush.bf16.msra.mxu2 %v1885_v38 }
 0x58b   : > { %1856 = vmatmul.msk.bf16.vlgmr.msra.gmra.mxu0 %vm770_vm1, %v1118_v41  ;;  %v2037_v41 = vld [vmem:[#allocation13 + $0x4] sm:$0xf0] }
 0x600   : > { %v1204_v42 = vpop.f32.mrf.mxu1 }
 0x608   : > { %v1164_v45 = vpop.f32.mrf.mxu0  ;;  %v1206_v46 = vpop.f32.mrf.mxu1 }
 0x609   : > { %v1205_v47 = vadd.f32 %v1204_v42, %v1164_v45  ;;  %v1889_v42 = vor.u32 %v2038_v37, %v1886_v39  ;;  %v1877_v45 = vor.u32 %v2037_v41, %v1876_v40 }
 0x60b   : > { %v1212_v49 = vadd.f32 %v2166_v44, %v1205_v47  ;;  %v1878_v44 = vld [vmem:[#allocation13 + $0x8] sm:$0xf0]  ;;  %1375 = vmatpush.bf16.msra.mxu3 %v1889_v42  ;;  %1363 = vmatpush.bf16.msra.mxu2 %v1877_v45  ;;  %v2059_v47 = vld [vmem:[#allocation15 + $0x38] sm:$0xff] }
 0x60c   : > { %v1881_v46 = vor.u32 %v2036_v43, %v1878_v44  ;;  %1518 = vmatpush.bf16.msrb.mxu0 %v2059_v47 }
 0x60d   : > { %v1215_v50 = vadd.f32 %v1214_v48, %v1212_v49  ;;  %v2067_v48 = vld [vmem:[#allocation15 + $0x78] sm:$0xff] }
 0x60e   : > { %1531 = vmatpush.bf16.msrb.mxu1 %v2067_v48 }
 0x60f   : > { %1218 = vadd.xlane.f32.xlu1 %v1215_v50  ;;  %1376 = vmatpush.bf16.msra.mxu3 %v1881_v46 }
 0x610   : > { %v1166_v51 = vpop.f32.mrf.mxu0 }
 0x611   : > { %v2058_v51 = vld [vmem:[#allocation15 + $0x30] sm:$0xff] }
 0x612   : > { %1519 = vmatpush.bf16.msrb.mxu0 %v2058_v51  ;;  %1532 = vmatpush.bf16.msrb.mxu1 %v2066_v52 }
 0x616   : > { %1520 = vmatpush.bf16.msrb.mxu0 %v2057_v54  ;;  %1533 = vmatpush.bf16.msrb.mxu1 %v2065_v55 }
 0x61a   : > { %1521 = vmatpush.bf16.msrb.mxu0 %v2056_v56  ;;  %1534 = vmatpush.bf16.msrb.mxu1 %v2064_v57 }
 0x61e   : > { %1522 = vmatpush.bf16.msrb.mxu0 %v2055_v60  ;;  %1535 = vmatpush.bf16.msrb.mxu1 %v2063_v61 }
 0x682   : > { %v1219_v1 = vpop.xlane.xlu1 %1218 }
 0x683   : > { %v1227_v2 = vmul.f32 %v2643_v0, %v1219_v1  ;;  %v2054_v1 = vld [vmem:[#allocation15 + $0x10] sm:$0xff] }
 0x684   : > { %1523 = vmatpush.bf16.msrb.mxu0 %v2054_v1 }
 0x685   : > { %v2646_v3 = vsub.f32 %v1215_v50, %v1227_v2  ;;  %v2062_v2 = vld [vmem:[#allocation15 + $0x50] sm:$0xff] }
 0x686   : > { %1536 = vmatpush.bf16.msrb.mxu1 %v2062_v2 }
 0x687   : > { %v1229_v4 = vmul.f32 %v2646_v3, %v2646_v3 }
 0x688   : > { %1524 = vmatpush.bf16.msrb.mxu0 %v2053_v13 }
 0x689   : > { %1230 = vadd.xlane.f32.xlu1 %v1229_v4 }
 0x68a   : > { %1537 = vmatpush.bf16.msrb.mxu1 %v2061_v14 }
 0x68c   : > { %1525 = vmatpush.bf16.msrb.mxu0 %v2052_v15 }
 0x68e   : > { %1538 = vmatpush.bf16.msrb.mxu1 %v2060_v16 }
 0x6fc   : > { %v1231_v49 = vpop.xlane.xlu1 %1230 }
 0x6fd   : > { %v1232_v50 = vmul.f32 %v1231_v49, %v2643_v0 }
 0x6ff   : > { %v1233_v53 = vadd.f32 1e-05, %v1232_v50  ;;  %v2170_v50 = vld [vmem:[%s2701_s15] ss:$0 sm:$0xff] }
 0x701   : > { %2178 = vrsqrt.f32 %v1233_v53  ;;  %vm1240_vm7 = vweird.f32 %v1233_v53 }
 0x707   : > { %v2179_v58 = vpop.eup %2178 }
 0x708   : > { %v1235_v59 = vmul.f32 %v2179_v58, %v1233_v53  ;;  %vm1241_vm6 = vweird.f32 %v2179_v58 }
 0x709   : > { %vm1242_vm8 = vmor %vm1240_vm7, %vm1241_vm6 }
 0x70a   : > { %v1236_v62 = vmul.f32 %v2179_v58, %v1235_v59 }
 0x70c   : > { %v1237_v63 = vmul.f32 0.5, %v1236_v62 }
 0x70e   : > { %v1238_v4 = vsub.f32 1.5, %v1237_v63 }
 0x710   : > { %v1239_v5 = vmul.f32 %v2179_v58, %v1238_v4 }
 0x712   : > { %v1243_v7 = vsel %vm1242_vm8, %v2179_v58, %v1239_v5 }
 0x713   : > { %v1244_v8 = vmul.f32 %v1243_v7, %v2646_v3  ;;  %v1270_v3 = vld [vmem:[%s2698_s12] sm:$0x3] }
 0x714   : > { %v1272_v17 = vperm.slane %v1270_v3, 0  ;;  %v1273_v18 = vperm.slane %v1270_v3, 1 }
 0x715   : > { %v1248_v10 = vmul.f32 %v2167_v6, %v1244_v8 }
 0x717   : > { %v1252_v11 = vadd.f32 %v2168_v9, %v1248_v10 }
 0x719   : > { %v1253_v12 = vpack.c.bf16 %v1252_v11, %v1252_v11 }
 0x71b   : > { %1364 = vmatmul.bf16.vlgmr.msra.gmra.mxu2 %v1253_v12  ;;  %1377 = vmatmul.bf16.vlgmr.msra.gmra.mxu3 %v1253_v12 }
 0x79e   : > { %v1365_v19 = vpop.f32.mrf.mxu2  ;;  %v1378_v20 = vpop.f32.mrf.mxu3 }
 0x79f   : > { %v1366_v21 = vadd.f32 %v1365_v19, %v1272_v17  ;;  %v1379_v22 = vadd.f32 %v1378_v20, %v1273_v18 }
 0x7a1   : > { %v1382_v23 = vmax.f32 %v1366_v21, 0.0  ;;  %v1383_v24 = vmax.f32 %v1379_v22, 0.0 }
 0x7a3   : > { %v1384_v25 = vpack.c.bf16 %v1382_v23, %v1382_v23  ;;  %v1385_v26 = vpack.c.bf16 %v1383_v24, %v1383_v24 }
 0x7a5   : > { %1526 = vmatmul.bf16.vlgmr.msrb.gmra.mxu0 %v1384_v25  ;;  %1539 = vmatmul.bf16.vlgmr.msrb.gmra.mxu1 %v1385_v26 }
 0x7a6   : > { %v1367_v27 = vpop.f32.mrf.mxu2  ;;  %v1380_v28 = vpop.f32.mrf.mxu3 }
 0x822   : > { %v1527_v30 = vpop.f32.mrf.mxu0  ;;  %v1540_v31 = vpop.f32.mrf.mxu1 }
 0x823   : > { %v1528_v32 = vadd.f32 %v2169_v29, %v1527_v30 }
 0x825   : > { %v1541_v33 = vadd.f32 %v1540_v31, %v1528_v32 }
 0x827   : > { %v1544_v34 = vadd.f32 %v1541_v33, %v1252_v11 }
 0x829   : > { %1547 = vadd.xlane.f32.xlu2 %v1544_v34 }
 0x82a   : > { %v1529_v35 = vpop.f32.mrf.mxu0  ;;  %v1542_v36 = vpop.f32.mrf.mxu1 }
 0x89c   : > { %v1548_v37 = vpop.xlane.xlu2 %1547 }
 0x89d   : > { %v1549_v38 = vmul.f32 %v1548_v37, %v2643_v0 }
 0x89f   : > { %v1550_v39 = vsub.f32 %v1544_v34, %v1549_v38 }
 0x8a1   : > { %v1551_v40 = vmul.f32 %v1550_v39, %v1550_v39 }
 0x8a3   : > { %1552 = vadd.xlane.f32.xlu2 %v1551_v40 }
 0x916   : > { %v1553_v41 = vpop.xlane.xlu2 %1552 }
 0x917   : > { %v1554_v42 = vmul.f32 %v1553_v41, %v2643_v0  ;;  %v2171_v0 = vld [vmem:[%s2724_s0] ss:$0 sm:$0xff] }
 0x919   : > { %v1555_v43 = vadd.f32 1e-05, %v1554_v42 }
 0x91b   : > { %2180 = vrsqrt.f32 %v1555_v43  ;;  %vm1562_vm10 = vweird.f32 %v1555_v43 }
 0x921   : > { %v2181_v44 = vpop.eup %2180 }
 0x922   : > { %v1557_v45 = vmul.f32 %v2181_v44, %v1555_v43  ;;  %vm1563_vm9 = vweird.f32 %v2181_v44 }
 0x923   : > { %vm1564_vm11 = vmor %vm1562_vm10, %vm1563_vm9 }
 0x924   : > { %v1558_v46 = vmul.f32 %v2181_v44, %v1557_v45 }
 0x926   : > { %v1559_v47 = vmul.f32 0.5, %v1558_v46 }
 0x928   : > { %v1560_v48 = vsub.f32 1.5, %v1559_v47 }
 0x92a   : > { %v1561_v49 = vmul.f32 %v2181_v44, %v1560_v48 }
 0x92c   : > { %v1565_v51 = vsel %vm1564_vm11, %v2181_v44, %v1561_v49 }
 0x92d   : > { %v1566_v52 = vmul.f32 %v1565_v51, %v1550_v39 }
 0x92f   : > { %v1570_v53 = vmul.f32 %v2170_v50, %v1566_v52 }
 0x931   : > { %v1574_v54 = vadd.f32 %v2171_v0, %v1570_v53 }
 0x933   : > { %v1575_v55 = vpack.c.bf16 %v1574_v54, %v1574_v54 }
 0x935   : > { %1576 = vst [vmem:[%s674_s27] sm:$0xf] %v1575_v55 }
 0x936 PF: > { %s2725_s20 = sld [smem:[#allocation20_spill]]  ;;  %s2726_s28 = smov %s2376_s29 }
 0x937   : > { %s2727_s29 = smov %s2729_s5 }
 0x93c   : > { %s38_s0 = sadd.s32 1, %s2725_s20  }
 0x93d   : > { %p35_p9 = scmp.ge.s32.totalorder %s38_s0, 4  }
 0x93f   :  { %37 = sbr.rel (!%p35_p9) target bundleno = 23 (0x17), region = 155 }
 0x944   :  { %1602 = vsyncpa [#allocation9], 1 }
 0x945   :  { %1604 = vsyncpa [#allocation9 + $0x1], 1 }
 0x946   :  { %1605 = vsyncpa [#allocation11], 1 }
 0x947   :  { %1606 = vsyncpa [#allocation14], 1 }

</bundles_post_ra>
